<compile_context>
chip_gen: v7x
topology: tpu7x:2x2x1
jax: 0.10.0
libtpu: 0.0.40
codegen_flags: <defaults>
</compile_context>

<pallas_src>
import functools

import jax
import jax.numpy as jnp
import numpy as np
from jax.experimental import pallas as pl
from jax.experimental.pallas import tpu as pltpu


def _round_up(x, m):
    return ((x + m - 1) // m) * m


# ----------------------------------------------------------------------------
# Pallas kernels
# ----------------------------------------------------------------------------
def _multi_mm_kernel(*refs, n_in, relu):
    """out = act( sum_i a_i @ b_i + bias ).

    refs = (a_0..a_{n-1}, b_0..b_{n-1}, bias, out). a_i are bf16 (tm, K_i) row tiles, b_i are
    bf16 (K_i, Np) resident weight blocks, bias is f32 (1, Np). Accumulation is f32 on the MXU;
    the epilogue (bias add / ReLU / store) runs in f32 on the VPU with a lane-dense store.
    """
    a_refs = refs[:n_in]
    b_refs = refs[n_in:2 * n_in]
    c_ref = refs[2 * n_in]
    o_ref = refs[2 * n_in + 1]
    acc = jnp.dot(a_refs[0][...], b_refs[0][...], preferred_element_type=jnp.float32)
    for i in range(1, n_in):
        acc = acc + jnp.dot(a_refs[i][...], b_refs[i][...],
                            preferred_element_type=jnp.float32)
    acc = acc + c_ref[...]
    if relu:
        acc = jnp.maximum(acc, 0.0)
    o_ref[...] = acc.astype(o_ref.dtype)


def multi_mm_bias_act(a_list, b_list, bias=None, relu=False, tile_m=512):
    """Fused sum_i (M,K_i)@(K_i,N) + bias [+relu] -> (M,N) f32, tiled over M.

    * N (output channels) is zero-padded to a multiple of 128 -> lane-dense output blocks.
    * a_i / b_i go to the MXU in bf16; accumulation stays f32.
    * grid = cdiv(M, tm); for M <= tile_m a single full-dim block is used (no row padding).
    """
    M = a_list[0].shape[0]
    N = b_list[0].shape[1]
    Np = _round_up(N, 128)
    if bias is None:
        bias = jnp.zeros((N,), jnp.float32)
    bias_p = jnp.pad(bias.astype(jnp.float32).reshape(1, N), ((0, 0), (0, Np - N)))
    a_bf = [a.astype(jnp.bfloat16) for a in a_list]
    b_bf = [jnp.pad(b.astype(jnp.float32), ((0, 0), (0, Np - N))).astype(jnp.bfloat16)
            for b in b_list]
    tm = tile_m if M > tile_m else M
    n_in = len(a_list)
    in_specs = (
        [pl.BlockSpec((tm, a.shape[1]), lambda i: (i, 0)) for a in a_list]
        + [pl.BlockSpec((b.shape[0], Np), lambda i: (0, 0)) for b in b_list]
        + [pl.BlockSpec((1, Np), lambda i: (0, 0))]
    )
    out = pl.pallas_call(
        functools.partial(_multi_mm_kernel, n_in=n_in, relu=relu),
        out_shape=jax.ShapeDtypeStruct((M, Np), jnp.float32),
        grid_spec=pltpu.PrefetchScalarGridSpec(
            num_scalar_prefetch=0,
            grid=(pl.cdiv(M, tm),),
            in_specs=in_specs,
            out_specs=pl.BlockSpec((tm, Np), lambda i: (i, 0)),
        ),
        compiler_params=pltpu.CompilerParams(
            dimension_semantics=("parallel",),
            vmem_limit_bytes=48 * 1024 * 1024,
        ),
    )(*a_bf, *b_bf, bias_p)
    return out if Np == N else out[:, :N]


def mm_affine(a, b, bias=None, relu=False, tile_m=512):
    return multi_mm_bias_act([a], [b], bias=bias, relu=relu, tile_m=tile_m)


def _gap_kernel(x_ref, o_ref):
    # x_ref: [N, H*W, C] -> o_ref: [N, C] (mean over spatial)
    o_ref[...] = jnp.mean(x_ref[...], axis=1)


def global_avg_pool(x):
    """x: [N, H, W, C] -> [N, C] (AdaptiveAvgPool2d(1)); reduction done inside a Pallas kernel."""
    N, H, W, C = x.shape
    xr = x.reshape(N, H * W, C).astype(jnp.float32)
    return pl.pallas_call(
        _gap_kernel,
        out_shape=jax.ShapeDtypeStruct((N, C), jnp.float32),
    )(xr)


# ----------------------------------------------------------------------------
# Conv / bilinear wrappers (im2col + interpolation-matrix glue in JAX)
# ----------------------------------------------------------------------------
def conv2d_bn_act(x, w, scale, bias, stride=1, dilation=1, padding=0, relu=True):
    """Conv2d (no conv bias) + folded eval-BatchNorm affine + optional ReLU, NHWC.

    `x` / `w` may be lists: the inputs are treated as channel-concatenated and the conv over the
    concat is computed as a sum of per-input matmuls inside ONE Pallas kernel, so the
    concatenated tensor is never materialized in HBM. Stride is applied during im2col.
    BN scale is folded into the weight columns; the kernel epilogue is only `+bias [+relu]`.
    Matches PyTorch Conv2d(stride, padding, dilation) semantics.
    """
    xs = list(x) if isinstance(x, (list, tuple)) else [x]
    ws = list(w) if isinstance(w, (list, tuple)) else [w]
    N, H, W, _ = xs[0].shape
    KH, KW, _, Cout = ws[0].shape
    Hp, Wp = H + 2 * padding, W + 2 * padding
    Ho = (Hp - dilation * (KH - 1) - 1) // stride + 1
    Wo = (Wp - dilation * (KW - 1) - 1) // stride + 1
    a_list, b_list = [], []
    for xi, wi in zip(xs, ws):
        Cin = xi.shape[-1]
        xi = xi.astype(jnp.bfloat16)  # feed the MXU bf16; halves im2col HBM traffic
        if KH == 1 and KW == 1 and stride == 1 and padding == 0:
            patches = xi.reshape(N * H * W, Cin)
        else:
            xp = jnp.pad(xi, ((0, 0), (padding, padding), (padding, padding), (0, 0)))
            cols = []
            for kh in range(KH):
                for kw in range(KW):
                    h0 = kh * dilation
                    w0 = kw * dilation
                    cols.append(xp[:, h0:h0 + (Ho - 1) * stride + 1:stride,
                                      w0:w0 + (Wo - 1) * stride + 1:stride, :])
            # TODO(synk): im2col still materializes KH*KW shifted copies of the activation in
            # HBM; true in-kernel tap accumulation over a VMEM-resident padded tile needs
            # manual strided DMA (not expressible with BlockSpec index_maps).
            patches = jnp.concatenate(cols, axis=-1).reshape(N * Ho * Wo, KH * KW * Cin)
        a_list.append(patches)
        wmat = wi.reshape(KH * KW * Cin, Cout)
        if scale is not None:
            wmat = wmat * scale[None, :]  # fold eval-BN scale into the weight columns
        b_list.append(wmat)
    y = multi_mm_bias_act(a_list, b_list, bias, relu=relu)
    return y.reshape(N, Ho, Wo, Cout)


def _interp_matrix_np(out_size, in_size):
    """Dense 1-D bilinear interpolation matrix, align_corners=True (PyTorch semantics)."""
    if out_size == 1 or in_size == 1:
        m = np.zeros((out_size, in_size), np.float32)
        m[:, 0] = 1.0
        return m
    src = np.arange(out_size, dtype=np.float64) * (in_size - 1) / (out_size - 1)
    i0 = np.clip(np.floor(src).astype(np.int64), 0, in_size - 1)
    i1 = np.clip(i0 + 1, 0, in_size - 1)
    w1 = (src - i0).astype(np.float32)
    w0 = 1.0 - w1
    m = np.zeros((out_size, in_size), np.float32)
    m[np.arange(out_size), i0] += w0
    m[np.arange(out_size), i1] += w1
    return m


def bilinear_resize(x, Ho, Wo):
    """F.interpolate(mode='bilinear', align_corners=True), NHWC in/out.

    Fused into a single Pallas matmul with the 2-D interpolation matrix kron(Rh, Rw):
    out[(ho,wo), (n,c)] = R2d[(ho,wo), (hi,wi)] @ x[(hi,wi), (n,c)]. K = Hi*Wi is a proper MXU
    contraction dim (vs Hi / Wi alone) and only one small transpose per side remains.
    NOTE: for extreme resize factors kron(Rh, Rw) grows as (Ho*Wo, Hi*Wi); fall back to a
    separable two-pass if that ever exceeds the HBM budget.
    """
    N, Hi, Wi, C = x.shape
    r2d = jnp.asarray(np.kron(_interp_matrix_np(Ho, Hi), _interp_matrix_np(Wo, Wi)))
    xm = jnp.transpose(x.astype(jnp.bfloat16).reshape(N, Hi * Wi, C), (1, 0, 2))
    xm = xm.reshape(Hi * Wi, N * C)
    y = mm_affine(r2d, xm)                 # (Ho*Wo, N*C) f32
    y = y.reshape(Ho, Wo, N, C)
    return jnp.transpose(y, (2, 0, 1, 3))  # [N, Ho, Wo, C]


# ----------------------------------------------------------------------------
# Deterministic synthetic parameters (conv weight + folded eval-BN affine)
# ----------------------------------------------------------------------------
def conv_bn_params(key, kh, kw, cin, cout):
    k1, k2, k3, k4, k5 = jax.random.split(key, 5)
    w = jax.random.normal(k1, (kh, kw, cin, cout), jnp.float32) / np.sqrt(kh * kw * cin)
    gamma = 1.0 + 0.1 * jax.random.normal(k2, (cout,), jnp.float32)
    beta = 0.1 * jax.random.normal(k3, (cout,), jnp.float32)
    run_mean = 0.1 * jax.random.normal(k4, (cout,), jnp.float32)
    run_var = 1.0 + 0.1 * jax.random.uniform(k5, (cout,), jnp.float32)
    eps = 1e-5
    scale = gamma / jnp.sqrt(run_var + eps)
    bias = beta - run_mean * scale
    return w, scale, bias


def conv_bias_params(key, kh, kw, cin, cout):
    k1, k2 = jax.random.split(key)
    w = jax.random.normal(k1, (kh, kw, cin, cout), jnp.float32) / np.sqrt(kh * kw * cin)
    b = 0.1 * jax.random.normal(k2, (cout,), jnp.float32)
    return w, b


def build_params(key):
    keys = jax.random.split(key, 14)
    p = {}
    # Simplified backbone (stride-16 high-level feature, stride-4 low-level feature)
    p["stem1"] = conv_bn_params(keys[0], 3, 3, 3, 8)     # /2
    p["stem2"] = conv_bn_params(keys[1], 3, 3, 8, 16)    # /4  -> low_level_feat
    p["layer3"] = conv_bn_params(keys[2], 3, 3, 16, 24)  # /8
    p["layer4"] = conv_bn_params(keys[3], 3, 3, 24, 32)  # /16 -> x
    # ASPP (output_stride=16 -> dilations 1, 6, 12, 18 + image pooling branch)
    p["aspp0"] = conv_bn_params(keys[4], 1, 1, 32, 16)
    p["aspp1"] = conv_bn_params(keys[5], 3, 3, 32, 16)
    p["aspp2"] = conv_bn_params(keys[6], 3, 3, 32, 16)
    p["aspp3"] = conv_bn_params(keys[7], 3, 3, 32, 16)
    p["aspp_pool"] = conv_bn_params(keys[8], 1, 1, 32, 16)
    p["aspp_proj"] = conv_bn_params(keys[9], 1, 1, 80, 16)
    # Decoder
    p["dec_low"] = conv_bn_params(keys[10], 1, 1, 16, 8)
    p["dec_conv1"] = conv_bn_params(keys[11], 3, 3, 24, 16)
    p["dec_conv2"] = conv_bn_params(keys[12], 3, 3, 16, 16)
    p["classifier"] = conv_bias_params(keys[13], 1, 1, 16, 21)  # num_classes=21
    return p


# ----------------------------------------------------------------------------
# DeepLab forward
# ----------------------------------------------------------------------------
def deeplab_forward(p, x_nchw):
    x = jnp.transpose(x_nchw, (0, 2, 3, 1)).astype(jnp.float32)  # NCHW -> NHWC

    # ---- backbone: x (stride 16), low_level_feat (stride 4) ----
    h = conv2d_bn_act(x, *p["stem1"], stride=2, padding=1)
    h = conv2d_bn_act(h, *p["stem2"], stride=2, padding=1)
    low_level_feat = h
    h = conv2d_bn_act(h, *p["layer3"], stride=2, padding=1)
    h = conv2d_bn_act(h, *p["layer4"], stride=2, padding=1)

    # ---- ASPP ----
    b0 = conv2d_bn_act(h, *p["aspp0"])
    b1 = conv2d_bn_act(h, *p["aspp1"], dilation=6, padding=6)
    b2 = conv2d_bn_act(h, *p["aspp2"], dilation=12, padding=12)
    b3 = conv2d_bn_act(h, *p["aspp3"], dilation=18, padding=18)
    N, Hf, Wf, _ = h.shape
    pooled = global_avg_pool(h)                                   # [N, C]
    wp, sp, bp = p["aspp_pool"]
    b4 = mm_affine(pooled, wp.reshape(wp.shape[2], wp.shape[3]) * sp[None, :], bp, relu=True)
    # upsampling a 1x1 pooled map with bilinear == broadcast
    b4 = jnp.broadcast_to(b4[:, None, None, :], (N, Hf, Wf, b4.shape[-1]))
    # fused concat + 1x1 proj: one kernel accumulates one matmul per branch (no 80-ch concat)
    wj, sj, bj = p["aspp_proj"]
    branches = [b0, b1, b2, b3, b4]
    w_parts, off = [], 0
    for br in branches:
        c = br.shape[-1]
        w_parts.append(wj[:, :, off:off + c, :])
        off += c
    h = conv2d_bn_act(branches, w_parts, sj, bj)                  # dropout(0.5): identity (eval)

    # ---- decoder ----
    low = conv2d_bn_act(low_level_feat, *p["dec_low"])
    h = bilinear_resize(h, low.shape[1], low.shape[2])            # align_corners=True
    # fused concat + 3x3 conv: sum of two matmuls inside one kernel (no 24-ch concat)
    w1, s1, c1 = p["dec_conv1"]
    ch = h.shape[-1]
    h = conv2d_bn_act([h, low], [w1[:, :, :ch, :], w1[:, :, ch:, :]], s1, c1, padding=1)
    h = conv2d_bn_act(h, *p["dec_conv2"], padding=1)              # dropout(0.1): identity
    wc, bc = p["classifier"]
    h = conv2d_bn_act(h, wc, None, bc, relu=False)

    # ---- final bilinear upsample to input size, align_corners=True ----
    h = bilinear_resize(h, x.shape[1], x.shape[2])
    return jnp.transpose(h, (0, 3, 1, 2))  # NHWC -> NCHW


if __name__ == "__main__":
    key = jax.random.PRNGKey(0)
    pkey, xkey = jax.random.split(key)
    params = build_params(pkey)
    # PyTorch DeepLab takes NCHW RGB input; small spatial 32 -> stride-16 feature is 2x2.
    x = jax.random.normal(xkey, (2, 3, 32, 32), jnp.float32)
    out = jax.jit(deeplab_forward)(params, x)
    out = jax.block_until_ready(out)
    assert out.shape == (2, 21, 32, 32), out.shape
    assert bool(jnp.all(jnp.isfinite(out)))
    print("KERNEL_OK")
</pallas_src>

<mosaic_0001>
module attributes {stable_mosaic.version = 11 : i64} {
  func.func @_multi_mm_kernel(%arg0: i32, %arg1: memref<512x27xbf16, #tpu.memory_space<vmem>>, %arg2: memref<27x128xbf16, #tpu.memory_space<vmem>>, %arg3: memref<1x128xf32, #tpu.memory_space<vmem>>, %arg4: memref<512x128xf32, #tpu.memory_space<vmem>>) attributes {dimension_semantics = [#tpu.dimension_semantics<parallel>], iteration_bounds = array<i64: 1>, scalar_prefetch = 0 : i64, scratch_operands = 0 : i64, tpu.core_type = #tpu.core_type<tc>, window_params = [{transform_indices = @transform_0, window_bounds = array<i64: 512, 27>}, {pipeline_mode = #tpu.pipeline_mode<synchronous>, transform_indices = @transform_1, window_bounds = array<i64: 27, 128>}, {pipeline_mode = #tpu.pipeline_mode<synchronous>, transform_indices = @transform_2, window_bounds = array<i64: 1, 128>}, {transform_indices = @transform_3, window_bounds = array<i64: 512, 128>}]} {
    %c0 = arith.constant 0 : index
    %c0_0 = arith.constant 0 : index
    %0 = vector.load %arg1[%c0, %c0_0] : memref<512x27xbf16, #tpu.memory_space<vmem>>, vector<512x27xbf16>
    %c0_1 = arith.constant 0 : index
    %c0_2 = arith.constant 0 : index
    %1 = vector.load %arg2[%c0_1, %c0_2] : memref<27x128xbf16, #tpu.memory_space<vmem>>, vector<27x128xbf16>
    %cst = arith.constant dense<0.000000e+00> : vector<512x128xf32>
    %2 = tpu.matmul %0, %1, %cst {dimension_numbers = #tpu.dot_dimension_numbers<[1], [0], [0], [1], [0, 0, 1, 1], [], []>} : vector<512x27xbf16>, vector<27x128xbf16>, vector<512x128xf32> -> vector<512x128xf32>
    %c0_3 = arith.constant 0 : index
    %c0_4 = arith.constant 0 : index
    %3 = vector.load %arg3[%c0_3, %c0_4] : memref<1x128xf32, #tpu.memory_space<vmem>>, vector<1x128xf32>
    %4 = vector.broadcast %3 : vector<1x128xf32> to vector<512x128xf32>
    %5 = arith.addf %2, %4 : vector<512x128xf32>
    %cst_5 = arith.constant 0.000000e+00 : f32
    %6 = vector.broadcast %cst_5 : f32 to vector<512x128xf32>
    %7 = arith.maximumf %5, %6 : vector<512x128xf32>
    %c0_6 = arith.constant 0 : index
    %c0_7 = arith.constant 0 : index
    %8 = vector.load %arg4[%c0_6, %c0_7] : memref<512x128xf32, #tpu.memory_space<vmem>>, vector<512x128xf32>
    tpu.vector_store %arg4[%c0_6, %c0_7], %7 {strides = array<i32>} : memref<512x128xf32, #tpu.memory_space<vmem>>, vector<512x128xf32>,
    return
  }
  func.func @transform_0(%arg0: i32) -> (i32, i32) {
    %c0_i32 = arith.constant 0 : i32
    %c0_i32_0 = arith.constant 0 : i32
    return %arg0, %c0_i32 : i32, i32
  }
  func.func @transform_1(%arg0: i32) -> (i32, i32) {
    %c0_i32 = arith.constant 0 : i32
    %c0_i32_0 = arith.constant 0 : i32
    %c0_i32_1 = arith.constant 0 : i32
    return %c0_i32, %c0_i32_0 : i32, i32
  }
  func.func @transform_2(%arg0: i32) -> (i32, i32) {
    %c0_i32 = arith.constant 0 : i32
    %c0_i32_0 = arith.constant 0 : i32
    %c0_i32_1 = arith.constant 0 : i32
    return %c0_i32, %c0_i32_0 : i32, i32
  }
  func.func @transform_3(%arg0: i32) -> (i32, i32) {
    %c0_i32 = arith.constant 0 : i32
    %c0_i32_0 = arith.constant 0 : i32
    return %arg0, %c0_i32 : i32, i32
  }
}

module attributes {stable_mosaic.version = 11 : i64} {
  func.func @_multi_mm_kernel(%arg0: i32, %arg1: memref<128x72xbf16, #tpu.memory_space<vmem>>, %arg2: memref<72x128xbf16, #tpu.memory_space<vmem>>, %arg3: memref<1x128xf32, #tpu.memory_space<vmem>>, %arg4: memref<128x128xf32, #tpu.memory_space<vmem>>) attributes {dimension_semantics = [#tpu.dimension_semantics<parallel>], iteration_bounds = array<i64: 1>, scalar_prefetch = 0 : i64, scratch_operands = 0 : i64, tpu.core_type = #tpu.core_type<tc>, window_params = [{transform_indices = @transform_0, window_bounds = array<i64: 128, 72>}, {pipeline_mode = #tpu.pipeline_mode<synchronous>, transform_indices = @transform_1, window_bounds = array<i64: 72, 128>}, {pipeline_mode = #tpu.pipeline_mode<synchronous>, transform_indices = @transform_2, window_bounds = array<i64: 1, 128>}, {transform_indices = @transform_3, window_bounds = array<i64: 128, 128>}]} {
    %c0 = arith.constant 0 : index
    %c0_0 = arith.constant 0 : index
    %0 = vector.load %arg1[%c0, %c0_0] : memref<128x72xbf16, #tpu.memory_space<vmem>>, vector<128x72xbf16>
    %c0_1 = arith.constant 0 : index
    %c0_2 = arith.constant 0 : index
    %1 = vector.load %arg2[%c0_1, %c0_2] : memref<72x128xbf16, #tpu.memory_space<vmem>>, vector<72x128xbf16>
    %cst = arith.constant dense<0.000000e+00> : vector<128x128xf32>
    %2 = tpu.matmul %0, %1, %cst {dimension_numbers = #tpu.dot_dimension_numbers<[1], [0], [0], [1], [0, 0, 1, 1], [], []>} : vector<128x72xbf16>, vector<72x128xbf16>, vector<128x128xf32> -> vector<128x128xf32>
    %c0_3 = arith.constant 0 : index
    %c0_4 = arith.constant 0 : index
    %3 = vector.load %arg3[%c0_3, %c0_4] : memref<1x128xf32, #tpu.memory_space<vmem>>, vector<1x128xf32>
    %4 = vector.broadcast %3 : vector<1x128xf32> to vector<128x128xf32>
    %5 = arith.addf %2, %4 : vector<128x128xf32>
    %cst_5 = arith.constant 0.000000e+00 : f32
    %6 = vector.broadcast %cst_5 : f32 to vector<128x128xf32>
    %7 = arith.maximumf %5, %6 : vector<128x128xf32>
    %c0_6 = arith.constant 0 : index
    %c0_7 = arith.constant 0 : index
    %8 = vector.load %arg4[%c0_6, %c0_7] : memref<128x128xf32, #tpu.memory_space<vmem>>, vector<128x128xf32>
    tpu.vector_store %arg4[%c0_6, %c0_7], %7 {strides = array<i32>} : memref<128x128xf32, #tpu.memory_space<vmem>>, vector<128x128xf32>,
    return
  }
  func.func @transform_0(%arg0: i32) -> (i32, i32) {
    %c0_i32 = arith.constant 0 : i32
    %c0_i32_0 = arith.constant 0 : i32
    return %arg0, %c0_i32 : i32, i32
  }
  func.func @transform_1(%arg0: i32) -> (i32, i32) {
    %c0_i32 = arith.constant 0 : i32
    %c0_i32_0 = arith.constant 0 : i32
    %c0_i32_1 = arith.constant 0 : i32
    return %c0_i32, %c0_i32_0 : i32, i32
  }
  func.func @transform_2(%arg0: i32) -> (i32, i32) {
    %c0_i32 = arith.constant 0 : i32
    %c0_i32_0 = arith.constant 0 : i32
    %c0_i32_1 = arith.constant 0 : i32
    return %c0_i32, %c0_i32_0 : i32, i32
  }
  func.func @transform_3(%arg0: i32) -> (i32, i32) {
    %c0_i32 = arith.constant 0 : i32
    %c0_i32_0 = arith.constant 0 : i32
    return %arg0, %c0_i32 : i32, i32
  }
}

module attributes {stable_mosaic.version = 11 : i64} {
  func.func @_multi_mm_kernel(%arg0: i32, %arg1: memref<128x16xbf16, #tpu.memory_space<vmem>>, %arg2: memref<16x128xbf16, #tpu.memory_space<vmem>>, %arg3: memref<1x128xf32, #tpu.memory_space<vmem>>, %arg4: memref<128x128xf32, #tpu.memory_space<vmem>>) attributes {dimension_semantics = [#tpu.dimension_semantics<parallel>], iteration_bounds = array<i64: 1>, scalar_prefetch = 0 : i64, scratch_operands = 0 : i64, tpu.core_type = #tpu.core_type<tc>, window_params = [{transform_indices = @transform_0, window_bounds = array<i64: 128, 16>}, {pipeline_mode = #tpu.pipeline_mode<synchronous>, transform_indices = @transform_1, window_bounds = array<i64: 16, 128>}, {pipeline_mode = #tpu.pipeline_mode<synchronous>, transform_indices = @transform_2, window_bounds = array<i64: 1, 128>}, {transform_indices = @transform_3, window_bounds = array<i64: 128, 128>}]} {
    %c0 = arith.constant 0 : index
    %c0_0 = arith.constant 0 : index
    %0 = vector.load %arg1[%c0, %c0_0] : memref<128x16xbf16, #tpu.memory_space<vmem>>, vector<128x16xbf16>
    %c0_1 = arith.constant 0 : index
    %c0_2 = arith.constant 0 : index
    %1 = vector.load %arg2[%c0_1, %c0_2] : memref<16x128xbf16, #tpu.memory_space<vmem>>, vector<16x128xbf16>
    %cst = arith.constant dense<0.000000e+00> : vector<128x128xf32>
    %2 = tpu.matmul %0, %1, %cst {dimension_numbers = #tpu.dot_dimension_numbers<[1], [0], [0], [1], [0, 0, 1, 1], [], []>} : vector<128x16xbf16>, vector<16x128xbf16>, vector<128x128xf32> -> vector<128x128xf32>
    %c0_3 = arith.constant 0 : index
    %c0_4 = arith.constant 0 : index
    %3 = vector.load %arg3[%c0_3, %c0_4] : memref<1x128xf32, #tpu.memory_space<vmem>>, vector<1x128xf32>
    %4 = vector.broadcast %3 : vector<1x128xf32> to vector<128x128xf32>
    %5 = arith.addf %2, %4 : vector<128x128xf32>
    %cst_5 = arith.constant 0.000000e+00 : f32
    %6 = vector.broadcast %cst_5 : f32 to vector<128x128xf32>
    %7 = arith.maximumf %5, %6 : vector<128x128xf32>
    %c0_6 = arith.constant 0 : index
    %c0_7 = arith.constant 0 : index
    %8 = vector.load %arg4[%c0_6, %c0_7] : memref<128x128xf32, #tpu.memory_space<vmem>>, vector<128x128xf32>
    tpu.vector_store %arg4[%c0_6, %c0_7], %7 {strides = array<i32>} : memref<128x128xf32, #tpu.memory_space<vmem>>, vector<128x128xf32>,
    return
  }
  func.func @transform_0(%arg0: i32) -> (i32, i32) {
    %c0_i32 = arith.constant 0 : i32
    %c0_i32_0 = arith.constant 0 : i32
    return %arg0, %c0_i32 : i32, i32
  }
  func.func @transform_1(%arg0: i32) -> (i32, i32) {
    %c0_i32 = arith.constant 0 : i32
    %c0_i32_0 = arith.constant 0 : i32
    %c0_i32_1 = arith.constant 0 : i32
    return %c0_i32, %c0_i32_0 : i32, i32
  }
  func.func @transform_2(%arg0: i32) -> (i32, i32) {
    %c0_i32 = arith.constant 0 : i32
    %c0_i32_0 = arith.constant 0 : i32
    %c0_i32_1 = arith.constant 0 : i32
    return %c0_i32, %c0_i32_0 : i32, i32
  }
  func.func @transform_3(%arg0: i32) -> (i32, i32) {
    %c0_i32 = arith.constant 0 : i32
    %c0_i32_0 = arith.constant 0 : i32
    return %arg0, %c0_i32 : i32, i32
  }
}

module attributes {stable_mosaic.version = 11 : i64} {
  func.func @_multi_mm_kernel(%arg0: i32, %arg1: memref<32x144xbf16, #tpu.memory_space<vmem>>, %arg2: memref<144x128xbf16, #tpu.memory_space<vmem>>, %arg3: memref<1x128xf32, #tpu.memory_space<vmem>>, %arg4: memref<32x128xf32, #tpu.memory_space<vmem>>) attributes {dimension_semantics = [#tpu.dimension_semantics<parallel>], iteration_bounds = array<i64: 1>, scalar_prefetch = 0 : i64, scratch_operands = 0 : i64, tpu.core_type = #tpu.core_type<tc>, window_params = [{transform_indices = @transform_0, window_bounds = array<i64: 32, 144>}, {pipeline_mode = #tpu.pipeline_mode<synchronous>, transform_indices = @transform_1, window_bounds = array<i64: 144, 128>}, {pipeline_mode = #tpu.pipeline_mode<synchronous>, transform_indices = @transform_2, window_bounds = array<i64: 1, 128>}, {transform_indices = @transform_3, window_bounds = array<i64: 32, 128>}]} {
    %c0 = arith.constant 0 : index
    %c0_0 = arith.constant 0 : index
    %0 = vector.load %arg1[%c0, %c0_0] : memref<32x144xbf16, #tpu.memory_space<vmem>>, vector<32x144xbf16>
    %c0_1 = arith.constant 0 : index
    %c0_2 = arith.constant 0 : index
    %1 = vector.load %arg2[%c0_1, %c0_2] : memref<144x128xbf16, #tpu.memory_space<vmem>>, vector<144x128xbf16>
    %cst = arith.constant dense<0.000000e+00> : vector<32x128xf32>
    %2 = tpu.matmul %0, %1, %cst {dimension_numbers = #tpu.dot_dimension_numbers<[1], [0], [0], [1], [0, 0, 1, 1], [], []>} : vector<32x144xbf16>, vector<144x128xbf16>, vector<32x128xf32> -> vector<32x128xf32>
    %c0_3 = arith.constant 0 : index
    %c0_4 = arith.constant 0 : index
    %3 = vector.load %arg3[%c0_3, %c0_4] : memref<1x128xf32, #tpu.memory_space<vmem>>, vector<1x128xf32>
    %4 = vector.broadcast %3 : vector<1x128xf32> to vector<32x128xf32>
    %5 = arith.addf %2, %4 : vector<32x128xf32>
    %cst_5 = arith.constant 0.000000e+00 : f32
    %6 = vector.broadcast %cst_5 : f32 to vector<32x128xf32>
    %7 = arith.maximumf %5, %6 : vector<32x128xf32>
    %c0_6 = arith.constant 0 : index
    %c0_7 = arith.constant 0 : index
    %8 = vector.load %arg4[%c0_6, %c0_7] : memref<32x128xf32, #tpu.memory_space<vmem>>, vector<32x128xf32>
    tpu.vector_store %arg4[%c0_6, %c0_7], %7 {strides = array<i32>} : memref<32x128xf32, #tpu.memory_space<vmem>>, vector<32x128xf32>,
    return
  }
  func.func @transform_0(%arg0: i32) -> (i32, i32) {
    %c0_i32 = arith.constant 0 : i32
    %c0_i32_0 = arith.constant 0 : i32
    return %arg0, %c0_i32 : i32, i32
  }
  func.func @transform_1(%arg0: i32) -> (i32, i32) {
    %c0_i32 = arith.constant 0 : i32
    %c0_i32_0 = arith.constant 0 : i32
    %c0_i32_1 = arith.constant 0 : i32
    return %c0_i32, %c0_i32_0 : i32, i32
  }
  func.func @transform_2(%arg0: i32) -> (i32, i32) {
    %c0_i32 = arith.constant 0 : i32
    %c0_i32_0 = arith.constant 0 : i32
    %c0_i32_1 = arith.constant 0 : i32
    return %c0_i32, %c0_i32_0 : i32, i32
  }
  func.func @transform_3(%arg0: i32) -> (i32, i32) {
    %c0_i32 = arith.constant 0 : i32
    %c0_i32_0 = arith.constant 0 : i32
    return %arg0, %c0_i32 : i32, i32
  }
}

module attributes {stable_mosaic.version = 11 : i64} {
  func.func @_multi_mm_kernel(%arg0: i32, %arg1: memref<8x216xbf16, #tpu.memory_space<vmem>>, %arg2: memref<216x128xbf16, #tpu.memory_space<vmem>>, %arg3: memref<1x128xf32, #tpu.memory_space<vmem>>, %arg4: memref<8x128xf32, #tpu.memory_space<vmem>>) attributes {dimension_semantics = [#tpu.dimension_semantics<parallel>], iteration_bounds = array<i64: 1>, scalar_prefetch = 0 : i64, scratch_operands = 0 : i64, tpu.core_type = #tpu.core_type<tc>, window_params = [{transform_indices = @transform_0, window_bounds = array<i64: 8, 216>}, {pipeline_mode = #tpu.pipeline_mode<synchronous>, transform_indices = @transform_1, window_bounds = array<i64: 216, 128>}, {pipeline_mode = #tpu.pipeline_mode<synchronous>, transform_indices = @transform_2, window_bounds = array<i64: 1, 128>}, {transform_indices = @transform_3, window_bounds = array<i64: 8, 128>}]} {
    %c0 = arith.constant 0 : index
    %c0_0 = arith.constant 0 : index
    %0 = vector.load %arg1[%c0, %c0_0] : memref<8x216xbf16, #tpu.memory_space<vmem>>, vector<8x216xbf16>
    %c0_1 = arith.constant 0 : index
    %c0_2 = arith.constant 0 : index
    %1 = vector.load %arg2[%c0_1, %c0_2] : memref<216x128xbf16, #tpu.memory_space<vmem>>, vector<216x128xbf16>
    %cst = arith.constant dense<0.000000e+00> : vector<8x128xf32>
    %2 = tpu.matmul %0, %1, %cst {dimension_numbers = #tpu.dot_dimension_numbers<[1], [0], [0], [1], [0, 0, 1, 1], [], []>} : vector<8x216xbf16>, vector<216x128xbf16>, vector<8x128xf32> -> vector<8x128xf32>
    %c0_3 = arith.constant 0 : index
    %c0_4 = arith.constant 0 : index
    %3 = vector.load %arg3[%c0_3, %c0_4] : memref<1x128xf32, #tpu.memory_space<vmem>>, vector<1x128xf32>
    %4 = vector.broadcast %3 : vector<1x128xf32> to vector<8x128xf32>
    %5 = arith.addf %2, %4 : vector<8x128xf32>
    %cst_5 = arith.constant 0.000000e+00 : f32
    %6 = vector.broadcast %cst_5 : f32 to vector<8x128xf32>
    %7 = arith.maximumf %5, %6 : vector<8x128xf32>
    %c0_6 = arith.constant 0 : index
    %c0_7 = arith.constant 0 : index
    %8 = vector.load %arg4[%c0_6, %c0_7] : memref<8x128xf32, #tpu.memory_space<vmem>>, vector<8x128xf32>
    tpu.vector_store %arg4[%c0_6, %c0_7], %7 {strides = array<i32>} : memref<8x128xf32, #tpu.memory_space<vmem>>, vector<8x128xf32>,
    return
  }
  func.func @transform_0(%arg0: i32) -> (i32, i32) {
    %c0_i32 = arith.constant 0 : i32
    %c0_i32_0 = arith.constant 0 : i32
    return %arg0, %c0_i32 : i32, i32
  }
  func.func @transform_1(%arg0: i32) -> (i32, i32) {
    %c0_i32 = arith.constant 0 : i32
    %c0_i32_0 = arith.constant 0 : i32
    %c0_i32_1 = arith.constant 0 : i32
    return %c0_i32, %c0_i32_0 : i32, i32
  }
  func.func @transform_2(%arg0: i32) -> (i32, i32) {
    %c0_i32 = arith.constant 0 : i32
    %c0_i32_0 = arith.constant 0 : i32
    %c0_i32_1 = arith.constant 0 : i32
    return %c0_i32, %c0_i32_0 : i32, i32
  }
  func.func @transform_3(%arg0: i32) -> (i32, i32) {
    %c0_i32 = arith.constant 0 : i32
    %c0_i32_0 = arith.constant 0 : i32
    return %arg0, %c0_i32 : i32, i32
  }
}

module attributes {stable_mosaic.version = 11 : i64} {
  func.func @_multi_mm_kernel(%arg0: i32, %arg1: memref<8x288xbf16, #tpu.memory_space<vmem>>, %arg2: memref<288x128xbf16, #tpu.memory_space<vmem>>, %arg3: memref<1x128xf32, #tpu.memory_space<vmem>>, %arg4: memref<8x128xf32, #tpu.memory_space<vmem>>) attributes {dimension_semantics = [#tpu.dimension_semantics<parallel>], iteration_bounds = array<i64: 1>, scalar_prefetch = 0 : i64, scratch_operands = 0 : i64, tpu.core_type = #tpu.core_type<tc>, window_params = [{transform_indices = @transform_0, window_bounds = array<i64: 8, 288>}, {pipeline_mode = #tpu.pipeline_mode<synchronous>, transform_indices = @transform_1, window_bounds = array<i64: 288, 128>}, {pipeline_mode = #tpu.pipeline_mode<synchronous>, transform_indices = @transform_2, window_bounds = array<i64: 1, 128>}, {transform_indices = @transform_3, window_bounds = array<i64: 8, 128>}]} {
    %c0 = arith.constant 0 : index
    %c0_0 = arith.constant 0 : index
    %0 = vector.load %arg1[%c0, %c0_0] : memref<8x288xbf16, #tpu.memory_space<vmem>>, vector<8x288xbf16>
    %c0_1 = arith.constant 0 : index
    %c0_2 = arith.constant 0 : index
    %1 = vector.load %arg2[%c0_1, %c0_2] : memref<288x128xbf16, #tpu.memory_space<vmem>>, vector<288x128xbf16>
    %cst = arith.constant dense<0.000000e+00> : vector<8x128xf32>
    %2 = tpu.matmul %0, %1, %cst {dimension_numbers = #tpu.dot_dimension_numbers<[1], [0], [0], [1], [0, 0, 1, 1], [], []>} : vector<8x288xbf16>, vector<288x128xbf16>, vector<8x128xf32> -> vector<8x128xf32>
    %c0_3 = arith.constant 0 : index
    %c0_4 = arith.constant 0 : index
    %3 = vector.load %arg3[%c0_3, %c0_4] : memref<1x128xf32, #tpu.memory_space<vmem>>, vector<1x128xf32>
    %4 = vector.broadcast %3 : vector<1x128xf32> to vector<8x128xf32>
    %5 = arith.addf %2, %4 : vector<8x128xf32>
    %cst_5 = arith.constant 0.000000e+00 : f32
    %6 = vector.broadcast %cst_5 : f32 to vector<8x128xf32>
    %7 = arith.maximumf %5, %6 : vector<8x128xf32>
    %c0_6 = arith.constant 0 : index
    %c0_7 = arith.constant 0 : index
    %8 = vector.load %arg4[%c0_6, %c0_7] : memref<8x128xf32, #tpu.memory_space<vmem>>, vector<8x128xf32>
    tpu.vector_store %arg4[%c0_6, %c0_7], %7 {strides = array<i32>} : memref<8x128xf32, #tpu.memory_space<vmem>>, vector<8x128xf32>,
    return
  }
  func.func @transform_0(%arg0: i32) -> (i32, i32) {
    %c0_i32 = arith.constant 0 : i32
    %c0_i32_0 = arith.constant 0 : i32
    return %arg0, %c0_i32 : i32, i32
  }
  func.func @transform_1(%arg0: i32) -> (i32, i32) {
    %c0_i32 = arith.constant 0 : i32
    %c0_i32_0 = arith.constant 0 : i32
    %c0_i32_1 = arith.constant 0 : i32
    return %c0_i32, %c0_i32_0 : i32, i32
  }
  func.func @transform_2(%arg0: i32) -> (i32, i32) {
    %c0_i32 = arith.constant 0 : i32
    %c0_i32_0 = arith.constant 0 : i32
    %c0_i32_1 = arith.constant 0 : i32
    return %c0_i32, %c0_i32_0 : i32, i32
  }
  func.func @transform_3(%arg0: i32) -> (i32, i32) {
    %c0_i32 = arith.constant 0 : i32
    %c0_i32_0 = arith.constant 0 : i32
    return %arg0, %c0_i32 : i32, i32
  }
}

module attributes {stable_mosaic.version = 11 : i64} {
  func.func @_gap_kernel(%arg0: memref<2x4x32xf32, #tpu.memory_space<vmem>>, %arg1: memref<2x32xf32, #tpu.memory_space<vmem>>) attributes {dimension_semantics = [], scalar_prefetch = 0 : i64, scratch_operands = 0 : i64, tpu.core_type = #tpu.core_type<tc>} {
    %c0 = arith.constant 0 : index
    %c0_0 = arith.constant 0 : index
    %c0_1 = arith.constant 0 : index
    %0 = vector.load %arg0[%c0, %c0_0, %c0_1] : memref<2x4x32xf32, #tpu.memory_space<vmem>>, vector<2x4x32xf32>
    %cst = arith.constant dense<0.000000e+00> : vector<2x32xf32>
    %1 = vector.multi_reduction <add>, %0, %cst [1] : vector<2x4x32xf32> to vector<2x32xf32>
    %cst_2 = arith.constant 4.000000e+00 : f32
    %2 = vector.broadcast %cst_2 : f32 to vector<2x32xf32>
    %3 = arith.divf %1, %2 : vector<2x32xf32>
    %c0_3 = arith.constant 0 : index
    %c0_4 = arith.constant 0 : index
    %4 = vector.load %arg1[%c0_3, %c0_4] : memref<2x32xf32, #tpu.memory_space<vmem>>, vector<2x32xf32>
    tpu.vector_store %arg1[%c0_3, %c0_4], %3 {strides = array<i32>} : memref<2x32xf32, #tpu.memory_space<vmem>>, vector<2x32xf32>,
    return
  }
}

module attributes {stable_mosaic.version = 11 : i64} {
  func.func @_multi_mm_kernel(%arg0: i32, %arg1: memref<8x32xbf16, #tpu.memory_space<vmem>>, %arg2: memref<32x128xbf16, #tpu.memory_space<vmem>>, %arg3: memref<1x128xf32, #tpu.memory_space<vmem>>, %arg4: memref<8x128xf32, #tpu.memory_space<vmem>>) attributes {dimension_semantics = [#tpu.dimension_semantics<parallel>], iteration_bounds = array<i64: 1>, scalar_prefetch = 0 : i64, scratch_operands = 0 : i64, tpu.core_type = #tpu.core_type<tc>, window_params = [{transform_indices = @transform_0, window_bounds = array<i64: 8, 32>}, {pipeline_mode = #tpu.pipeline_mode<synchronous>, transform_indices = @transform_1, window_bounds = array<i64: 32, 128>}, {pipeline_mode = #tpu.pipeline_mode<synchronous>, transform_indices = @transform_2, window_bounds = array<i64: 1, 128>}, {transform_indices = @transform_3, window_bounds = array<i64: 8, 128>}]} {
    %c0 = arith.constant 0 : index
    %c0_0 = arith.constant 0 : index
    %0 = vector.load %arg1[%c0, %c0_0] : memref<8x32xbf16, #tpu.memory_space<vmem>>, vector<8x32xbf16>
    %c0_1 = arith.constant 0 : index
    %c0_2 = arith.constant 0 : index
    %1 = vector.load %arg2[%c0_1, %c0_2] : memref<32x128xbf16, #tpu.memory_space<vmem>>, vector<32x128xbf16>
    %cst = arith.constant dense<0.000000e+00> : vector<8x128xf32>
    %2 = tpu.matmul %0, %1, %cst {dimension_numbers = #tpu.dot_dimension_numbers<[1], [0], [0], [1], [0, 0, 1, 1], [], []>} : vector<8x32xbf16>, vector<32x128xbf16>, vector<8x128xf32> -> vector<8x128xf32>
    %c0_3 = arith.constant 0 : index
    %c0_4 = arith.constant 0 : index
    %3 = vector.load %arg3[%c0_3, %c0_4] : memref<1x128xf32, #tpu.memory_space<vmem>>, vector<1x128xf32>
    %4 = vector.broadcast %3 : vector<1x128xf32> to vector<8x128xf32>
    %5 = arith.addf %2, %4 : vector<8x128xf32>
    %cst_5 = arith.constant 0.000000e+00 : f32
    %6 = vector.broadcast %cst_5 : f32 to vector<8x128xf32>
    %7 = arith.maximumf %5, %6 : vector<8x128xf32>
    %c0_6 = arith.constant 0 : index
    %c0_7 = arith.constant 0 : index
    %8 = vector.load %arg4[%c0_6, %c0_7] : memref<8x128xf32, #tpu.memory_space<vmem>>, vector<8x128xf32>
    tpu.vector_store %arg4[%c0_6, %c0_7], %7 {strides = array<i32>} : memref<8x128xf32, #tpu.memory_space<vmem>>, vector<8x128xf32>,
    return
  }
  func.func @transform_0(%arg0: i32) -> (i32, i32) {
    %c0_i32 = arith.constant 0 : i32
    %c0_i32_0 = arith.constant 0 : i32
    return %arg0, %c0_i32 : i32, i32
  }
  func.func @transform_1(%arg0: i32) -> (i32, i32) {
    %c0_i32 = arith.constant 0 : i32
    %c0_i32_0 = arith.constant 0 : i32
    %c0_i32_1 = arith.constant 0 : i32
    return %c0_i32, %c0_i32_0 : i32, i32
  }
  func.func @transform_2(%arg0: i32) -> (i32, i32) {
    %c0_i32 = arith.constant 0 : i32
    %c0_i32_0 = arith.constant 0 : i32
    %c0_i32_1 = arith.constant 0 : i32
    return %c0_i32, %c0_i32_0 : i32, i32
  }
  func.func @transform_3(%arg0: i32) -> (i32, i32) {
    %c0_i32 = arith.constant 0 : i32
    %c0_i32_0 = arith.constant 0 : i32
    return %arg0, %c0_i32 : i32, i32
  }
}

module attributes {stable_mosaic.version = 11 : i64} {
  func.func @_multi_mm_kernel(%arg0: i32, %arg1: memref<2x32xbf16, #tpu.memory_space<vmem>>, %arg2: memref<32x128xbf16, #tpu.memory_space<vmem>>, %arg3: memref<1x128xf32, #tpu.memory_space<vmem>>, %arg4: memref<2x128xf32, #tpu.memory_space<vmem>>) attributes {dimension_semantics = [#tpu.dimension_semantics<parallel>], iteration_bounds = array<i64: 1>, scalar_prefetch = 0 : i64, scratch_operands = 0 : i64, tpu.core_type = #tpu.core_type<tc>, window_params = [{transform_indices = @transform_0, window_bounds = array<i64: 2, 32>}, {pipeline_mode = #tpu.pipeline_mode<synchronous>, transform_indices = @transform_1, window_bounds = array<i64: 32, 128>}, {pipeline_mode = #tpu.pipeline_mode<synchronous>, transform_indices = @transform_2, window_bounds = array<i64: 1, 128>}, {transform_indices = @transform_3, window_bounds = array<i64: 2, 128>}]} {
    %c0 = arith.constant 0 : index
    %c0_0 = arith.constant 0 : index
    %0 = vector.load %arg1[%c0, %c0_0] : memref<2x32xbf16, #tpu.memory_space<vmem>>, vector<2x32xbf16>
    %c0_1 = arith.constant 0 : index
    %c0_2 = arith.constant 0 : index
    %1 = vector.load %arg2[%c0_1, %c0_2] : memref<32x128xbf16, #tpu.memory_space<vmem>>, vector<32x128xbf16>
    %cst = arith.constant dense<0.000000e+00> : vector<2x128xf32>
    %2 = tpu.matmul %0, %1, %cst {dimension_numbers = #tpu.dot_dimension_numbers<[1], [0], [0], [1], [0, 0, 1, 1], [], []>} : vector<2x32xbf16>, vector<32x128xbf16>, vector<2x128xf32> -> vector<2x128xf32>
    %c0_3 = arith.constant 0 : index
    %c0_4 = arith.constant 0 : index
    %3 = vector.load %arg3[%c0_3, %c0_4] : memref<1x128xf32, #tpu.memory_space<vmem>>, vector<1x128xf32>
    %4 = vector.broadcast %3 : vector<1x128xf32> to vector<2x128xf32>
    %5 = arith.addf %2, %4 : vector<2x128xf32>
    %cst_5 = arith.constant 0.000000e+00 : f32
    %6 = vector.broadcast %cst_5 : f32 to vector<2x128xf32>
    %7 = arith.maximumf %5, %6 : vector<2x128xf32>
    %c0_6 = arith.constant 0 : index
    %c0_7 = arith.constant 0 : index
    %8 = vector.load %arg4[%c0_6, %c0_7] : memref<2x128xf32, #tpu.memory_space<vmem>>, vector<2x128xf32>
    tpu.vector_store %arg4[%c0_6, %c0_7], %7 {strides = array<i32>} : memref<2x128xf32, #tpu.memory_space<vmem>>, vector<2x128xf32>,
    return
  }
  func.func @transform_0(%arg0: i32) -> (i32, i32) {
    %c0_i32 = arith.constant 0 : i32
    %c0_i32_0 = arith.constant 0 : i32
    return %arg0, %c0_i32 : i32, i32
  }
  func.func @transform_1(%arg0: i32) -> (i32, i32) {
    %c0_i32 = arith.constant 0 : i32
    %c0_i32_0 = arith.constant 0 : i32
    %c0_i32_1 = arith.constant 0 : i32
    return %c0_i32, %c0_i32_0 : i32, i32
  }
  func.func @transform_2(%arg0: i32) -> (i32, i32) {
    %c0_i32 = arith.constant 0 : i32
    %c0_i32_0 = arith.constant 0 : i32
    %c0_i32_1 = arith.constant 0 : i32
    return %c0_i32, %c0_i32_0 : i32, i32
  }
  func.func @transform_3(%arg0: i32) -> (i32, i32) {
    %c0_i32 = arith.constant 0 : i32
    %c0_i32_0 = arith.constant 0 : i32
    return %arg0, %c0_i32 : i32, i32
  }
}

module attributes {stable_mosaic.version = 11 : i64} {
  func.func @_multi_mm_kernel(%arg0: i32, %arg1: memref<8x16xbf16, #tpu.memory_space<vmem>>, %arg2: memref<8x16xbf16, #tpu.memory_space<vmem>>, %arg3: memref<8x16xbf16, #tpu.memory_space<vmem>>, %arg4: memref<8x16xbf16, #tpu.memory_space<vmem>>, %arg5: memref<8x16xbf16, #tpu.memory_space<vmem>>, %arg6: memref<16x128xbf16, #tpu.memory_space<vmem>>, %arg7: memref<16x128xbf16, #tpu.memory_space<vmem>>, %arg8: memref<16x128xbf16, #tpu.memory_space<vmem>>, %arg9: memref<16x128xbf16, #tpu.memory_space<vmem>>, %arg10: memref<16x128xbf16, #tpu.memory_space<vmem>>, %arg11: memref<1x128xf32, #tpu.memory_space<vmem>>, %arg12: memref<8x128xf32, #tpu.memory_space<vmem>>) attributes {dimension_semantics = [#tpu.dimension_semantics<parallel>], iteration_bounds = array<i64: 1>, scalar_prefetch = 0 : i64, scratch_operands = 0 : i64, tpu.core_type = #tpu.core_type<tc>, window_params = [{transform_indices = @transform_0, window_bounds = array<i64: 8, 16>}, {transform_indices = @transform_1, window_bounds = array<i64: 8, 16>}, {transform_indices = @transform_2, window_bounds = array<i64: 8, 16>}, {transform_indices = @transform_3, window_bounds = array<i64: 8, 16>}, {transform_indices = @transform_4, window_bounds = array<i64: 8, 16>}, {pipeline_mode = #tpu.pipeline_mode<synchronous>, transform_indices = @transform_5, window_bounds = array<i64: 16, 128>}, {pipeline_mode = #tpu.pipeline_mode<synchronous>, transform_indices = @transform_6, window_bounds = array<i64: 16, 128>}, {pipeline_mode = #tpu.pipeline_mode<synchronous>, transform_indices = @transform_7, window_bounds = array<i64: 16, 128>}, {pipeline_mode = #tpu.pipeline_mode<synchronous>, transform_indices = @transform_8, window_bounds = array<i64: 16, 128>}, {pipeline_mode = #tpu.pipeline_mode<synchronous>, transform_indices = @transform_9, window_bounds = array<i64: 16, 128>}, {pipeline_mode = #tpu.pipeline_mode<synchronous>, transform_indices = @transform_10, window_bounds = array<i64: 1, 128>}, {transform_indices = @transform_11, window_bounds = array<i64: 8, 128>}]} {
    %c0 = arith.constant 0 : index
    %c0_0 = arith.constant 0 : index
    %0 = vector.load %arg1[%c0, %c0_0] : memref<8x16xbf16, #tpu.memory_space<vmem>>, vector<8x16xbf16>
    %c0_1 = arith.constant 0 : index
    %c0_2 = arith.constant 0 : index
    %1 = vector.load %arg6[%c0_1, %c0_2] : memref<16x128xbf16, #tpu.memory_space<vmem>>, vector<16x128xbf16>
    %cst = arith.constant dense<0.000000e+00> : vector<8x128xf32>
    %2 = tpu.matmul %0, %1, %cst {dimension_numbers = #tpu.dot_dimension_numbers<[1], [0], [0], [1], [0, 0, 1, 1], [], []>} : vector<8x16xbf16>, vector<16x128xbf16>, vector<8x128xf32> -> vector<8x128xf32>
    %c0_3 = arith.constant 0 : index
    %c0_4 = arith.constant 0 : index
    %3 = vector.load %arg2[%c0_3, %c0_4] : memref<8x16xbf16, #tpu.memory_space<vmem>>, vector<8x16xbf16>
    %c0_5 = arith.constant 0 : index
    %c0_6 = arith.constant 0 : index
    %4 = vector.load %arg7[%c0_5, %c0_6] : memref<16x128xbf16, #tpu.memory_space<vmem>>, vector<16x128xbf16>
    %cst_7 = arith.constant dense<0.000000e+00> : vector<8x128xf32>
    %5 = tpu.matmul %3, %4, %cst_7 {dimension_numbers = #tpu.dot_dimension_numbers<[1], [0], [0], [1], [0, 0, 1, 1], [], []>} : vector<8x16xbf16>, vector<16x128xbf16>, vector<8x128xf32> -> vector<8x128xf32>
    %6 = arith.addf %2, %5 : vector<8x128xf32>
    %c0_8 = arith.constant 0 : index
    %c0_9 = arith.constant 0 : index
    %7 = vector.load %arg3[%c0_8, %c0_9] : memref<8x16xbf16, #tpu.memory_space<vmem>>, vector<8x16xbf16>
    %c0_10 = arith.constant 0 : index
    %c0_11 = arith.constant 0 : index
    %8 = vector.load %arg8[%c0_10, %c0_11] : memref<16x128xbf16, #tpu.memory_space<vmem>>, vector<16x128xbf16>
    %cst_12 = arith.constant dense<0.000000e+00> : vector<8x128xf32>
    %9 = tpu.matmul %7, %8, %cst_12 {dimension_numbers = #tpu.dot_dimension_numbers<[1], [0], [0], [1], [0, 0, 1, 1], [], []>} : vector<8x16xbf16>, vector<16x128xbf16>, vector<8x128xf32> -> vector<8x128xf32>
    %10 = arith.addf %6, %9 : vector<8x128xf32>
    %c0_13 = arith.constant 0 : index
    %c0_14 = arith.constant 0 : index
    %11 = vector.load %arg4[%c0_13, %c0_14] : memref<8x16xbf16, #tpu.memory_space<vmem>>, vector<8x16xbf16>
    %c0_15 = arith.constant 0 : index
    %c0_16 = arith.constant 0 : index
    %12 = vector.load %arg9[%c0_15, %c0_16] : memref<16x128xbf16, #tpu.memory_space<vmem>>, vector<16x128xbf16>
    %cst_17 = arith.constant dense<0.000000e+00> : vector<8x128xf32>
    %13 = tpu.matmul %11, %12, %cst_17 {dimension_numbers = #tpu.dot_dimension_numbers<[1], [0], [0], [1], [0, 0, 1, 1], [], []>} : vector<8x16xbf16>, vector<16x128xbf16>, vector<8x128xf32> -> vector<8x128xf32>
    %14 = arith.addf %10, %13 : vector<8x128xf32>
    %c0_18 = arith.constant 0 : index
    %c0_19 = arith.constant 0 : index
    %15 = vector.load %arg5[%c0_18, %c0_19] : memref<8x16xbf16, #tpu.memory_space<vmem>>, vector<8x16xbf16>
    %c0_20 = arith.constant 0 : index
    %c0_21 = arith.constant 0 : index
    %16 = vector.load %arg10[%c0_20, %c0_21] : memref<16x128xbf16, #tpu.memory_space<vmem>>, vector<16x128xbf16>
    %cst_22 = arith.constant dense<0.000000e+00> : vector<8x128xf32>
    %17 = tpu.matmul %15, %16, %cst_22 {dimension_numbers = #tpu.dot_dimension_numbers<[1], [0], [0], [1], [0, 0, 1, 1], [], []>} : vector<8x16xbf16>, vector<16x128xbf16>, vector<8x128xf32> -> vector<8x128xf32>
    %18 = arith.addf %14, %17 : vector<8x128xf32>
    %c0_23 = arith.constant 0 : index
    %c0_24 = arith.constant 0 : index
    %19 = vector.load %arg11[%c0_23, %c0_24] : memref<1x128xf32, #tpu.memory_space<vmem>>, vector<1x128xf32>
    %20 = vector.broadcast %19 : vector<1x128xf32> to vector<8x128xf32>
    %21 = arith.addf %18, %20 : vector<8x128xf32>
    %cst_25 = arith.constant 0.000000e+00 : f32
    %22 = vector.broadcast %cst_25 : f32 to vector<8x128xf32>
    %23 = arith.maximumf %21, %22 : vector<8x128xf32>
    %c0_26 = arith.constant 0 : index
    %c0_27 = arith.constant 0 : index
    %24 = vector.load %arg12[%c0_26, %c0_27] : memref<8x128xf32, #tpu.memory_space<vmem>>, vector<8x128xf32>
    tpu.vector_store %arg12[%c0_26, %c0_27], %23 {strides = array<i32>} : memref<8x128xf32, #tpu.memory_space<vmem>>, vector<8x128xf32>,
    return
  }
  func.func @transform_0(%arg0: i32) -> (i32, i32) {
    %c0_i32 = arith.constant 0 : i32
    %c0_i32_0 = arith.constant 0 : i32
    return %arg0, %c0_i32 : i32, i32
  }
  func.func @transform_1(%arg0: i32) -> (i32, i32) {
    %c0_i32 = arith.constant 0 : i32
    %c0_i32_0 = arith.constant 0 : i32
    return %arg0, %c0_i32 : i32, i32
  }
  func.func @transform_2(%arg0: i32) -> (i32, i32) {
    %c0_i32 = arith.constant 0 : i32
    %c0_i32_0 = arith.constant 0 : i32
    return %arg0, %c0_i32 : i32, i32
  }
  func.func @transform_3(%arg0: i32) -> (i32, i32) {
    %c0_i32 = arith.constant 0 : i32
    %c0_i32_0 = arith.constant 0 : i32
    return %arg0, %c0_i32 : i32, i32
  }
  func.func @transform_4(%arg0: i32) -> (i32, i32) {
    %c0_i32 = arith.constant 0 : i32
    %c0_i32_0 = arith.constant 0 : i32
    return %arg0, %c0_i32 : i32, i32
  }
  func.func @transform_5(%arg0: i32) -> (i32, i32) {
    %c0_i32 = arith.constant 0 : i32
    %c0_i32_0 = arith.constant 0 : i32
    %c0_i32_1 = arith.constant 0 : i32
    return %c0_i32, %c0_i32_0 : i32, i32
  }
  func.func @transform_6(%arg0: i32) -> (i32, i32) {
    %c0_i32 = arith.constant 0 : i32
    %c0_i32_0 = arith.constant 0 : i32
    %c0_i32_1 = arith.constant 0 : i32
    return %c0_i32, %c0_i32_0 : i32, i32
  }
  func.func @transform_7(%arg0: i32) -> (i32, i32) {
    %c0_i32 = arith.constant 0 : i32
    %c0_i32_0 = arith.constant 0 : i32
    %c0_i32_1 = arith.constant 0 : i32
    return %c0_i32, %c0_i32_0 : i32, i32
  }
  func.func @transform_8(%arg0: i32) -> (i32, i32) {
    %c0_i32 = arith.constant 0 : i32
    %c0_i32_0 = arith.constant 0 : i32
    %c0_i32_1 = arith.constant 0 : i32
    return %c0_i32, %c0_i32_0 : i32, i32
  }
  func.func @transform_9(%arg0: i32) -> (i32, i32) {
    %c0_i32 = arith.constant 0 : i32
    %c0_i32_0 = arith.constant 0 : i32
    %c0_i32_1 = arith.constant 0 : i32
    return %c0_i32, %c0_i32_0 : i32, i32
  }
  func.func @transform_10(%arg0: i32) -> (i32, i32) {
    %c0_i32 = arith.constant 0 : i32
    %c0_i32_0 = arith.constant 0 : i32
    %c0_i32_1 = arith.constant 0 : i32
    return %c0_i32, %c0_i32_0 : i32, i32
  }
  func.func @transform_11(%arg0: i32) -> (i32, i32) {
    %c0_i32 = arith.constant 0 : i32
    %c0_i32_0 = arith.constant 0 : i32
    return %arg0, %c0_i32 : i32, i32
  }
}

module attributes {stable_mosaic.version = 11 : i64} {
  func.func @_multi_mm_kernel(%arg0: i32, %arg1: memref<64x4xbf16, #tpu.memory_space<vmem>>, %arg2: memref<4x128xbf16, #tpu.memory_space<vmem>>, %arg3: memref<1x128xf32, #tpu.memory_space<vmem>>, %arg4: memref<64x128xf32, #tpu.memory_space<vmem>>) attributes {dimension_semantics = [#tpu.dimension_semantics<parallel>], iteration_bounds = array<i64: 1>, scalar_prefetch = 0 : i64, scratch_operands = 0 : i64, tpu.core_type = #tpu.core_type<tc>, window_params = [{transform_indices = @transform_0, window_bounds = array<i64: 64, 4>}, {pipeline_mode = #tpu.pipeline_mode<synchronous>, transform_indices = @transform_1, window_bounds = array<i64: 4, 128>}, {pipeline_mode = #tpu.pipeline_mode<synchronous>, transform_indices = @transform_2, window_bounds = array<i64: 1, 128>}, {transform_indices = @transform_3, window_bounds = array<i64: 64, 128>}]} {
    %c0 = arith.constant 0 : index
    %c0_0 = arith.constant 0 : index
    %0 = vector.load %arg1[%c0, %c0_0] : memref<64x4xbf16, #tpu.memory_space<vmem>>, vector<64x4xbf16>
    %c0_1 = arith.constant 0 : index
    %c0_2 = arith.constant 0 : index
    %1 = vector.load %arg2[%c0_1, %c0_2] : memref<4x128xbf16, #tpu.memory_space<vmem>>, vector<4x128xbf16>
    %cst = arith.constant dense<0.000000e+00> : vector<64x128xf32>
    %2 = tpu.matmul %0, %1, %cst {dimension_numbers = #tpu.dot_dimension_numbers<[1], [0], [0], [1], [0, 0, 1, 1], [], []>} : vector<64x4xbf16>, vector<4x128xbf16>, vector<64x128xf32> -> vector<64x128xf32>
    %c0_3 = arith.constant 0 : index
    %c0_4 = arith.constant 0 : index
    %3 = vector.load %arg3[%c0_3, %c0_4] : memref<1x128xf32, #tpu.memory_space<vmem>>, vector<1x128xf32>
    %4 = vector.broadcast %3 : vector<1x128xf32> to vector<64x128xf32>
    %5 = arith.addf %2, %4 : vector<64x128xf32>
    %c0_5 = arith.constant 0 : index
    %c0_6 = arith.constant 0 : index
    %6 = vector.load %arg4[%c0_5, %c0_6] : memref<64x128xf32, #tpu.memory_space<vmem>>, vector<64x128xf32>
    tpu.vector_store %arg4[%c0_5, %c0_6], %5 {strides = array<i32>} : memref<64x128xf32, #tpu.memory_space<vmem>>, vector<64x128xf32>,
    return
  }
  func.func @transform_0(%arg0: i32) -> (i32, i32) {
    %c0_i32 = arith.constant 0 : i32
    %c0_i32_0 = arith.constant 0 : i32
    return %arg0, %c0_i32 : i32, i32
  }
  func.func @transform_1(%arg0: i32) -> (i32, i32) {
    %c0_i32 = arith.constant 0 : i32
    %c0_i32_0 = arith.constant 0 : i32
    %c0_i32_1 = arith.constant 0 : i32
    return %c0_i32, %c0_i32_0 : i32, i32
  }
  func.func @transform_2(%arg0: i32) -> (i32, i32) {
    %c0_i32 = arith.constant 0 : i32
    %c0_i32_0 = arith.constant 0 : i32
    %c0_i32_1 = arith.constant 0 : i32
    return %c0_i32, %c0_i32_0 : i32, i32
  }
  func.func @transform_3(%arg0: i32) -> (i32, i32) {
    %c0_i32 = arith.constant 0 : i32
    %c0_i32_0 = arith.constant 0 : i32
    return %arg0, %c0_i32 : i32, i32
  }
}

module attributes {stable_mosaic.version = 11 : i64} {
  func.func @_multi_mm_kernel(%arg0: i32, %arg1: memref<128x144xbf16, #tpu.memory_space<vmem>>, %arg2: memref<128x72xbf16, #tpu.memory_space<vmem>>, %arg3: memref<144x128xbf16, #tpu.memory_space<vmem>>, %arg4: memref<72x128xbf16, #tpu.memory_space<vmem>>, %arg5: memref<1x128xf32, #tpu.memory_space<vmem>>, %arg6: memref<128x128xf32, #tpu.memory_space<vmem>>) attributes {dimension_semantics = [#tpu.dimension_semantics<parallel>], iteration_bounds = array<i64: 1>, scalar_prefetch = 0 : i64, scratch_operands = 0 : i64, tpu.core_type = #tpu.core_type<tc>, window_params = [{transform_indices = @transform_0, window_bounds = array<i64: 128, 144>}, {transform_indices = @transform_1, window_bounds = array<i64: 128, 72>}, {pipeline_mode = #tpu.pipeline_mode<synchronous>, transform_indices = @transform_2, window_bounds = array<i64: 144, 128>}, {pipeline_mode = #tpu.pipeline_mode<synchronous>, transform_indices = @transform_3, window_bounds = array<i64: 72, 128>}, {pipeline_mode = #tpu.pipeline_mode<synchronous>, transform_indices = @transform_4, window_bounds = array<i64: 1, 128>}, {transform_indices = @transform_5, window_bounds = array<i64: 128, 128>}]} {
    %c0 = arith.constant 0 : index
    %c0_0 = arith.constant 0 : index
    %0 = vector.load %arg1[%c0, %c0_0] : memref<128x144xbf16, #tpu.memory_space<vmem>>, vector<128x144xbf16>
    %c0_1 = arith.constant 0 : index
    %c0_2 = arith.constant 0 : index
    %1 = vector.load %arg3[%c0_1, %c0_2] : memref<144x128xbf16, #tpu.memory_space<vmem>>, vector<144x128xbf16>
    %cst = arith.constant dense<0.000000e+00> : vector<128x128xf32>
    %2 = tpu.matmul %0, %1, %cst {dimension_numbers = #tpu.dot_dimension_numbers<[1], [0], [0], [1], [0, 0, 1, 1], [], []>} : vector<128x144xbf16>, vector<144x128xbf16>, vector<128x128xf32> -> vector<128x128xf32>
    %c0_3 = arith.constant 0 : index
    %c0_4 = arith.constant 0 : index
    %3 = vector.load %arg2[%c0_3, %c0_4] : memref<128x72xbf16, #tpu.memory_space<vmem>>, vector<128x72xbf16>
    %c0_5 = arith.constant 0 : index
    %c0_6 = arith.constant 0 : index
    %4 = vector.load %arg4[%c0_5, %c0_6] : memref<72x128xbf16, #tpu.memory_space<vmem>>, vector<72x128xbf16>
    %cst_7 = arith.constant dense<0.000000e+00> : vector<128x128xf32>
    %5 = tpu.matmul %3, %4, %cst_7 {dimension_numbers = #tpu.dot_dimension_numbers<[1], [0], [0], [1], [0, 0, 1, 1], [], []>} : vector<128x72xbf16>, vector<72x128xbf16>, vector<128x128xf32> -> vector<128x128xf32>
    %6 = arith.addf %2, %5 : vector<128x128xf32>
    %c0_8 = arith.constant 0 : index
    %c0_9 = arith.constant 0 : index
    %7 = vector.load %arg5[%c0_8, %c0_9] : memref<1x128xf32, #tpu.memory_space<vmem>>, vector<1x128xf32>
    %8 = vector.broadcast %7 : vector<1x128xf32> to vector<128x128xf32>
    %9 = arith.addf %6, %8 : vector<128x128xf32>
    %cst_10 = arith.constant 0.000000e+00 : f32
    %10 = vector.broadcast %cst_10 : f32 to vector<128x128xf32>
    %11 = arith.maximumf %9, %10 : vector<128x128xf32>
    %c0_11 = arith.constant 0 : index
    %c0_12 = arith.constant 0 : index
    %12 = vector.load %arg6[%c0_11, %c0_12] : memref<128x128xf32, #tpu.memory_space<vmem>>, vector<128x128xf32>
    tpu.vector_store %arg6[%c0_11, %c0_12], %11 {strides = array<i32>} : memref<128x128xf32, #tpu.memory_space<vmem>>, vector<128x128xf32>,
    return
  }
  func.func @transform_0(%arg0: i32) -> (i32, i32) {
    %c0_i32 = arith.constant 0 : i32
    %c0_i32_0 = arith.constant 0 : i32
    return %arg0, %c0_i32 : i32, i32
  }
  func.func @transform_1(%arg0: i32) -> (i32, i32) {
    %c0_i32 = arith.constant 0 : i32
    %c0_i32_0 = arith.constant 0 : i32
    return %arg0, %c0_i32 : i32, i32
  }
  func.func @transform_2(%arg0: i32) -> (i32, i32) {
    %c0_i32 = arith.constant 0 : i32
    %c0_i32_0 = arith.constant 0 : i32
    %c0_i32_1 = arith.constant 0 : i32
    return %c0_i32, %c0_i32_0 : i32, i32
  }
  func.func @transform_3(%arg0: i32) -> (i32, i32) {
    %c0_i32 = arith.constant 0 : i32
    %c0_i32_0 = arith.constant 0 : i32
    %c0_i32_1 = arith.constant 0 : i32
    return %c0_i32, %c0_i32_0 : i32, i32
  }
  func.func @transform_4(%arg0: i32) -> (i32, i32) {
    %c0_i32 = arith.constant 0 : i32
    %c0_i32_0 = arith.constant 0 : i32
    %c0_i32_1 = arith.constant 0 : i32
    return %c0_i32, %c0_i32_0 : i32, i32
  }
  func.func @transform_5(%arg0: i32) -> (i32, i32) {
    %c0_i32 = arith.constant 0 : i32
    %c0_i32_0 = arith.constant 0 : i32
    return %arg0, %c0_i32 : i32, i32
  }
}

module attributes {stable_mosaic.version = 11 : i64} {
  func.func @_multi_mm_kernel(%arg0: i32, %arg1: memref<128x144xbf16, #tpu.memory_space<vmem>>, %arg2: memref<144x128xbf16, #tpu.memory_space<vmem>>, %arg3: memref<1x128xf32, #tpu.memory_space<vmem>>, %arg4: memref<128x128xf32, #tpu.memory_space<vmem>>) attributes {dimension_semantics = [#tpu.dimension_semantics<parallel>], iteration_bounds = array<i64: 1>, scalar_prefetch = 0 : i64, scratch_operands = 0 : i64, tpu.core_type = #tpu.core_type<tc>, window_params = [{transform_indices = @transform_0, window_bounds = array<i64: 128, 144>}, {pipeline_mode = #tpu.pipeline_mode<synchronous>, transform_indices = @transform_1, window_bounds = array<i64: 144, 128>}, {pipeline_mode = #tpu.pipeline_mode<synchronous>, transform_indices = @transform_2, window_bounds = array<i64: 1, 128>}, {transform_indices = @transform_3, window_bounds = array<i64: 128, 128>}]} {
    %c0 = arith.constant 0 : index
    %c0_0 = arith.constant 0 : index
    %0 = vector.load %arg1[%c0, %c0_0] : memref<128x144xbf16, #tpu.memory_space<vmem>>, vector<128x144xbf16>
    %c0_1 = arith.constant 0 : index
    %c0_2 = arith.constant 0 : index
    %1 = vector.load %arg2[%c0_1, %c0_2] : memref<144x128xbf16, #tpu.memory_space<vmem>>, vector<144x128xbf16>
    %cst = arith.constant dense<0.000000e+00> : vector<128x128xf32>
    %2 = tpu.matmul %0, %1, %cst {dimension_numbers = #tpu.dot_dimension_numbers<[1], [0], [0], [1], [0, 0, 1, 1], [], []>} : vector<128x144xbf16>, vector<144x128xbf16>, vector<128x128xf32> -> vector<128x128xf32>
    %c0_3 = arith.constant 0 : index
    %c0_4 = arith.constant 0 : index
    %3 = vector.load %arg3[%c0_3, %c0_4] : memref<1x128xf32, #tpu.memory_space<vmem>>, vector<1x128xf32>
    %4 = vector.broadcast %3 : vector<1x128xf32> to vector<128x128xf32>
    %5 = arith.addf %2, %4 : vector<128x128xf32>
    %cst_5 = arith.constant 0.000000e+00 : f32
    %6 = vector.broadcast %cst_5 : f32 to vector<128x128xf32>
    %7 = arith.maximumf %5, %6 : vector<128x128xf32>
    %c0_6 = arith.constant 0 : index
    %c0_7 = arith.constant 0 : index
    %8 = vector.load %arg4[%c0_6, %c0_7] : memref<128x128xf32, #tpu.memory_space<vmem>>, vector<128x128xf32>
    tpu.vector_store %arg4[%c0_6, %c0_7], %7 {strides = array<i32>} : memref<128x128xf32, #tpu.memory_space<vmem>>, vector<128x128xf32>,
    return
  }
  func.func @transform_0(%arg0: i32) -> (i32, i32) {
    %c0_i32 = arith.constant 0 : i32
    %c0_i32_0 = arith.constant 0 : i32
    return %arg0, %c0_i32 : i32, i32
  }
  func.func @transform_1(%arg0: i32) -> (i32, i32) {
    %c0_i32 = arith.constant 0 : i32
    %c0_i32_0 = arith.constant 0 : i32
    %c0_i32_1 = arith.constant 0 : i32
    return %c0_i32, %c0_i32_0 : i32, i32
  }
  func.func @transform_2(%arg0: i32) -> (i32, i32) {
    %c0_i32 = arith.constant 0 : i32
    %c0_i32_0 = arith.constant 0 : i32
    %c0_i32_1 = arith.constant 0 : i32
    return %c0_i32, %c0_i32_0 : i32, i32
  }
  func.func @transform_3(%arg0: i32) -> (i32, i32) {
    %c0_i32 = arith.constant 0 : i32
    %c0_i32_0 = arith.constant 0 : i32
    return %arg0, %c0_i32 : i32, i32
  }
}

module attributes {stable_mosaic.version = 11 : i64} {
  func.func @_multi_mm_kernel(%arg0: i32, %arg1: memref<128x16xbf16, #tpu.memory_space<vmem>>, %arg2: memref<16x128xbf16, #tpu.memory_space<vmem>>, %arg3: memref<1x128xf32, #tpu.memory_space<vmem>>, %arg4: memref<128x128xf32, #tpu.memory_space<vmem>>) attributes {dimension_semantics = [#tpu.dimension_semantics<parallel>], iteration_bounds = array<i64: 1>, scalar_prefetch = 0 : i64, scratch_operands = 0 : i64, tpu.core_type = #tpu.core_type<tc>, window_params = [{transform_indices = @transform_0, window_bounds = array<i64: 128, 16>}, {pipeline_mode = #tpu.pipeline_mode<synchronous>, transform_indices = @transform_1, window_bounds = array<i64: 16, 128>}, {pipeline_mode = #tpu.pipeline_mode<synchronous>, transform_indices = @transform_2, window_bounds = array<i64: 1, 128>}, {transform_indices = @transform_3, window_bounds = array<i64: 128, 128>}]} {
    %c0 = arith.constant 0 : index
    %c0_0 = arith.constant 0 : index
    %0 = vector.load %arg1[%c0, %c0_0] : memref<128x16xbf16, #tpu.memory_space<vmem>>, vector<128x16xbf16>
    %c0_1 = arith.constant 0 : index
    %c0_2 = arith.constant 0 : index
    %1 = vector.load %arg2[%c0_1, %c0_2] : memref<16x128xbf16, #tpu.memory_space<vmem>>, vector<16x128xbf16>
    %cst = arith.constant dense<0.000000e+00> : vector<128x128xf32>
    %2 = tpu.matmul %0, %1, %cst {dimension_numbers = #tpu.dot_dimension_numbers<[1], [0], [0], [1], [0, 0, 1, 1], [], []>} : vector<128x16xbf16>, vector<16x128xbf16>, vector<128x128xf32> -> vector<128x128xf32>
    %c0_3 = arith.constant 0 : index
    %c0_4 = arith.constant 0 : index
    %3 = vector.load %arg3[%c0_3, %c0_4] : memref<1x128xf32, #tpu.memory_space<vmem>>, vector<1x128xf32>
    %4 = vector.broadcast %3 : vector<1x128xf32> to vector<128x128xf32>
    %5 = arith.addf %2, %4 : vector<128x128xf32>
    %c0_5 = arith.constant 0 : index
    %c0_6 = arith.constant 0 : index
    %6 = vector.load %arg4[%c0_5, %c0_6] : memref<128x128xf32, #tpu.memory_space<vmem>>, vector<128x128xf32>
    tpu.vector_store %arg4[%c0_5, %c0_6], %5 {strides = array<i32>} : memref<128x128xf32, #tpu.memory_space<vmem>>, vector<128x128xf32>,
    return
  }
  func.func @transform_0(%arg0: i32) -> (i32, i32) {
    %c0_i32 = arith.constant 0 : i32
    %c0_i32_0 = arith.constant 0 : i32
    return %arg0, %c0_i32 : i32, i32
  }
  func.func @transform_1(%arg0: i32) -> (i32, i32) {
    %c0_i32 = arith.constant 0 : i32
    %c0_i32_0 = arith.constant 0 : i32
    %c0_i32_1 = arith.constant 0 : i32
    return %c0_i32, %c0_i32_0 : i32, i32
  }
  func.func @transform_2(%arg0: i32) -> (i32, i32) {
    %c0_i32 = arith.constant 0 : i32
    %c0_i32_0 = arith.constant 0 : i32
    %c0_i32_1 = arith.constant 0 : i32
    return %c0_i32, %c0_i32_0 : i32, i32
  }
  func.func @transform_3(%arg0: i32) -> (i32, i32) {
    %c0_i32 = arith.constant 0 : i32
    %c0_i32_0 = arith.constant 0 : i32
    return %arg0, %c0_i32 : i32, i32
  }
}

module attributes {stable_mosaic.version = 11 : i64} {
  func.func @_multi_mm_kernel(%arg0: i32, %arg1: memref<512x64xbf16, #tpu.memory_space<vmem>>, %arg2: memref<64x128xbf16, #tpu.memory_space<vmem>>, %arg3: memref<1x128xf32, #tpu.memory_space<vmem>>, %arg4: memref<512x128xf32, #tpu.memory_space<vmem>>) attributes {dimension_semantics = [#tpu.dimension_semantics<parallel>], iteration_bounds = array<i64: 2>, scalar_prefetch = 0 : i64, scratch_operands = 0 : i64, tpu.core_type = #tpu.core_type<tc>, window_params = [{transform_indices = @transform_0, window_bounds = array<i64: 512, 64>}, {pipeline_mode = #tpu.pipeline_mode<synchronous>, transform_indices = @transform_1, window_bounds = array<i64: 64, 128>}, {pipeline_mode = #tpu.pipeline_mode<synchronous>, transform_indices = @transform_2, window_bounds = array<i64: 1, 128>}, {transform_indices = @transform_3, window_bounds = array<i64: 512, 128>}]} {
    %c0 = arith.constant 0 : index
    %c0_0 = arith.constant 0 : index
    %0 = vector.load %arg1[%c0, %c0_0] : memref<512x64xbf16, #tpu.memory_space<vmem>>, vector<512x64xbf16>
    %c0_1 = arith.constant 0 : index
    %c0_2 = arith.constant 0 : index
    %1 = vector.load %arg2[%c0_1, %c0_2] : memref<64x128xbf16, #tpu.memory_space<vmem>>, vector<64x128xbf16>
    %cst = arith.constant dense<0.000000e+00> : vector<512x128xf32>
    %2 = tpu.matmul %0, %1, %cst {dimension_numbers = #tpu.dot_dimension_numbers<[1], [0], [0], [1], [0, 0, 1, 1], [], []>} : vector<512x64xbf16>, vector<64x128xbf16>, vector<512x128xf32> -> vector<512x128xf32>
    %c0_3 = arith.constant 0 : index
    %c0_4 = arith.constant 0 : index
    %3 = vector.load %arg3[%c0_3, %c0_4] : memref<1x128xf32, #tpu.memory_space<vmem>>, vector<1x128xf32>
    %4 = vector.broadcast %3 : vector<1x128xf32> to vector<512x128xf32>
    %5 = arith.addf %2, %4 : vector<512x128xf32>
    %c0_5 = arith.constant 0 : index
    %c0_6 = arith.constant 0 : index
    %6 = vector.load %arg4[%c0_5, %c0_6] : memref<512x128xf32, #tpu.memory_space<vmem>>, vector<512x128xf32>
    tpu.vector_store %arg4[%c0_5, %c0_6], %5 {strides = array<i32>} : memref<512x128xf32, #tpu.memory_space<vmem>>, vector<512x128xf32>,
    return
  }
  func.func @transform_0(%arg0: i32) -> (i32, i32) {
    %c0_i32 = arith.constant 0 : i32
    %c0_i32_0 = arith.constant 0 : i32
    return %arg0, %c0_i32 : i32, i32
  }
  func.func @transform_1(%arg0: i32) -> (i32, i32) {
    %c0_i32 = arith.constant 0 : i32
    %c0_i32_0 = arith.constant 0 : i32
    %c0_i32_1 = arith.constant 0 : i32
    return %c0_i32, %c0_i32_0 : i32, i32
  }
  func.func @transform_2(%arg0: i32) -> (i32, i32) {
    %c0_i32 = arith.constant 0 : i32
    %c0_i32_0 = arith.constant 0 : i32
    %c0_i32_1 = arith.constant 0 : i32
    return %c0_i32, %c0_i32_0 : i32, i32
  }
  func.func @transform_3(%arg0: i32) -> (i32, i32) {
    %c0_i32 = arith.constant 0 : i32
    %c0_i32_0 = arith.constant 0 : i32
    return %arg0, %c0_i32 : i32, i32
  }
}

</mosaic_0001>

<bundles_post_ra>
// kernel: deeplab_forward.17
= control target key start
LH: loop header
LB: loop body
LE: loop exit
PB: predicated region body
PF: predicated region fallthrough
CT: control target
= control target key end

     0   :  { %vm358_vm0 = vcmask 1044480   ;;  %vm359_vm1 = vcmask 1045504   ;;  %vm261_vm2 = vcmask 220160   ;;  %v994_v1 = vmov 65535   ;;  %s1410_s1 = inlined_call_operand.vmem [shape: bf16[27,128], index: 1, kind: input, shape index: {}]   ;;  %s1411_s0 = inlined_call_operand.vmem [shape: bf16[512,27], index: 0, kind: input, shape index: {}]   ;;  %s1412_s2 = inlined_call_operand.vmem [shape: f32[1,128], index: 2, kind: input, shape index: {}]   ;;  %s1413_s3 = inlined_call_operand.vmem [shape: f32[512,128], index: 3, kind: output, shape index: {}]  }
   0x1   :  { %v960_v0 = vld [vmem:[%s1410_s1] sm:$0xff]   ;;  %v360_v2 = vsel %vm358_vm0, 4294967295, %v994_v1  ;;  %v961_v3 = vld [vmem:[%s1410_s1 + $0x8] sm:$0x3f]   ;;  %v966_v10 = vld [vmem:[%s1411_s0 + $0x10] sm:$0xff]  }
   0x2   :  { %887 = vmatprep.subr.bf16.mxu0 %v960_v0  ;;  %955 = vmatprep.subr.bf16.mxu1 %v960_v0  ;;  %v361_v4 = vsel %vm359_vm1, %v360_v2, 0  ;;  %v962_v5 = vld [vmem:[%s1411_s0] sm:$0xff]   ;;  %v964_v8 = vld [vmem:[%s1411_s0 + $0x8] sm:$0xff]   ;;  %v967_v11 = vld [vmem:[%s1411_s0 + $0x90] sm:$0xff]  }
   0x3   :  { %888 = vmatpush3.bf16.msra.mxu0 %v960_v0  ;;  %957 = vmatpush3.bf16.msra.mxu1 %v960_v0  ;;  %v363_v6 = vand.u32 %v961_v3, %v361_v4  ;;  %v963_v7 = vld [vmem:[%s1411_s0 + $0x80] sm:$0xff]   ;;  %v965_v9 = vld [vmem:[%s1411_s0 + $0x88] sm:$0xff]   ;;  %v968_v12 = vld [vmem:[%s1411_s0 + $0x18] sm:$0xff]  }
   0x4   :  { %891 = vmatprep.mubr.msk.bf16.mxu0 %vm261_vm2, %v962_v5  ;;  %923 = vmatprep.mubr.msk.bf16.mxu1 %vm261_vm2, %v963_v7  ;;  %v969_v13 = vld [vmem:[%s1411_s0 + $0x98] sm:$0xff]   ;;  %v970_v14 = vld [vmem:[%s1411_s0 + $0x20] sm:$0xff]   ;;  %v972_v16 = vld [vmem:[%s1411_s0 + $0x28] sm:$0xff]  }
   0x5   :  { %889 = vmatprep.subr.bf16.mxu0 %v363_v6  ;;  %956 = vmatprep.subr.bf16.mxu1 %v363_v6  ;;  %v971_v15 = vld [vmem:[%s1411_s0 + $0xa0] sm:$0xff]   ;;  %v973_v17 = vld [vmem:[%s1411_s0 + $0xa8] sm:$0xff]   ;;  %v974_v18 = vld [vmem:[%s1411_s0 + $0x30] sm:$0xff]  }
   0x6   :  { %v975_v19 = vld [vmem:[%s1411_s0 + $0xb0] sm:$0xff]   ;;  %v976_v20 = vld [vmem:[%s1411_s0 + $0x38] sm:$0xff]   ;;  %v978_v22 = vld [vmem:[%s1411_s0 + $0x40] sm:$0xff]  }
   0x7   :  { %890 = vmatpush3.bf16.msra.mxu0 %v363_v6  ;;  %958 = vmatpush3.bf16.msra.mxu1 %v363_v6  ;;  %v977_v21 = vld [vmem:[%s1411_s0 + $0xb8] sm:$0xff]   ;;  %v979_v23 = vld [vmem:[%s1411_s0 + $0xc0] sm:$0xff]   ;;  %v980_v24 = vld [vmem:[%s1411_s0 + $0x48] sm:$0xff]  }
   0x8   :  { %v981_v25 = vld [vmem:[%s1411_s0 + $0xc8] sm:$0xff]   ;;  %v982_v26 = vld [vmem:[%s1411_s0 + $0x50] sm:$0xff]   ;;  %v984_v28 = vld [vmem:[%s1411_s0 + $0x58] sm:$0xff]  }
   0x9   :  { %v983_v27 = vld [vmem:[%s1411_s0 + $0xd0] sm:$0xff]   ;;  %v985_v29 = vld [vmem:[%s1411_s0 + $0xd8] sm:$0xff]   ;;  %v986_v30 = vld [vmem:[%s1411_s0 + $0x60] sm:$0xff]  }
   0xa   :  { %892 = vmatmul.mubr.msk.bf16.vlgmr.msra.gmra.mrb[0].mxu0 %vm261_vm2, %v964_v8  ;;  %924 = vmatmul.mubr.msk.bf16.vlgmr.msra.gmra.mrb[0].mxu1 %vm261_vm2, %v965_v9  ;;  %v987_v31 = vld [vmem:[%s1411_s0 + $0xe0] sm:$0xff]   ;;  %v988_v32 = vld [vmem:[%s1411_s0 + $0x68] sm:$0xff]   ;;  %v990_v34 = vld [vmem:[%s1411_s0 + $0x70] sm:$0xff]  }
   0xb   :  { %895 = vmatprep.mubr.msk.bf16.mxu0 %vm261_vm2, %v966_v10  ;;  %927 = vmatprep.mubr.msk.bf16.mxu1 %vm261_vm2, %v967_v11  ;;  %v989_v33 = vld [vmem:[%s1411_s0 + $0xe8] sm:$0xff]   ;;  %v991_v35 = vld [vmem:[%s1411_s0 + $0xf0] sm:$0xff]   ;;  %v992_v36 = vld [vmem:[%s1411_s0 + $0x78] sm:$0xff]  }
   0xc   :  { %v993_v37 = vld [vmem:[%s1411_s0 + $0xf8] sm:$0xff]   ;;  %v1152_v38 = vld [vmem:[%s1412_s2] ss:$0 sm:$0xff] }
  0x12   :  { %896 = vmatmul.mubr.msk.bf16.gmra.mrb[4].mxu0 %vm261_vm2, %v968_v12  ;;  %928 = vmatmul.mubr.msk.bf16.gmra.mrb[4].mxu1 %vm261_vm2, %v969_v13 }
  0x13   :  { %899 = vmatprep.mubr.msk.bf16.mxu0 %vm261_vm2, %v970_v14  ;;  %931 = vmatprep.mubr.msk.bf16.mxu1 %vm261_vm2, %v971_v15 }
  0x1a   :  { %900 = vmatmul.mubr.msk.bf16.gmra.mrb[8].mxu0 %vm261_vm2, %v972_v16  ;;  %932 = vmatmul.mubr.msk.bf16.gmra.mrb[8].mxu1 %vm261_vm2, %v973_v17 }
  0x1b   :  { %903 = vmatprep.mubr.msk.bf16.mxu0 %vm261_vm2, %v974_v18  ;;  %935 = vmatprep.mubr.msk.bf16.mxu1 %vm261_vm2, %v975_v19 }
  0x22   :  { %904 = vmatmul.mubr.msk.bf16.gmra.mrb[12].mxu0 %vm261_vm2, %v976_v20  ;;  %936 = vmatmul.mubr.msk.bf16.gmra.mrb[12].mxu1 %vm261_vm2, %v977_v21 }
  0x23   :  { %907 = vmatprep.mubr.msk.bf16.mxu0 %vm261_vm2, %v978_v22  ;;  %939 = vmatprep.mubr.msk.bf16.mxu1 %vm261_vm2, %v979_v23 }
  0x2a   :  { %908 = vmatmul.mubr.msk.bf16.gmra.mrb[16].mxu0 %vm261_vm2, %v980_v24  ;;  %940 = vmatmul.mubr.msk.bf16.gmra.mrb[16].mxu1 %vm261_vm2, %v981_v25 }
  0x2b   :  { %911 = vmatprep.mubr.msk.bf16.mxu0 %vm261_vm2, %v982_v26  ;;  %943 = vmatprep.mubr.msk.bf16.mxu1 %vm261_vm2, %v983_v27 }
  0x32   :  { %912 = vmatmul.mubr.msk.bf16.gmra.mrb[20].mxu0 %vm261_vm2, %v984_v28  ;;  %944 = vmatmul.mubr.msk.bf16.gmra.mrb[20].mxu1 %vm261_vm2, %v985_v29 }
  0x33   :  { %915 = vmatprep.mubr.msk.bf16.mxu0 %vm261_vm2, %v986_v30  ;;  %947 = vmatprep.mubr.msk.bf16.mxu1 %vm261_vm2, %v987_v31 }
  0x3a   :  { %916 = vmatmul.mubr.msk.bf16.gmra.mrb[24].mxu0 %vm261_vm2, %v988_v32  ;;  %948 = vmatmul.mubr.msk.bf16.gmra.mrb[24].mxu1 %vm261_vm2, %v989_v33 }
  0x3b   :  { %919 = vmatprep.mubr.msk.bf16.mxu0 %vm261_vm2, %v990_v34  ;;  %951 = vmatprep.mubr.msk.bf16.mxu1 %vm261_vm2, %v991_v35 }
  0x42   :  { %920 = vmatmul.mubr.msk.bf16.gmra.mrb[28].mxu0 %vm261_vm2, %v992_v36  ;;  %952 = vmatmul.mubr.msk.bf16.gmra.mrb[28].mxu1 %vm261_vm2, %v993_v37 }
  0xdd   :  { %v893_v39 = vpop.f32.mrb[0].mxu0  ;;  %v925_v40 = vpop.f32.mrb[0].mxu1 }
  0xde   :  { %v408_v41 = vadd.f32 %v893_v39, %v1152_v38  ;;  %v536_v42 = vadd.f32 %v925_v40, %v1152_v38  ;;  %v399_v43 = vpop.f32.mrb[1].mxu0  ;;  %v527_v44 = vpop.f32.mrb[1].mxu1 }
  0xdf   :  { %v400_v45 = vadd.f32 %v1152_v38, %v399_v43  ;;  %v528_v46 = vadd.f32 %v1152_v38, %v527_v44  ;;  %v894_v47 = vpop.f32.mrb[2].mxu0  ;;  %v926_v48 = vpop.f32.mrb[2].mxu1 }
  0xe0   :  { %v656_v49 = vmax.f32 %v408_v41, 0.0  ;;  %v688_v50 = vmax.f32 %v536_v42, 0.0  ;;  %v411_v51 = vadd.f32 %v894_v47, %v1152_v38  ;;  %v539_v52 = vadd.f32 %v926_v48, %v1152_v38  ;;  %v402_v53 = vpop.f32.mrb[3].mxu0  ;;  %v530_v54 = vpop.f32.mrb[3].mxu1 }
  0xe1   :  { %v654_v55 = vmax.f32 %v400_v45, 0.0  ;;  %v686_v56 = vmax.f32 %v528_v46, 0.0  ;;  %v403_v57 = vadd.f32 %v1152_v38, %v402_v53  ;;  %v531_v58 = vadd.f32 %v1152_v38, %v530_v54 }
  0xe2   :  { %720 = vst [vmem:[%s1413_s3 + $0x10] sm:$0xff] %v656_v49  ;;  %752 = vst [vmem:[%s1413_s3 + $0x110] sm:$0xff] %v688_v50  ;;  %v657_v59 = vmax.f32 %v411_v51, 0.0  ;;  %v689_v60 = vmax.f32 %v539_v52, 0.0 }
  0xe3   :  { %718 = vst [vmem:[%s1413_s3] sm:$0xff] %v654_v55  ;;  %750 = vst [vmem:[%s1413_s3 + $0x100] sm:$0xff] %v686_v56  ;;  %v655_v61 = vmax.f32 %v403_v57, 0.0  ;;  %v687_v62 = vmax.f32 %v531_v58, 0.0 }
  0xe4   :  { %721 = vst [vmem:[%s1413_s3 + $0x18] sm:$0xff] %v657_v59  ;;  %753 = vst [vmem:[%s1413_s3 + $0x118] sm:$0xff] %v689_v60 }
  0xe5   :  { %719 = vst [vmem:[%s1413_s3 + $0x8] sm:$0xff] %v655_v61  ;;  %751 = vst [vmem:[%s1413_s3 + $0x108] sm:$0xff] %v687_v62  ;;  %v897_v63 = vpop.f32.mrb[4].mxu0  ;;  %v929_v0 = vpop.f32.mrb[4].mxu1 }
  0xe6   :  { %v424_v1 = vadd.f32 %v897_v63, %v1152_v38  ;;  %v552_v2 = vadd.f32 %v929_v0, %v1152_v38  ;;  %v415_v3 = vpop.f32.mrb[5].mxu0  ;;  %v543_v4 = vpop.f32.mrb[5].mxu1 }
  0xe7   :  { %v416_v5 = vadd.f32 %v1152_v38, %v415_v3  ;;  %v544_v6 = vadd.f32 %v1152_v38, %v543_v4  ;;  %v898_v7 = vpop.f32.mrb[6].mxu0  ;;  %v930_v8 = vpop.f32.mrb[6].mxu1 }
  0xe8   :  { %v660_v9 = vmax.f32 %v424_v1, 0.0  ;;  %v692_v10 = vmax.f32 %v552_v2, 0.0  ;;  %v427_v11 = vadd.f32 %v898_v7, %v1152_v38  ;;  %v555_v12 = vadd.f32 %v930_v8, %v1152_v38  ;;  %v418_v13 = vpop.f32.mrb[7].mxu0  ;;  %v546_v14 = vpop.f32.mrb[7].mxu1 }
  0xe9   :  { %v658_v15 = vmax.f32 %v416_v5, 0.0  ;;  %v690_v16 = vmax.f32 %v544_v6, 0.0  ;;  %v419_v17 = vadd.f32 %v1152_v38, %v418_v13  ;;  %v547_v18 = vadd.f32 %v1152_v38, %v546_v14 }
  0xea   :  { %724 = vst [vmem:[%s1413_s3 + $0x30] sm:$0xff] %v660_v9  ;;  %756 = vst [vmem:[%s1413_s3 + $0x130] sm:$0xff] %v692_v10  ;;  %v661_v19 = vmax.f32 %v427_v11, 0.0  ;;  %v693_v20 = vmax.f32 %v555_v12, 0.0 }
  0xeb   :  { %722 = vst [vmem:[%s1413_s3 + $0x20] sm:$0xff] %v658_v15  ;;  %754 = vst [vmem:[%s1413_s3 + $0x120] sm:$0xff] %v690_v16  ;;  %v659_v21 = vmax.f32 %v419_v17, 0.0  ;;  %v691_v22 = vmax.f32 %v547_v18, 0.0 }
  0xec   :  { %725 = vst [vmem:[%s1413_s3 + $0x38] sm:$0xff] %v661_v19  ;;  %757 = vst [vmem:[%s1413_s3 + $0x138] sm:$0xff] %v693_v20 }
  0xed   :  { %723 = vst [vmem:[%s1413_s3 + $0x28] sm:$0xff] %v659_v21  ;;  %755 = vst [vmem:[%s1413_s3 + $0x128] sm:$0xff] %v691_v22  ;;  %v901_v23 = vpop.f32.mrb[8].mxu0  ;;  %v933_v24 = vpop.f32.mrb[8].mxu1 }
  0xee   :  { %v440_v25 = vadd.f32 %v901_v23, %v1152_v38  ;;  %v568_v26 = vadd.f32 %v933_v24, %v1152_v38  ;;  %v431_v27 = vpop.f32.mrb[9].mxu0  ;;  %v559_v28 = vpop.f32.mrb[9].mxu1 }
  0xef   :  { %v432_v29 = vadd.f32 %v1152_v38, %v431_v27  ;;  %v560_v30 = vadd.f32 %v1152_v38, %v559_v28  ;;  %v902_v31 = vpop.f32.mrb[10].mxu0  ;;  %v934_v32 = vpop.f32.mrb[10].mxu1 }
  0xf0   :  { %v664_v33 = vmax.f32 %v440_v25, 0.0  ;;  %v696_v34 = vmax.f32 %v568_v26, 0.0  ;;  %v443_v35 = vadd.f32 %v902_v31, %v1152_v38  ;;  %v571_v36 = vadd.f32 %v934_v32, %v1152_v38  ;;  %v434_v37 = vpop.f32.mrb[11].mxu0  ;;  %v562_v39 = vpop.f32.mrb[11].mxu1 }
  0xf1   :  { %v662_v40 = vmax.f32 %v432_v29, 0.0  ;;  %v694_v41 = vmax.f32 %v560_v30, 0.0  ;;  %v435_v42 = vadd.f32 %v1152_v38, %v434_v37  ;;  %v563_v43 = vadd.f32 %v1152_v38, %v562_v39 }
  0xf2   :  { %728 = vst [vmem:[%s1413_s3 + $0x50] sm:$0xff] %v664_v33  ;;  %760 = vst [vmem:[%s1413_s3 + $0x150] sm:$0xff] %v696_v34  ;;  %v665_v44 = vmax.f32 %v443_v35, 0.0  ;;  %v697_v45 = vmax.f32 %v571_v36, 0.0 }
  0xf3   :  { %726 = vst [vmem:[%s1413_s3 + $0x40] sm:$0xff] %v662_v40  ;;  %758 = vst [vmem:[%s1413_s3 + $0x140] sm:$0xff] %v694_v41  ;;  %v663_v46 = vmax.f32 %v435_v42, 0.0  ;;  %v695_v47 = vmax.f32 %v563_v43, 0.0 }
  0xf4   :  { %729 = vst [vmem:[%s1413_s3 + $0x58] sm:$0xff] %v665_v44  ;;  %761 = vst [vmem:[%s1413_s3 + $0x158] sm:$0xff] %v697_v45 }
  0xf5   :  { %727 = vst [vmem:[%s1413_s3 + $0x48] sm:$0xff] %v663_v46  ;;  %759 = vst [vmem:[%s1413_s3 + $0x148] sm:$0xff] %v695_v47  ;;  %v905_v48 = vpop.f32.mrb[12].mxu0  ;;  %v937_v49 = vpop.f32.mrb[12].mxu1 }
  0xf6   :  { %v456_v50 = vadd.f32 %v905_v48, %v1152_v38  ;;  %v584_v51 = vadd.f32 %v937_v49, %v1152_v38  ;;  %v447_v52 = vpop.f32.mrb[13].mxu0  ;;  %v575_v53 = vpop.f32.mrb[13].mxu1 }
  0xf7   :  { %v448_v54 = vadd.f32 %v1152_v38, %v447_v52  ;;  %v576_v55 = vadd.f32 %v1152_v38, %v575_v53  ;;  %v906_v56 = vpop.f32.mrb[14].mxu0  ;;  %v938_v57 = vpop.f32.mrb[14].mxu1 }
  0xf8   :  { %v668_v58 = vmax.f32 %v456_v50, 0.0  ;;  %v700_v59 = vmax.f32 %v584_v51, 0.0  ;;  %v459_v60 = vadd.f32 %v906_v56, %v1152_v38  ;;  %v587_v61 = vadd.f32 %v938_v57, %v1152_v38  ;;  %v450_v62 = vpop.f32.mrb[15].mxu0  ;;  %v578_v63 = vpop.f32.mrb[15].mxu1 }
  0xf9   :  { %v666_v0 = vmax.f32 %v448_v54, 0.0  ;;  %v698_v1 = vmax.f32 %v576_v55, 0.0  ;;  %v451_v2 = vadd.f32 %v1152_v38, %v450_v62  ;;  %v579_v3 = vadd.f32 %v1152_v38, %v578_v63 }
  0xfa   :  { %732 = vst [vmem:[%s1413_s3 + $0x70] sm:$0xff] %v668_v58  ;;  %764 = vst [vmem:[%s1413_s3 + $0x170] sm:$0xff] %v700_v59  ;;  %v669_v4 = vmax.f32 %v459_v60, 0.0  ;;  %v701_v5 = vmax.f32 %v587_v61, 0.0 }
  0xfb   :  { %730 = vst [vmem:[%s1413_s3 + $0x60] sm:$0xff] %v666_v0  ;;  %762 = vst [vmem:[%s1413_s3 + $0x160] sm:$0xff] %v698_v1  ;;  %v667_v6 = vmax.f32 %v451_v2, 0.0  ;;  %v699_v7 = vmax.f32 %v579_v3, 0.0 }
  0xfc   :  { %733 = vst [vmem:[%s1413_s3 + $0x78] sm:$0xff] %v669_v4  ;;  %765 = vst [vmem:[%s1413_s3 + $0x178] sm:$0xff] %v701_v5 }
  0xfd   :  { %731 = vst [vmem:[%s1413_s3 + $0x68] sm:$0xff] %v667_v6  ;;  %763 = vst [vmem:[%s1413_s3 + $0x168] sm:$0xff] %v699_v7  ;;  %v909_v8 = vpop.f32.mrb[16].mxu0  ;;  %v941_v9 = vpop.f32.mrb[16].mxu1 }
  0xfe   :  { %v472_v10 = vadd.f32 %v909_v8, %v1152_v38  ;;  %v600_v11 = vadd.f32 %v941_v9, %v1152_v38  ;;  %v463_v12 = vpop.f32.mrb[17].mxu0  ;;  %v591_v13 = vpop.f32.mrb[17].mxu1 }
  0xff   :  { %v464_v14 = vadd.f32 %v1152_v38, %v463_v12  ;;  %v592_v15 = vadd.f32 %v1152_v38, %v591_v13  ;;  %v910_v16 = vpop.f32.mrb[18].mxu0  ;;  %v942_v17 = vpop.f32.mrb[18].mxu1 }
 0x100   :  { %v672_v18 = vmax.f32 %v472_v10, 0.0  ;;  %v704_v19 = vmax.f32 %v600_v11, 0.0  ;;  %v475_v20 = vadd.f32 %v910_v16, %v1152_v38  ;;  %v603_v21 = vadd.f32 %v942_v17, %v1152_v38  ;;  %v466_v22 = vpop.f32.mrb[19].mxu0  ;;  %v594_v23 = vpop.f32.mrb[19].mxu1 }
 0x101   :  { %v670_v24 = vmax.f32 %v464_v14, 0.0  ;;  %v702_v25 = vmax.f32 %v592_v15, 0.0  ;;  %v467_v26 = vadd.f32 %v1152_v38, %v466_v22  ;;  %v595_v27 = vadd.f32 %v1152_v38, %v594_v23 }
 0x102   :  { %736 = vst [vmem:[%s1413_s3 + $0x90] sm:$0xff] %v672_v18  ;;  %768 = vst [vmem:[%s1413_s3 + $0x190] sm:$0xff] %v704_v19  ;;  %v673_v28 = vmax.f32 %v475_v20, 0.0  ;;  %v705_v29 = vmax.f32 %v603_v21, 0.0 }
 0x103   :  { %734 = vst [vmem:[%s1413_s3 + $0x80] sm:$0xff] %v670_v24  ;;  %766 = vst [vmem:[%s1413_s3 + $0x180] sm:$0xff] %v702_v25  ;;  %v671_v30 = vmax.f32 %v467_v26, 0.0  ;;  %v703_v31 = vmax.f32 %v595_v27, 0.0 }
 0x104   :  { %737 = vst [vmem:[%s1413_s3 + $0x98] sm:$0xff] %v673_v28  ;;  %769 = vst [vmem:[%s1413_s3 + $0x198] sm:$0xff] %v705_v29 }
 0x105   :  { %735 = vst [vmem:[%s1413_s3 + $0x88] sm:$0xff] %v671_v30  ;;  %767 = vst [vmem:[%s1413_s3 + $0x188] sm:$0xff] %v703_v31  ;;  %v913_v32 = vpop.f32.mrb[20].mxu0  ;;  %v945_v33 = vpop.f32.mrb[20].mxu1 }
 0x106   :  { %v488_v34 = vadd.f32 %v913_v32, %v1152_v38  ;;  %v616_v35 = vadd.f32 %v945_v33, %v1152_v38  ;;  %v479_v36 = vpop.f32.mrb[21].mxu0  ;;  %v607_v37 = vpop.f32.mrb[21].mxu1 }
 0x107   :  { %v480_v39 = vadd.f32 %v1152_v38, %v479_v36  ;;  %v608_v40 = vadd.f32 %v1152_v38, %v607_v37  ;;  %v914_v41 = vpop.f32.mrb[22].mxu0  ;;  %v946_v42 = vpop.f32.mrb[22].mxu1 }
 0x108   :  { %v676_v43 = vmax.f32 %v488_v34, 0.0  ;;  %v708_v44 = vmax.f32 %v616_v35, 0.0  ;;  %v491_v45 = vadd.f32 %v914_v41, %v1152_v38  ;;  %v619_v46 = vadd.f32 %v946_v42, %v1152_v38  ;;  %v482_v47 = vpop.f32.mrb[23].mxu0  ;;  %v610_v48 = vpop.f32.mrb[23].mxu1 }
 0x109   :  { %v674_v49 = vmax.f32 %v480_v39, 0.0  ;;  %v706_v50 = vmax.f32 %v608_v40, 0.0  ;;  %v483_v51 = vadd.f32 %v1152_v38, %v482_v47  ;;  %v611_v52 = vadd.f32 %v1152_v38, %v610_v48 }
 0x10a   :  { %740 = vst [vmem:[%s1413_s3 + $0xb0] sm:$0xff] %v676_v43  ;;  %772 = vst [vmem:[%s1413_s3 + $0x1b0] sm:$0xff] %v708_v44  ;;  %v677_v53 = vmax.f32 %v491_v45, 0.0  ;;  %v709_v54 = vmax.f32 %v619_v46, 0.0 }
 0x10b   :  { %738 = vst [vmem:[%s1413_s3 + $0xa0] sm:$0xff] %v674_v49  ;;  %770 = vst [vmem:[%s1413_s3 + $0x1a0] sm:$0xff] %v706_v50  ;;  %v675_v55 = vmax.f32 %v483_v51, 0.0  ;;  %v707_v56 = vmax.f32 %v611_v52, 0.0 }
 0x10c   :  { %741 = vst [vmem:[%s1413_s3 + $0xb8] sm:$0xff] %v677_v53  ;;  %773 = vst [vmem:[%s1413_s3 + $0x1b8] sm:$0xff] %v709_v54 }
 0x10d   :  { %739 = vst [vmem:[%s1413_s3 + $0xa8] sm:$0xff] %v675_v55  ;;  %771 = vst [vmem:[%s1413_s3 + $0x1a8] sm:$0xff] %v707_v56  ;;  %v917_v57 = vpop.f32.mrb[24].mxu0  ;;  %v949_v58 = vpop.f32.mrb[24].mxu1 }
 0x10e   :  { %v504_v59 = vadd.f32 %v917_v57, %v1152_v38  ;;  %v632_v60 = vadd.f32 %v949_v58, %v1152_v38  ;;  %v495_v61 = vpop.f32.mrb[25].mxu0  ;;  %v623_v62 = vpop.f32.mrb[25].mxu1 }
 0x10f   :  { %v496_v63 = vadd.f32 %v1152_v38, %v495_v61  ;;  %v624_v0 = vadd.f32 %v1152_v38, %v623_v62  ;;  %v918_v1 = vpop.f32.mrb[26].mxu0  ;;  %v950_v2 = vpop.f32.mrb[26].mxu1 }
 0x110   :  { %v680_v3 = vmax.f32 %v504_v59, 0.0  ;;  %v712_v4 = vmax.f32 %v632_v60, 0.0  ;;  %v507_v5 = vadd.f32 %v918_v1, %v1152_v38  ;;  %v635_v6 = vadd.f32 %v950_v2, %v1152_v38  ;;  %v498_v7 = vpop.f32.mrb[27].mxu0  ;;  %v626_v8 = vpop.f32.mrb[27].mxu1 }
 0x111   :  { %v678_v9 = vmax.f32 %v496_v63, 0.0  ;;  %v710_v10 = vmax.f32 %v624_v0, 0.0  ;;  %v499_v11 = vadd.f32 %v1152_v38, %v498_v7  ;;  %v627_v12 = vadd.f32 %v1152_v38, %v626_v8 }
 0x112   :  { %744 = vst [vmem:[%s1413_s3 + $0xd0] sm:$0xff] %v680_v3  ;;  %776 = vst [vmem:[%s1413_s3 + $0x1d0] sm:$0xff] %v712_v4  ;;  %v681_v13 = vmax.f32 %v507_v5, 0.0  ;;  %v713_v14 = vmax.f32 %v635_v6, 0.0 }
 0x113   :  { %742 = vst [vmem:[%s1413_s3 + $0xc0] sm:$0xff] %v678_v9  ;;  %774 = vst [vmem:[%s1413_s3 + $0x1c0] sm:$0xff] %v710_v10  ;;  %v679_v15 = vmax.f32 %v499_v11, 0.0  ;;  %v711_v16 = vmax.f32 %v627_v12, 0.0 }
 0x114   :  { %745 = vst [vmem:[%s1413_s3 + $0xd8] sm:$0xff] %v681_v13  ;;  %777 = vst [vmem:[%s1413_s3 + $0x1d8] sm:$0xff] %v713_v14 }
 0x115   :  { %743 = vst [vmem:[%s1413_s3 + $0xc8] sm:$0xff] %v679_v15  ;;  %775 = vst [vmem:[%s1413_s3 + $0x1c8] sm:$0xff] %v711_v16  ;;  %v921_v17 = vpop.f32.mrb[28].mxu0  ;;  %v953_v18 = vpop.f32.mrb[28].mxu1 }
 0x116   :  { %v520_v19 = vadd.f32 %v921_v17, %v1152_v38  ;;  %v648_v20 = vadd.f32 %v953_v18, %v1152_v38  ;;  %v511_v21 = vpop.f32.mrb[29].mxu0  ;;  %v639_v22 = vpop.f32.mrb[29].mxu1 }
 0x117   :  { %v512_v23 = vadd.f32 %v1152_v38, %v511_v21  ;;  %v640_v24 = vadd.f32 %v1152_v38, %v639_v22  ;;  %v922_v25 = vpop.f32.mrb[30].mxu0  ;;  %v954_v26 = vpop.f32.mrb[30].mxu1 }
 0x118   :  { %v684_v27 = vmax.f32 %v520_v19, 0.0  ;;  %v716_v28 = vmax.f32 %v648_v20, 0.0  ;;  %v523_v29 = vadd.f32 %v922_v25, %v1152_v38  ;;  %v651_v30 = vadd.f32 %v954_v26, %v1152_v38  ;;  %v514_v31 = vpop.f32.mrb[31].mxu0  ;;  %v642_v32 = vpop.f32.mrb[31].mxu1 }
 0x119   :  { %v682_v33 = vmax.f32 %v512_v23, 0.0  ;;  %v714_v34 = vmax.f32 %v640_v24, 0.0  ;;  %v515_v35 = vadd.f32 %v1152_v38, %v514_v31  ;;  %v643_v36 = vadd.f32 %v1152_v38, %v642_v32 }
 0x11a   :  { %748 = vst [vmem:[%s1413_s3 + $0xf0] sm:$0xff] %v684_v27  ;;  %780 = vst [vmem:[%s1413_s3 + $0x1f0] sm:$0xff] %v716_v28  ;;  %v685_v37 = vmax.f32 %v523_v29, 0.0  ;;  %v717_v39 = vmax.f32 %v651_v30, 0.0 }
 0x11b   :  { %746 = vst [vmem:[%s1413_s3 + $0xe0] sm:$0xff] %v682_v33  ;;  %778 = vst [vmem:[%s1413_s3 + $0x1e0] sm:$0xff] %v714_v34  ;;  %v683_v40 = vmax.f32 %v515_v35, 0.0  ;;  %v715_v38 = vmax.f32 %v643_v36, 0.0 }
 0x11c   :  { %749 = vst [vmem:[%s1413_s3 + $0xf8] sm:$0xff] %v685_v37  ;;  %781 = vst [vmem:[%s1413_s3 + $0x1f8] sm:$0xff] %v717_v39 }
 0x11d   :  { %747 = vst [vmem:[%s1413_s3 + $0xe8] sm:$0xff] %v683_v40  ;;  %779 = vst [vmem:[%s1413_s3 + $0x1e8] sm:$0xff] %v715_v38 }

// kernel: deeplab_forward.18
= control target key start
LH: loop header
LB: loop body
LE: loop exit
PB: predicated region body
PF: predicated region fallthrough
CT: control target
= control target key end

     0   :  { %vm114_vm0 = vcmask 588800   ;;  %vm139_vm1 = vcmask 1043456   ;;  %s480_s1 = inlined_call_operand.vmem [shape: bf16[72,128], index: 1, kind: input, shape index: {}]   ;;  %s481_s0 = inlined_call_operand.vmem [shape: bf16[128,72], index: 0, kind: input, shape index: {}]   ;;  %s482_s2 = inlined_call_operand.vmem [shape: f32[1,128], index: 2, kind: input, shape index: {}]   ;;  %s483_s3 = inlined_call_operand.vmem [shape: f32[128,128], index: 3, kind: output, shape index: {}]  }
   0x1   :  { %v349_v0 = vld [vmem:[%s480_s1] sm:$0xff]   ;;  %v350_v1 = vld [vmem:[%s480_s1 + $0x8] sm:$0xff]   ;;  %v351_v2 = vld [vmem:[%s480_s1 + $0x10] sm:$0xff]  }
   0x2   :  { %311 = vmatprep.subr.bf16.mxu0 %v349_v0  ;;  %337 = vmatprep.subr.bf16.mxu1 %v349_v0  ;;  %v354_v3 = vld [vmem:[%s481_s0] sm:$0xff]   ;;  %v352_v5 = vld [vmem:[%s480_s1 + $0x18] sm:$0xff]   ;;  %v356_v8 = vld [vmem:[%s481_s0 + $0x8] sm:$0xff]  }
   0x3   :  { %312 = vmatpush3.bf16.msra.mxu0 %v349_v0  ;;  %342 = vmatpush3.bf16.msra.mxu1 %v349_v0  ;;  %v355_v4 = vld [vmem:[%s481_s0 + $0x20] sm:$0xff]   ;;  %v357_v9 = vld [vmem:[%s481_s0 + $0x28] sm:$0xff]   ;;  %v358_v10 = vld [vmem:[%s481_s0 + $0x10] sm:$0xff]  }
   0x4   :  { %313 = vmatprep.subr.bf16.mxu0 %v350_v1  ;;  %338 = vmatprep.subr.bf16.mxu1 %v350_v1  ;;  %v353_v6 = vld [vmem:[%s480_s1 + $0x20] ss:$0 sps:$4 sm:$0xff]   ;;  %v359_v11 = vld [vmem:[%s481_s0 + $0x30] sm:$0xff]   ;;  %v360_v12 = vld [vmem:[%s481_s0 + $0x18] sm:$0xff]  }
   0x5   :  { %321 = vmatprep.mubr.msk.bf16.mxu0 %vm114_vm0, %v354_v3  ;;  %329 = vmatprep.mubr.msk.bf16.mxu1 %vm114_vm0, %v355_v4  ;;  %v141_v7 = vsel %vm139_vm1, %v353_v6, 0  ;;  %v361_v13 = vld [vmem:[%s481_s0 + $0x38] sm:$0xff]   ;;  %v276_v14 = vld [vmem:[%s482_s2] ss:$0 sm:$0xff] }
   0x7   :  { %314 = vmatpush3.bf16.msra.mxu0 %v350_v1  ;;  %343 = vmatpush3.bf16.msra.mxu1 %v350_v1 }
   0x8   :  { %315 = vmatprep.subr.bf16.mxu0 %v351_v2  ;;  %339 = vmatprep.subr.bf16.mxu1 %v351_v2 }
   0xb   :  { %316 = vmatpush3.bf16.msra.mxu0 %v351_v2  ;;  %344 = vmatpush3.bf16.msra.mxu1 %v351_v2 }
   0xc   :  { %317 = vmatprep.subr.bf16.mxu0 %v352_v5  ;;  %340 = vmatprep.subr.bf16.mxu1 %v352_v5 }
   0xf   :  { %318 = vmatpush3.bf16.msra.mxu0 %v352_v5  ;;  %345 = vmatpush3.bf16.msra.mxu1 %v352_v5 }
  0x10   :  { %347 = vmatprep.subr.msk.bf16.mxu0 %vm139_vm1, %v353_v6  ;;  %348 = vmatprep.subr.msk.bf16.mxu1 %vm139_vm1, %v353_v6 }
  0x13   :  { %320 = vmatpush3.bf16.msra.mxu0 %v141_v7  ;;  %346 = vmatpush3.bf16.msra.mxu1 %v141_v7 }
  0x16   :  { %322 = vmatmul.mubr.msk.bf16.vlgmr.msra.gmra.mrb[0].mxu0 %vm114_vm0, %v356_v8  ;;  %330 = vmatmul.mubr.msk.bf16.vlgmr.msra.gmra.mrb[0].mxu1 %vm114_vm0, %v357_v9 }
  0x17   :  { %325 = vmatprep.mubr.msk.bf16.mxu0 %vm114_vm0, %v358_v10  ;;  %333 = vmatprep.mubr.msk.bf16.mxu1 %vm114_vm0, %v359_v11 }
  0x1e   :  { %326 = vmatmul.mubr.msk.bf16.gmra.mrb[4].mxu0 %vm114_vm0, %v360_v12  ;;  %334 = vmatmul.mubr.msk.bf16.gmra.mrb[4].mxu1 %vm114_vm0, %v361_v13 }
  0xe9   :  { %v323_v15 = vpop.f32.mrb[0].mxu0  ;;  %v331_v16 = vpop.f32.mrb[0].mxu1 }
  0xea   :  { %v186_v17 = vadd.f32 %v323_v15, %v276_v14  ;;  %v218_v18 = vadd.f32 %v331_v16, %v276_v14  ;;  %v177_v19 = vpop.f32.mrb[1].mxu0  ;;  %v209_v20 = vpop.f32.mrb[1].mxu1 }
  0xeb   :  { %v178_v21 = vadd.f32 %v276_v14, %v177_v19  ;;  %v210_v22 = vadd.f32 %v276_v14, %v209_v20  ;;  %v324_v23 = vpop.f32.mrb[2].mxu0  ;;  %v332_v24 = vpop.f32.mrb[2].mxu1 }
  0xec   :  { %v242_v25 = vmax.f32 %v186_v17, 0.0  ;;  %v250_v26 = vmax.f32 %v218_v18, 0.0  ;;  %v189_v27 = vadd.f32 %v324_v23, %v276_v14  ;;  %v221_v28 = vadd.f32 %v332_v24, %v276_v14  ;;  %v180_v29 = vpop.f32.mrb[3].mxu0  ;;  %v212_v30 = vpop.f32.mrb[3].mxu1 }
  0xed   :  { %v240_v31 = vmax.f32 %v178_v21, 0.0  ;;  %v248_v32 = vmax.f32 %v210_v22, 0.0  ;;  %v181_v33 = vadd.f32 %v276_v14, %v180_v29  ;;  %v213_v34 = vadd.f32 %v276_v14, %v212_v30 }
  0xee   :  { %258 = vst [vmem:[%s483_s3 + $0x10] sm:$0xff] %v242_v25  ;;  %266 = vst [vmem:[%s483_s3 + $0x50] sm:$0xff] %v250_v26  ;;  %v243_v35 = vmax.f32 %v189_v27, 0.0  ;;  %v251_v36 = vmax.f32 %v221_v28, 0.0 }
  0xef   :  { %256 = vst [vmem:[%s483_s3] sm:$0xff] %v240_v31  ;;  %264 = vst [vmem:[%s483_s3 + $0x40] sm:$0xff] %v248_v32  ;;  %v241_v37 = vmax.f32 %v181_v33, 0.0  ;;  %v249_v38 = vmax.f32 %v213_v34, 0.0 }
  0xf0   :  { %259 = vst [vmem:[%s483_s3 + $0x18] sm:$0xff] %v243_v35  ;;  %267 = vst [vmem:[%s483_s3 + $0x58] sm:$0xff] %v251_v36 }
  0xf1   :  { %257 = vst [vmem:[%s483_s3 + $0x8] sm:$0xff] %v241_v37  ;;  %265 = vst [vmem:[%s483_s3 + $0x48] sm:$0xff] %v249_v38  ;;  %v327_v39 = vpop.f32.mrb[4].mxu0  ;;  %v335_v40 = vpop.f32.mrb[4].mxu1 }
  0xf2   :  { %v202_v41 = vadd.f32 %v327_v39, %v276_v14  ;;  %v234_v42 = vadd.f32 %v335_v40, %v276_v14  ;;  %v193_v43 = vpop.f32.mrb[5].mxu0  ;;  %v225_v44 = vpop.f32.mrb[5].mxu1 }
  0xf3   :  { %v194_v45 = vadd.f32 %v276_v14, %v193_v43  ;;  %v226_v46 = vadd.f32 %v276_v14, %v225_v44  ;;  %v328_v47 = vpop.f32.mrb[6].mxu0  ;;  %v336_v48 = vpop.f32.mrb[6].mxu1 }
  0xf4   :  { %v246_v49 = vmax.f32 %v202_v41, 0.0  ;;  %v254_v50 = vmax.f32 %v234_v42, 0.0  ;;  %v205_v51 = vadd.f32 %v328_v47, %v276_v14  ;;  %v237_v52 = vadd.f32 %v336_v48, %v276_v14  ;;  %v196_v53 = vpop.f32.mrb[7].mxu0  ;;  %v228_v54 = vpop.f32.mrb[7].mxu1 }
  0xf5   :  { %v244_v55 = vmax.f32 %v194_v45, 0.0  ;;  %v252_v56 = vmax.f32 %v226_v46, 0.0  ;;  %v197_v57 = vadd.f32 %v276_v14, %v196_v53  ;;  %v229_v58 = vadd.f32 %v276_v14, %v228_v54 }
  0xf6   :  { %262 = vst [vmem:[%s483_s3 + $0x30] sm:$0xff] %v246_v49  ;;  %270 = vst [vmem:[%s483_s3 + $0x70] sm:$0xff] %v254_v50  ;;  %v247_v59 = vmax.f32 %v205_v51, 0.0  ;;  %v255_v60 = vmax.f32 %v237_v52, 0.0 }
  0xf7   :  { %260 = vst [vmem:[%s483_s3 + $0x20] sm:$0xff] %v244_v55  ;;  %268 = vst [vmem:[%s483_s3 + $0x60] sm:$0xff] %v252_v56  ;;  %v245_v61 = vmax.f32 %v197_v57, 0.0  ;;  %v253_v62 = vmax.f32 %v229_v58, 0.0 }
  0xf8   :  { %263 = vst [vmem:[%s483_s3 + $0x38] sm:$0xff] %v247_v59  ;;  %271 = vst [vmem:[%s483_s3 + $0x78] sm:$0xff] %v255_v60 }
  0xf9   :  { %261 = vst [vmem:[%s483_s3 + $0x28] sm:$0xff] %v245_v61  ;;  %269 = vst [vmem:[%s483_s3 + $0x68] sm:$0xff] %v253_v62 }

// kernel: deeplab_forward.28
= control target key start
LH: loop header
LB: loop body
LE: loop exit
PB: predicated region body
PF: predicated region fallthrough
CT: control target
= control target key end

     0   :  { %vm86_vm0 = vcmask 130048   ;;  %s406_s1 = inlined_call_operand.vmem [shape: bf16[16,128], index: 1, kind: input, shape index: {}]   ;;  %s407_s0 = inlined_call_operand.vmem [shape: bf16[128,16], index: 0, kind: input, shape index: {}]   ;;  %s408_s2 = inlined_call_operand.vmem [shape: f32[1,128], index: 2, kind: input, shape index: {}]   ;;  %s409_s3 = inlined_call_operand.vmem [shape: f32[128,128], index: 3, kind: output, shape index: {}]  }
   0x1   :  { %v291_v0 = vld [vmem:[%s406_s1] sm:$0xff]   ;;  %v294_v3 = vld [vmem:[%s407_s0 + $0x8] sm:$0xff]   ;;  %v296_v5 = vld [vmem:[%s407_s0 + $0x10] sm:$0xff]  }
   0x2   :  { %v292_v1 = vld [vmem:[%s407_s0] sm:$0xff]   ;;  %271 = vmatprep.subr.bf16.mxu0 %v291_v0  ;;  %289 = vmatprep.subr.bf16.mxu1 %v291_v0  ;;  %v295_v4 = vld [vmem:[%s407_s0 + $0x28] sm:$0xff]   ;;  %v297_v6 = vld [vmem:[%s407_s0 + $0x30] sm:$0xff]  }
   0x3   :  { %v293_v2 = vld [vmem:[%s407_s0 + $0x20] sm:$0xff]   ;;  %272 = vmatpush3.bf16.msra.mxu0 %v291_v0  ;;  %290 = vmatpush3.bf16.msra.mxu1 %v291_v0  ;;  %v298_v7 = vld [vmem:[%s407_s0 + $0x18] sm:$0xff]  }
   0x4   :  { %273 = vmatprep.mubr.msk.bf16.mxu0 %vm86_vm0, %v292_v1  ;;  %281 = vmatprep.mubr.msk.bf16.mxu1 %vm86_vm0, %v293_v2  ;;  %v299_v8 = vld [vmem:[%s407_s0 + $0x38] sm:$0xff]   ;;  %v244_v9 = vld [vmem:[%s408_s2] ss:$0 sm:$0xff] }
   0x6   :  { %274 = vmatmul.mubr.msk.bf16.vlgmr.msra.gmra.mrb[0].mxu0 %vm86_vm0, %v294_v3  ;;  %282 = vmatmul.mubr.msk.bf16.vlgmr.msra.gmra.mrb[0].mxu1 %vm86_vm0, %v295_v4 }
   0x7   :  { %277 = vmatprep.mubr.msk.bf16.mxu0 %vm86_vm0, %v296_v5  ;;  %285 = vmatprep.mubr.msk.bf16.mxu1 %vm86_vm0, %v297_v6 }
   0xe   :  { %278 = vmatmul.mubr.msk.bf16.gmra.mrb[4].mxu0 %vm86_vm0, %v298_v7  ;;  %286 = vmatmul.mubr.msk.bf16.gmra.mrb[4].mxu1 %vm86_vm0, %v299_v8 }
  0xd9   :  { %v275_v10 = vpop.f32.mrb[0].mxu0  ;;  %v283_v11 = vpop.f32.mrb[0].mxu1 }
  0xda   :  { %v154_v12 = vadd.f32 %v275_v10, %v244_v9  ;;  %v186_v13 = vadd.f32 %v283_v11, %v244_v9  ;;  %v145_v14 = vpop.f32.mrb[1].mxu0  ;;  %v177_v15 = vpop.f32.mrb[1].mxu1 }
  0xdb   :  { %v146_v16 = vadd.f32 %v244_v9, %v145_v14  ;;  %v178_v17 = vadd.f32 %v244_v9, %v177_v15  ;;  %v276_v18 = vpop.f32.mrb[2].mxu0  ;;  %v284_v19 = vpop.f32.mrb[2].mxu1 }
  0xdc   :  { %v210_v20 = vmax.f32 %v154_v12, 0.0  ;;  %v218_v21 = vmax.f32 %v186_v13, 0.0  ;;  %v157_v22 = vadd.f32 %v276_v18, %v244_v9  ;;  %v189_v23 = vadd.f32 %v284_v19, %v244_v9  ;;  %v148_v24 = vpop.f32.mrb[3].mxu0  ;;  %v180_v25 = vpop.f32.mrb[3].mxu1 }
  0xdd   :  { %v208_v26 = vmax.f32 %v146_v16, 0.0  ;;  %v216_v27 = vmax.f32 %v178_v17, 0.0  ;;  %v149_v28 = vadd.f32 %v244_v9, %v148_v24  ;;  %v181_v29 = vadd.f32 %v244_v9, %v180_v25 }
  0xde   :  { %226 = vst [vmem:[%s409_s3 + $0x10] sm:$0xff] %v210_v20  ;;  %234 = vst [vmem:[%s409_s3 + $0x50] sm:$0xff] %v218_v21  ;;  %v211_v30 = vmax.f32 %v157_v22, 0.0  ;;  %v219_v31 = vmax.f32 %v189_v23, 0.0 }
  0xdf   :  { %224 = vst [vmem:[%s409_s3] sm:$0xff] %v208_v26  ;;  %232 = vst [vmem:[%s409_s3 + $0x40] sm:$0xff] %v216_v27  ;;  %v209_v32 = vmax.f32 %v149_v28, 0.0  ;;  %v217_v33 = vmax.f32 %v181_v29, 0.0 }
  0xe0   :  { %227 = vst [vmem:[%s409_s3 + $0x18] sm:$0xff] %v211_v30  ;;  %235 = vst [vmem:[%s409_s3 + $0x58] sm:$0xff] %v219_v31 }
  0xe1   :  { %225 = vst [vmem:[%s409_s3 + $0x8] sm:$0xff] %v209_v32  ;;  %233 = vst [vmem:[%s409_s3 + $0x48] sm:$0xff] %v217_v33  ;;  %v279_v34 = vpop.f32.mrb[4].mxu0  ;;  %v287_v35 = vpop.f32.mrb[4].mxu1 }
  0xe2   :  { %v170_v36 = vadd.f32 %v279_v34, %v244_v9  ;;  %v202_v37 = vadd.f32 %v287_v35, %v244_v9  ;;  %v161_v38 = vpop.f32.mrb[5].mxu0  ;;  %v193_v39 = vpop.f32.mrb[5].mxu1 }
  0xe3   :  { %v162_v40 = vadd.f32 %v244_v9, %v161_v38  ;;  %v194_v41 = vadd.f32 %v244_v9, %v193_v39  ;;  %v280_v42 = vpop.f32.mrb[6].mxu0  ;;  %v288_v43 = vpop.f32.mrb[6].mxu1 }
  0xe4   :  { %v214_v44 = vmax.f32 %v170_v36, 0.0  ;;  %v222_v45 = vmax.f32 %v202_v37, 0.0  ;;  %v173_v46 = vadd.f32 %v280_v42, %v244_v9  ;;  %v205_v47 = vadd.f32 %v288_v43, %v244_v9  ;;  %v164_v48 = vpop.f32.mrb[7].mxu0  ;;  %v196_v49 = vpop.f32.mrb[7].mxu1 }
  0xe5   :  { %v212_v50 = vmax.f32 %v162_v40, 0.0  ;;  %v220_v51 = vmax.f32 %v194_v41, 0.0  ;;  %v165_v52 = vadd.f32 %v244_v9, %v164_v48  ;;  %v197_v53 = vadd.f32 %v244_v9, %v196_v49 }
  0xe6   :  { %230 = vst [vmem:[%s409_s3 + $0x30] sm:$0xff] %v214_v44  ;;  %238 = vst [vmem:[%s409_s3 + $0x70] sm:$0xff] %v222_v45  ;;  %v215_v54 = vmax.f32 %v173_v46, 0.0  ;;  %v223_v55 = vmax.f32 %v205_v47, 0.0 }
  0xe7   :  { %228 = vst [vmem:[%s409_s3 + $0x20] sm:$0xff] %v212_v50  ;;  %236 = vst [vmem:[%s409_s3 + $0x60] sm:$0xff] %v220_v51  ;;  %v213_v56 = vmax.f32 %v165_v52, 0.0  ;;  %v221_v57 = vmax.f32 %v197_v53, 0.0 }
  0xe8   :  { %231 = vst [vmem:[%s409_s3 + $0x38] sm:$0xff] %v215_v54  ;;  %239 = vst [vmem:[%s409_s3 + $0x78] sm:$0xff] %v223_v55 }
  0xe9   :  { %229 = vst [vmem:[%s409_s3 + $0x28] sm:$0xff] %v213_v56  ;;  %237 = vst [vmem:[%s409_s3 + $0x68] sm:$0xff] %v221_v57 }

// kernel: deeplab_forward.19
= control target key start
LH: loop header
LB: loop body
LE: loop exit
PB: predicated region body
PF: predicated region fallthrough
CT: control target
= control target key end

     0   :  { %v234_v0 = vmov 0   ;;  %vm116_vm0 = vcmask 130048   ;;  %s309_s1 = inlined_call_operand.vmem [shape: bf16[144,128], index: 1, kind: input, shape index: {}]   ;;  %s310_s0 = inlined_call_operand.vmem [shape: bf16[32,144], index: 0, kind: input, shape index: {}]   ;;  %s311_s2 = inlined_call_operand.vmem [shape: f32[1,128], index: 2, kind: input, shape index: {}]   ;;  %s312_s3 = inlined_call_operand.vmem [shape: f32[32,128], index: 3, kind: output, shape index: {}]  }
   0x1   :  { %123 = vmatprep.subr.bf16.mxu0 %v234_v0  ;;  %200 = vmatprep.subr.bf16.mxu1 %v234_v0  ;;  %v219_v1 = vld [vmem:[%s309_s1] sm:$0xff]   ;;  %v220_v2 = vld [vmem:[%s309_s1 + $0x8] sm:$0xff]   ;;  %v221_v3 = vld [vmem:[%s309_s1 + $0x10] sm:$0xff]  }
   0x2   :  { %124 = vmatpush1.bf16.msra.mxu0 %v219_v1  ;;  %209 = vmatpush1.bf16.msra.mxu1 %v219_v1  ;;  %v222_v4 = vld [vmem:[%s309_s1 + $0x18] sm:$0xff]   ;;  %v230_v5 = vld [vmem:[%s310_s0 + $0x4] ss:$8 sps:$4 sm:$0xff]   ;;  %v225_v9 = vld [vmem:[%s309_s1 + $0x30] sm:$0xff]  }
   0x3   :  { %125 = vmatprep.subr.bf16.mxu0 %v234_v0  ;;  %201 = vmatprep.subr.bf16.mxu1 %v234_v0  ;;  %v233_v6 = vld [vmem:[%s310_s0 + $0x14] ss:$8 sps:$4 sm:$0xff]   ;;  %v223_v7 = vld [vmem:[%s309_s1 + $0x20] sm:$0xff]   ;;  %v224_v8 = vld [vmem:[%s309_s1 + $0x28] sm:$0xff]  }
   0x4   :  { %198 = vmatprep.mubr.msk.bf16.mxu0 %vm116_vm0, %v230_v5  ;;  %199 = vmatprep.mubr.msk.bf16.mxu1 %vm116_vm0, %v233_v6  ;;  %v226_v10 = vld [vmem:[%s309_s1 + $0x38] sm:$0xff]   ;;  %v227_v11 = vld [vmem:[%s309_s1 + $0x40] sm:$0xff]  }
   0x5   :  { %v228_v12 = vld [vmem:[%s310_s0] ss:$8 sps:$4 sm:$0xff]   ;;  %v231_v13 = vld [vmem:[%s310_s0 + $0x10] ss:$8 sps:$4 sm:$0xff]  }
   0x6   :  { %126 = vmatpush1.bf16.msra.mxu0 %v220_v2  ;;  %210 = vmatpush1.bf16.msra.mxu1 %v220_v2  ;;  %v184_v14 = vld [vmem:[%s311_s2] ss:$0 sm:$0xff] }
   0x7   :  { %127 = vmatprep.subr.bf16.mxu0 %v234_v0  ;;  %202 = vmatprep.subr.bf16.mxu1 %v234_v0 }
   0xa   :  { %128 = vmatpush1.bf16.msra.mxu0 %v221_v3  ;;  %211 = vmatpush1.bf16.msra.mxu1 %v221_v3 }
   0xb   :  { %129 = vmatprep.subr.bf16.mxu0 %v234_v0  ;;  %203 = vmatprep.subr.bf16.mxu1 %v234_v0 }
   0xe   :  { %130 = vmatpush1.bf16.msra.mxu0 %v222_v4  ;;  %212 = vmatpush1.bf16.msra.mxu1 %v222_v4 }
   0xf   :  { %131 = vmatprep.subr.bf16.mxu0 %v234_v0  ;;  %204 = vmatprep.subr.bf16.mxu1 %v234_v0 }
  0x12   :  { %132 = vmatpush1.bf16.msra.mxu0 %v223_v7  ;;  %213 = vmatpush1.bf16.msra.mxu1 %v223_v7 }
  0x13   :  { %133 = vmatprep.subr.bf16.mxu0 %v234_v0  ;;  %205 = vmatprep.subr.bf16.mxu1 %v234_v0 }
  0x16   :  { %134 = vmatpush1.bf16.msra.mxu0 %v224_v8  ;;  %214 = vmatpush1.bf16.msra.mxu1 %v224_v8 }
  0x17   :  { %135 = vmatprep.subr.bf16.mxu0 %v234_v0  ;;  %206 = vmatprep.subr.bf16.mxu1 %v234_v0 }
  0x1a   :  { %136 = vmatpush1.bf16.msra.mxu0 %v225_v9  ;;  %215 = vmatpush1.bf16.msra.mxu1 %v225_v9 }
  0x1b   :  { %137 = vmatprep.subr.bf16.mxu0 %v234_v0  ;;  %207 = vmatprep.subr.bf16.mxu1 %v234_v0 }
  0x1e   :  { %138 = vmatpush1.bf16.msra.mxu0 %v226_v10  ;;  %216 = vmatpush1.bf16.msra.mxu1 %v226_v10 }
  0x1f   :  { %139 = vmatprep.subr.bf16.mxu0 %v234_v0  ;;  %208 = vmatprep.subr.bf16.mxu1 %v234_v0 }
  0x22   :  { %140 = vmatpush1.bf16.msra.mxu0 %v227_v11  ;;  %217 = vmatpush1.bf16.msra.mxu1 %v227_v11 }
  0x25   :  { %156 = vmatmul.mubr.bf16.vlgmr.msra.gmra.mrb[0].mxu0 %v228_v12  ;;  %164 = vmatmul.mubr.bf16.vlgmr.msra.gmra.mrb[0].mxu1 %v231_v13 }
  0xf8   :  { %v157_v15 = vpop.f32.mrb[0].mxu0  ;;  %v165_v16 = vpop.f32.mrb[0].mxu1 }
  0xf9   :  { %v158_v17 = vadd.f32 %v184_v14, %v157_v15  ;;  %v166_v18 = vadd.f32 %v184_v14, %v165_v16  ;;  %v159_v19 = vpop.f32.mrb[1].mxu0  ;;  %v167_v20 = vpop.f32.mrb[1].mxu1 }
  0xfa   :  { %v160_v21 = vpop.f32.mrb[2].mxu0  ;;  %v168_v22 = vpop.f32.mrb[2].mxu1 }
  0xfb   :  { %v172_v23 = vmax.f32 %v158_v17, 0.0  ;;  %v174_v24 = vmax.f32 %v166_v18, 0.0  ;;  %v161_v25 = vadd.f32 %v184_v14, %v160_v21  ;;  %v169_v26 = vadd.f32 %v184_v14, %v168_v22  ;;  %v162_v27 = vpop.f32.mrb[3].mxu0  ;;  %v170_v28 = vpop.f32.mrb[3].mxu1 }
  0xfd   :  { %176 = vst [vmem:[%s312_s3] sm:$0xff] %v172_v23  ;;  %178 = vst [vmem:[%s312_s3 + $0x10] sm:$0xff] %v174_v24  ;;  %v173_v29 = vmax.f32 %v161_v25, 0.0  ;;  %v175_v30 = vmax.f32 %v169_v26, 0.0 }
  0xff   :  { %177 = vst [vmem:[%s312_s3 + $0x8] sm:$0xff] %v173_v29  ;;  %179 = vst [vmem:[%s312_s3 + $0x18] sm:$0xff] %v175_v30 }

// kernel: deeplab_forward.20
= control target key start
LH: loop header
LB: loop body
LE: loop exit
PB: predicated region body
PF: predicated region fallthrough
CT: control target
= control target key end

     0   :  { %v226_v0 = vmov 0   ;;  %vm137_vm0 = vcmask 719872   ;;  %vm141_vm1 = vcmask 1043456   ;;  %s298_s1 = inlined_call_operand.vmem [shape: bf16[216,128], index: 1, kind: input, shape index: {}]   ;;  %s299_s0 = inlined_call_operand.vmem [shape: bf16[8,216], index: 0, kind: input, shape index: {}]   ;;  %s300_s2 = inlined_call_operand.vmem [shape: f32[1,128], index: 2, kind: input, shape index: {}]   ;;  %s301_s3 = inlined_call_operand.vmem [shape: f32[8,128], index: 3, kind: output, shape index: {}]  }
   0x1   :  { %145 = vmatprep.subr.bf16.mxu0 %v226_v0  ;;  %v210_v1 = vld [vmem:[%s298_s1] sm:$0xff]   ;;  %v211_v2 = vld [vmem:[%s298_s1 + $0x8] sm:$0xff]   ;;  %v212_v3 = vld [vmem:[%s298_s1 + $0x10] sm:$0xff]  }
   0x2   :  { %146 = vmatpush1.bf16.msra.mxu0 %v210_v1  ;;  %v213_v4 = vld [vmem:[%s298_s1 + $0x18] sm:$0xff]   ;;  %v15_v5 = vld [vmem:[%s299_s0] sm:$0xff]  ;;  %v215_v8 = vld [vmem:[%s298_s1 + $0x28] sm:$0xff]  }
   0x3   :  { %147 = vmatprep.subr.bf16.mxu0 %v226_v0  ;;  %v214_v6 = vld [vmem:[%s298_s1 + $0x20] sm:$0xff]   ;;  %v193_v7 = vcombine.high %v15_v5, %v15_v5  ;;  %v216_v9 = vld [vmem:[%s298_s1 + $0x30] sm:$0xff]   ;;  %v217_v10 = vld [vmem:[%s298_s1 + $0x38] sm:$0xff]   ;;  %v192_v18 = vcombine.low %v15_v5, %v15_v5 }
   0x4   :  { %v218_v11 = vld [vmem:[%s298_s1 + $0x40] sm:$0xff]   ;;  %v219_v12 = vld [vmem:[%s298_s1 + $0x48] sm:$0xff]   ;;  %v220_v13 = vld [vmem:[%s298_s1 + $0x50] sm:$0xff]  }
   0x5   :  { %208 = vmatprep.mubr.msk.bf16.mxu0 %vm137_vm0, %v193_v7  ;;  %v221_v14 = vld [vmem:[%s298_s1 + $0x58] sm:$0xff]   ;;  %v222_v15 = vld [vmem:[%s298_s1 + $0x60] sm:$0xff]   ;;  %v223_v16 = vld [vmem:[%s298_s1 + $0x68] ss:$0 sps:$4 sm:$0xff]  }
   0x6   :  { %148 = vmatpush1.bf16.msra.mxu0 %v211_v2  ;;  %v143_v17 = vsel %vm141_vm1, %v223_v16, 0  ;;  %v191_v19 = vld [vmem:[%s300_s2] ss:$0 sm:$0xff] }
   0x7   :  { %149 = vmatprep.subr.bf16.mxu0 %v226_v0 }
   0xa   :  { %150 = vmatpush1.bf16.msra.mxu0 %v212_v3 }
   0xb   :  { %151 = vmatprep.subr.bf16.mxu0 %v226_v0 }
   0xe   :  { %152 = vmatpush1.bf16.msra.mxu0 %v213_v4 }
   0xf   :  { %153 = vmatprep.subr.bf16.mxu0 %v226_v0 }
  0x12   :  { %154 = vmatpush1.bf16.msra.mxu0 %v214_v6 }
  0x13   :  { %155 = vmatprep.subr.bf16.mxu0 %v226_v0 }
  0x16   :  { %156 = vmatpush1.bf16.msra.mxu0 %v215_v8 }
  0x17   :  { %157 = vmatprep.subr.bf16.mxu0 %v226_v0 }
  0x1a   :  { %158 = vmatpush1.bf16.msra.mxu0 %v216_v9 }
  0x1b   :  { %159 = vmatprep.subr.bf16.mxu0 %v226_v0 }
  0x1e   :  { %160 = vmatpush1.bf16.msra.mxu0 %v217_v10 }
  0x1f   :  { %161 = vmatprep.subr.bf16.mxu0 %v226_v0 }
  0x22   :  { %162 = vmatpush1.bf16.msra.mxu0 %v218_v11 }
  0x23   :  { %163 = vmatprep.subr.bf16.mxu0 %v226_v0 }
  0x26   :  { %164 = vmatpush1.bf16.msra.mxu0 %v219_v12 }
  0x27   :  { %165 = vmatprep.subr.bf16.mxu0 %v226_v0 }
  0x2a   :  { %166 = vmatpush1.bf16.msra.mxu0 %v220_v13 }
  0x2b   :  { %167 = vmatprep.subr.bf16.mxu0 %v226_v0 }
  0x2e   :  { %168 = vmatpush1.bf16.msra.mxu0 %v221_v14 }
  0x2f   :  { %169 = vmatprep.subr.bf16.mxu0 %v226_v0 }
  0x32   :  { %170 = vmatpush1.bf16.msra.mxu0 %v222_v15 }
  0x33   :  { %171 = vmatprep.subr.bf16.mxu0 %v226_v0 }
  0x36   :  { %172 = vmatpush1.bf16.msra.mxu0 %v143_v17 }
  0x39   :  { %178 = vmatmul.mubr.bf16.vlgmr.msra.gmra.mrb[0].mxu0 %v192_v18 }
 0x10c   :  { %v179_v20 = vpop.f32.mrb[0].mxu0 }
 0x10d   :  { %v180_v21 = vadd.f32 %v191_v19, %v179_v20  ;;  %v181_v22 = vpop.f32.mrb[1].mxu0 }
 0x10e   :  { %v182_v23 = vpop.f32.mrb[2].mxu0 }
 0x10f   :  { %v185_v24 = vmax.f32 %v180_v21, 0.0  ;;  %v183_v25 = vpop.f32.mrb[3].mxu0 }
 0x111   :  { %186 = vst [vmem:[%s301_s3] sm:$0xff] %v185_v24 }

// kernel: deeplab_forward.25
= control target key start
LH: loop header
LB: loop body
LE: loop exit
PB: predicated region body
PF: predicated region fallthrough
CT: control target
= control target key end

     0   :  { %vm10_vm0 = vcmask 257024   ;;  %vm30_vm1 = vcmask 1041409   ;;  %vm33_vm2 = vcmask 254976   ;;  %s58_s0 = inlined_call_operand.vmem [shape: f32[2,4,32], index: 0, kind: input, shape index: {}]   ;;  %s59_s1 = inlined_call_operand.vmem [shape: f32[2,32], index: 1, kind: output, shape index: {}]  }
   0x1   :  { %v8_v0 = vld [vmem:[%s58_s0] sm:$0xf]  ;;  %v9_v1 = vld [vmem:[%s58_s0 + $0x4] sm:$0xf] }
   0x2   :  { %v11_v2 = vsel %vm10_vm0, %v8_v0, 0.0  ;;  %v18_v3 = vsel %vm10_vm0, %v9_v1, 0.0 }
   0x3   :  { %v12_v4 = vrot.slane %v11_v2, 4  ;;  %v19_v5 = vrot.slane %v18_v3, 4 }
   0x5   :  { %v13_v6 = vadd.f32 %v12_v4, %v11_v2  ;;  %v20_v7 = vadd.f32 %v19_v5, %v18_v3 }
   0x7   :  { %v14_v8 = vrot.slane %v13_v6, 2  ;;  %v21_v9 = vrot.slane %v20_v7, 2 }
   0x9   :  { %v15_v10 = vadd.f32 %v14_v8, %v13_v6  ;;  %v22_v11 = vadd.f32 %v21_v9, %v20_v7 }
   0xb   :  { %v16_v12 = vrot.slane %v15_v10, 1  ;;  %v23_v13 = vrot.slane %v22_v11, 1 }
   0xd   :  { %v17_v14 = vadd.f32 %v16_v12, %v15_v10  ;;  %v24_v15 = vadd.f32 %v23_v13, %v22_v11 }
   0xf   :  { %v26_v16 = vmul.f32 0.25, %v17_v14  ;;  %v27_v17 = vmul.f32 0.25, %v24_v15 }
  0x11   :  { %v31_v18 = vsel %vm30_vm1, %v27_v17, %v26_v16 }
  0x12   :  { %34 = vst.msk [vmem:[%s59_s1] sm:$0x3] %vm33_vm2, %v31_v18 }

// kernel: deeplab_forward.21
= control target key start
LH: loop header
LB: loop body
LE: loop exit
PB: predicated region body
PF: predicated region fallthrough
CT: control target
= control target key end

     0   :  { %v108_v0 = vmov 0.0   ;;  %vm109_vm0 = vmmov 0   ;;  %vm39_vm1 = vcmask 261120   ;;  %s145_s1 = inlined_call_operand.vmem [shape: bf16[32,128], index: 1, kind: input, shape index: {}]   ;;  %s146_s0 = inlined_call_operand.vmem [shape: bf16[8,32], index: 0, kind: input, shape index: {}]   ;;  %s147_s2 = inlined_call_operand.vmem [shape: f32[1,128], index: 2, kind: input, shape index: {}]   ;;  %s148_s3 = inlined_call_operand.vmem [shape: f32[8,128], index: 3, kind: output, shape index: {}]  }
   0x1   :  { %96 = vmatprep.subr.bf16.mxu0 %v108_v0  ;;  %v106_v1 = vld [vmem:[%s145_s1] sm:$0xff]   ;;  %100 = vmatprep.mubr.msk.bf16.mxu0 %vm109_vm0, %v108_v0  ;;  %v107_v2 = vld [vmem:[%s145_s1 + $0x8] sm:$0xff]  }
   0x2   :  { %97 = vmatpush3.bf16.msra.mxu0 %v106_v1  ;;  %v15_v3 = vld [vmem:[%s146_s0] sm:$0xf] }
   0x3   :  { %98 = vmatprep.subr.bf16.mxu0 %v108_v0  ;;  %v89_v4 = vld [vmem:[%s147_s2] ss:$0 sm:$0xff] }
   0x6   :  { %99 = vmatpush3.bf16.msra.mxu0 %v107_v2 }
   0x9   :  { %101 = vmatmul.mubr.msk.bf16.vlgmr.msra.gmra.mrb[0].mxu0 %vm39_vm1, %v15_v3 }
  0xdc   :  { %v77_v5 = vpop.f32.mrb[0].mxu0 }
  0xdd   :  { %v78_v6 = vadd.f32 %v89_v4, %v77_v5  ;;  %v102_v7 = vpop.f32.mrb[1].mxu0 }
  0xde   :  { %v80_v8 = vpop.f32.mrb[2].mxu0 }
  0xdf   :  { %v83_v9 = vmax.f32 %v78_v6, 0.0  ;;  %v103_v10 = vpop.f32.mrb[3].mxu0 }
  0xe1   :  { %84 = vst [vmem:[%s148_s3] sm:$0xff] %v83_v9 }

// kernel: deeplab_forward.22
= control target key start
LH: loop header
LB: loop body
LE: loop exit
PB: predicated region body
PF: predicated region fallthrough
CT: control target
= control target key end

     0   :  { %v347_v1 = vmov 0.0   ;;  %vm348_vm0 = vmmov 0   ;;  %vm178_vm1 = vcmask 261120   ;;  %s435_s1 = inlined_call_operand.vmem [shape: bf16[288,128], index: 1, kind: input, shape index: {}]   ;;  %s436_s0 = inlined_call_operand.vmem [shape: bf16[8,288], index: 0, kind: input, shape index: {}]   ;;  %s437_s2 = inlined_call_operand.vmem [shape: f32[1,128], index: 2, kind: input, shape index: {}]   ;;  %s438_s3 = inlined_call_operand.vmem [shape: f32[8,128], index: 3, kind: output, shape index: {}]  }
   0x1   :  { %v326_v0 = vld [vmem:[%s435_s1 + $0x40] sm:$0xff]   ;;  %316 = vmatprep.subr.bf16.mxu1 %v347_v1  ;;  %320 = vmatprep.mubr.msk.bf16.mxu1 %vm348_vm0, %v347_v1  ;;  %v328_v3 = vld [vmem:[%s435_s1 + $0x48] sm:$0xff]   ;;  %v330_v5 = vld [vmem:[%s435_s1 + $0x50] sm:$0xff]  }
   0x2   :  { %v327_v2 = vld [vmem:[%s435_s1] sm:$0xff]   ;;  %291 = vmatprep.subr.bf16.mxu0 %v326_v0  ;;  %v329_v4 = vld [vmem:[%s435_s1 + $0x8] sm:$0xff]   ;;  %v331_v6 = vld [vmem:[%s435_s1 + $0x10] sm:$0xff]  }
   0x3   :  { %292 = vmatpush3.bf16.msra.mxu0 %v327_v2  ;;  %v332_v7 = vld [vmem:[%s435_s1 + $0x58] sm:$0xff]   ;;  %v334_v9 = vld [vmem:[%s435_s1 + $0x60] sm:$0xff]   ;;  %v336_v12 = vld [vmem:[%s435_s1 + $0x68] sm:$0xff]  }
   0x4   :  { %293 = vmatprep.subr.bf16.mxu0 %v328_v3  ;;  %v333_v8 = vld [vmem:[%s435_s1 + $0x18] sm:$0xff]   ;;  %v340_v10 = vld [vmem:[%s435_s1 + $0x80] sm:$0xff]   ;;  %v346_v15 = vld [vmem:[%s435_s1 + $0x88] sm:$0xff]  }
   0x5   :  { %v335_v11 = vld [vmem:[%s435_s1 + $0x20] sm:$0xff]   ;;  %317 = vmatpush3.bf16.msra.mxu1 %v340_v10  ;;  %v337_v16 = vld [vmem:[%s435_s1 + $0x28] sm:$0xff]   ;;  %v338_v17 = vld [vmem:[%s435_s1 + $0x70] sm:$0xff]  }
   0x6   :  { %318 = vmatprep.subr.bf16.mxu1 %v347_v1  ;;  %v15_v13 = vld [vmem:[%s436_s0] sm:$0xff]  ;;  %v345_v18 = vld [vmem:[%s436_s0 + $0x8] ss:$0 sps:$4 sm:$0xff]   ;;  %v339_v19 = vld [vmem:[%s435_s1 + $0x30] sm:$0xff]  }
   0x7   :  { %294 = vmatpush3.bf16.msra.mxu0 %v329_v4  ;;  %v270_v14 = vcombine.high %v15_v13, %v15_v13  ;;  %v341_v20 = vld [vmem:[%s435_s1 + $0x78] sm:$0xff]   ;;  %v269_v22 = vcombine.low %v15_v13, %v15_v13  ;;  %v268_v29 = vld [vmem:[%s437_s2] ss:$0 sm:$0xff] }
   0x8   :  { %295 = vmatprep.subr.bf16.mxu0 %v330_v5  ;;  %v342_v21 = vld [vmem:[%s435_s1 + $0x38] sm:$0xff]  }
   0x9   :  { %214 = vmatprep.mubr.bf16.mxu0 %v270_v14  ;;  %319 = vmatpush3.bf16.msra.mxu1 %v346_v15 }
   0xb   :  { %296 = vmatpush3.bf16.msra.mxu0 %v331_v6 }
   0xc   :  { %297 = vmatprep.subr.bf16.mxu0 %v332_v7  ;;  %321 = vmatmul.mubr.msk.bf16.vlgmr.msra.gmra.mrb[0].mxu1 %vm178_vm1, %v345_v18 }
   0xf   :  { %298 = vmatpush3.bf16.msra.mxu0 %v333_v8 }
  0x10   :  { %299 = vmatprep.subr.bf16.mxu0 %v334_v9 }
  0x13   :  { %300 = vmatpush3.bf16.msra.mxu0 %v335_v11 }
  0x14   :  { %301 = vmatprep.subr.bf16.mxu0 %v336_v12 }
  0x17   :  { %302 = vmatpush3.bf16.msra.mxu0 %v337_v16 }
  0x18   :  { %303 = vmatprep.subr.bf16.mxu0 %v338_v17 }
  0x1b   :  { %304 = vmatpush3.bf16.msra.mxu0 %v339_v19 }
  0x1c   :  { %305 = vmatprep.subr.bf16.mxu0 %v341_v20 }
  0x1f   :  { %306 = vmatpush3.bf16.msra.mxu0 %v342_v21 }
  0x22   :  { %215 = vmatmul.mubr.bf16.vlgmr.msra.gmra.mrb[0].mxu0 %v269_v22 }
  0xdf   :  { %v256_v23 = vpop.f32.mrb[0].mxu1 }
  0xe0   :  { %v322_v24 = vpop.f32.mrb[1].mxu1 }
  0xe1   :  { %v259_v25 = vpop.f32.mrb[2].mxu1 }
  0xe2   :  { %v323_v26 = vpop.f32.mrb[3].mxu1 }
  0xf5   :  { %v307_v27 = vpop.f32.mrb[0].mxu0 }
  0xf6   :  { %v308_v28 = vpop.f32.mrb[1].mxu0 }
  0xf7   :  { %v309_v30 = vadd.f32 %v308_v28, %v307_v27  ;;  %v310_v31 = vpop.f32.mrb[2].mxu0 }
  0xf8   :  { %v311_v32 = vpop.f32.mrb[3].mxu0 }
  0xf9   :  { %v217_v33 = vadd.f32 %v309_v30, %v268_v29 }
  0xfb   :  { %v257_v34 = vadd.f32 %v256_v23, %v217_v33 }
  0xfd   :  { %v262_v35 = vmax.f32 %v257_v34, 0.0 }
  0xff   :  { %263 = vst [vmem:[%s438_s3] sm:$0xff] %v262_v35 }

// kernel: deeplab_forward.26
= control target key start
LH: loop header
LB: loop body
LE: loop exit
PB: predicated region body
PF: predicated region fallthrough
CT: control target
= control target key end

     0   :  { %v108_v0 = vmov 0.0   ;;  %vm109_vm0 = vmmov 0   ;;  %vm39_vm1 = vcmask 261120   ;;  %s145_s1 = inlined_call_operand.vmem [shape: bf16[32,128], index: 1, kind: input, shape index: {}]   ;;  %s146_s0 = inlined_call_operand.vmem [shape: bf16[2,32], index: 0, kind: input, shape index: {}]   ;;  %s147_s2 = inlined_call_operand.vmem [shape: f32[1,128], index: 2, kind: input, shape index: {}]   ;;  %s148_s3 = inlined_call_operand.vmem [shape: f32[2,128], index: 3, kind: output, shape index: {}]  }
   0x1   :  { %96 = vmatprep.subr.bf16.mxu0 %v108_v0  ;;  %v106_v1 = vld [vmem:[%s145_s1] sm:$0xff]   ;;  %100 = vmatprep.mubr.msk.bf16.mxu0 %vm109_vm0, %v108_v0  ;;  %v107_v2 = vld [vmem:[%s145_s1 + $0x8] sm:$0xff]  }
   0x2   :  { %97 = vmatpush3.bf16.msra.mxu0 %v106_v1  ;;  %v15_v3 = vld [vmem:[%s146_s0] sm:$0x1] }
   0x3   :  { %98 = vmatprep.subr.bf16.mxu0 %v108_v0  ;;  %v89_v4 = vld [vmem:[%s147_s2] ss:$0 sm:$0xff] }
   0x6   :  { %99 = vmatpush3.bf16.msra.mxu0 %v107_v2 }
   0x9   :  { %101 = vmatmul.mubr.msk.bf16.vlgmr.msra.gmra.mrb[0].mxu0 %vm39_vm1, %v15_v3 }
  0xdc   :  { %v77_v5 = vpop.f32.mrb[0].mxu0 }
  0xdd   :  { %v78_v6 = vadd.f32 %v89_v4, %v77_v5  ;;  %v102_v7 = vpop.f32.mrb[1].mxu0 }
  0xde   :  { %v80_v8 = vpop.f32.mrb[2].mxu0 }
  0xdf   :  { %v83_v9 = vmax.f32 %v78_v6, 0.0  ;;  %v103_v10 = vpop.f32.mrb[3].mxu0 }
  0xe1   :  { %84 = vst [vmem:[%s148_s3] sm:$0x3] %v83_v9 }

// kernel: deeplab_forward.27
= control target key start
LH: loop header
LB: loop body
LE: loop exit
PB: predicated region body
PF: predicated region fallthrough
CT: control target
= control target key end

     0   :  { %v375_v0 = vmov 0.0   ;;  %vm376_vm0 = vmmov 0   ;;  %vm51_vm1 = vcmask 130048   ;;  %s483_s6 = inlined_call_operand.vmem [shape: bf16[16,128], index: 6, kind: input, shape index: {}]   ;;  %s484_s5 = inlined_call_operand.vmem [shape: bf16[16,128], index: 5, kind: input, shape index: {}]   ;;  %s485_s1 = inlined_call_operand.vmem [shape: bf16[8,16], index: 1, kind: input, shape index: {}]   ;;  %s486_s0 = inlined_call_operand.vmem [shape: bf16[8,16], index: 0, kind: input, shape index: {}]   ;;  %s487_s7 = inlined_call_operand.vmem [shape: bf16[16,128], index: 7, kind: input, shape index: {}]   ;;  %s488_s8 = inlined_call_operand.vmem [shape: bf16[16,128], index: 8, kind: input, shape index: {}]   ;;  %s489_s9 = inlined_call_operand.vmem [shape: bf16[16,128], index: 9, kind: input, shape index: {}]   ;;  %s490_s2 = inlined_call_operand.vmem [shape: bf16[8,16], index: 2, kind: input, shape index: {}]   ;;  %s491_s3 = inlined_call_operand.vmem [shape: bf16[8,16], index: 3, kind: input, shape index: {}]   ;;  %s492_s4 = inlined_call_operand.vmem [shape: bf16[8,16], index: 4, kind: input, shape index: {}]   ;;  %s493_s10 = inlined_call_operand.vmem [shape: f32[1,128], index: 10, kind: input, shape index: {}]   ;;  %s494_s11 = inlined_call_operand.vmem [shape: f32[8,128], index: 11, kind: output, shape index: {}]  }
   0x1   :  { %338 = vmatprep.subr.bf16.mxu0 %v375_v0  ;;  %v370_v1 = vld [vmem:[%s483_s6] sm:$0xff]   ;;  %344 = vmatprep.subr.bf16.mxu1 %v375_v0 }
   0x2   :  { %v371_v2 = vld [vmem:[%s484_s5] sm:$0xff]   ;;  %340 = vmatprep.mubr.msk.bf16.mxu0 %vm376_vm0, %v375_v0  ;;  %346 = vmatprep.mubr.msk.bf16.mxu1 %vm376_vm0, %v375_v0 }
   0x3   :  { %339 = vmatpush3.bf16.msra.mxu0 %v370_v1  ;;  %v42_v3 = vld [vmem:[%s485_s1] sm:$0xf]  ;;  %345 = vmatpush3.bf16.msra.mxu1 %v371_v2 }
   0x4   :  { %v39_v4 = vld [vmem:[%s486_s0] sm:$0xf]  ;;  %350 = vmatprep.subr.bf16.mxu0 %v375_v0  ;;  %356 = vmatprep.subr.bf16.mxu1 %v375_v0 }
   0x5   :  { %v372_v5 = vld [vmem:[%s487_s7] sm:$0xff]  }
   0x6   :  { %v373_v6 = vld [vmem:[%s488_s8] sm:$0xff]   ;;  %341 = vmatmul.mubr.msk.bf16.vlgmr.msra.gmra.mrb[0].mxu0 %vm51_vm1, %v42_v3  ;;  %347 = vmatmul.mubr.msk.bf16.vlgmr.msra.gmra.mrb[0].mxu1 %vm51_vm1, %v39_v4 }
   0x7   :  { %351 = vmatpush3.bf16.msra.mxu0 %v372_v5  ;;  %352 = vmatprep.mubr.msk.bf16.mxu0 %vm376_vm0, %v375_v0  ;;  %v144_v7 = vld [vmem:[%s490_s2] sm:$0xf] }
   0x8   :  { %357 = vmatpush3.bf16.msra.mxu1 %v373_v6  ;;  %362 = vmatprep.subr.bf16.mxu0 %v375_v0  ;;  %v374_v8 = vld [vmem:[%s489_s9] sm:$0xff]  }
   0x9   :  { %358 = vmatprep.mubr.msk.bf16.mxu1 %vm376_vm0, %v375_v0  ;;  %v197_v9 = vld [vmem:[%s491_s3] sm:$0xf] }
   0xa   :  { %v250_v10 = vld [vmem:[%s492_s4] sm:$0xf] }
   0xb   :  { %v327_v31 = vld [vmem:[%s493_s10] ss:$0 sm:$0xff] }
   0xe   :  { %353 = vmatmul.mubr.msk.bf16.vlgmr.msra.gmra.mrb[4].mxu0 %vm51_vm1, %v144_v7  ;;  %359 = vmatmul.mubr.msk.bf16.vlgmr.msra.gmra.mrb[4].mxu1 %vm51_vm1, %v197_v9 }
   0xf   :  { %363 = vmatpush3.bf16.msra.mxu0 %v374_v8  ;;  %364 = vmatprep.mubr.msk.bf16.mxu0 %vm376_vm0, %v375_v0 }
  0x16   :  { %365 = vmatmul.mubr.msk.bf16.vlgmr.msra.gmra.mrb[8].mxu0 %vm51_vm1, %v250_v10 }
  0xd9   :  { %v89_v11 = vpop.f32.mrb[0].mxu0  ;;  %v138_v13 = vpop.f32.mrb[0].mxu1 }
  0xda   :  { %v342_v12 = vpop.f32.mrb[1].mxu0  ;;  %v139_v14 = vadd.f32 %v138_v13, %v89_v11  ;;  %v348_v16 = vpop.f32.mrb[1].mxu1 }
  0xdb   :  { %v92_v15 = vpop.f32.mrb[2].mxu0  ;;  %v141_v18 = vpop.f32.mrb[2].mxu1 }
  0xdc   :  { %v343_v17 = vpop.f32.mrb[3].mxu0  ;;  %v349_v19 = vpop.f32.mrb[3].mxu1 }
  0xe1   :  { %v190_v20 = vpop.f32.mrb[4].mxu0  ;;  %v243_v23 = vpop.f32.mrb[4].mxu1 }
  0xe2   :  { %v196_v21 = vadd.f32 %v190_v20, %v139_v14  ;;  %v354_v22 = vpop.f32.mrb[5].mxu0  ;;  %v360_v25 = vpop.f32.mrb[5].mxu1 }
  0xe3   :  { %v193_v24 = vpop.f32.mrb[6].mxu0  ;;  %v246_v28 = vpop.f32.mrb[6].mxu1 }
  0xe4   :  { %v249_v26 = vadd.f32 %v243_v23, %v196_v21  ;;  %v355_v27 = vpop.f32.mrb[7].mxu0  ;;  %v361_v29 = vpop.f32.mrb[7].mxu1 }
  0xe9   :  { %v296_v30 = vpop.f32.mrb[8].mxu0 }
  0xea   :  { %v302_v32 = vadd.f32 %v296_v30, %v249_v26  ;;  %v366_v33 = vpop.f32.mrb[9].mxu0 }
  0xeb   :  { %v299_v34 = vpop.f32.mrb[10].mxu0 }
  0xec   :  { %v310_v35 = vadd.f32 %v327_v31, %v302_v32  ;;  %v367_v36 = vpop.f32.mrb[11].mxu0 }
  0xee   :  { %v311_v37 = vmax.f32 %v310_v35, 0.0 }
  0xf0   :  { %312 = vst [vmem:[%s494_s11] sm:$0xff] %v311_v37 }

// kernel: deeplab_forward.29
= control target key start
LH: loop header
LB: loop body
LE: loop exit
PB: predicated region body
PF: predicated region fallthrough
CT: control target
= control target key end

     0   :  { %vm64_vm0 = vcmask 1041408   ;;  %vm51_vm1 = vcmask 31744   ;;  %s239_s1 = inlined_call_operand.vmem [shape: bf16[4,128], index: 1, kind: input, shape index: {}]   ;;  %s240_s0 = inlined_call_operand.vmem [shape: bf16[64,4], index: 0, kind: input, shape index: {}]   ;;  %s241_s2 = inlined_call_operand.vmem [shape: f32[1,128], index: 2, kind: input, shape index: {}]   ;;  %s242_s3 = inlined_call_operand.vmem [shape: f32[64,128], index: 3, kind: output, shape index: {}]  }
   0x1   :  { %v23_v0 = vld [vmem:[%s239_s1] sm:$0x3]  ;;  %v174_v3 = vld [vmem:[%s240_s0 + $0x10] sm:$0xff]   ;;  %v175_v4 = vld [vmem:[%s240_s0 + $0x8] sm:$0xff]  }
   0x2   :  { %171 = vmatprep.subr.msk.bf16.mxu0 %vm64_vm0, %v23_v0  ;;  %172 = vmatprep.subr.msk.bf16.mxu1 %vm64_vm0, %v23_v0  ;;  %v66_v1 = vsel %vm64_vm0, %v23_v0, 0  ;;  %v173_v2 = vld [vmem:[%s240_s0] sm:$0xff]   ;;  %v176_v5 = vld [vmem:[%s240_s0 + $0x18] sm:$0xff]  }
   0x3   :  { %160 = vmatpush3.bf16.msra.mxu0 %v66_v1  ;;  %170 = vmatpush3.bf16.msra.mxu1 %v66_v1  ;;  %v145_v6 = vld [vmem:[%s241_s2] ss:$0 sm:$0xff] }
   0x4   :  { %161 = vmatprep.mubr.msk.bf16.mxu0 %vm51_vm1, %v173_v2  ;;  %165 = vmatprep.mubr.msk.bf16.mxu1 %vm51_vm1, %v174_v3 }
   0x6   :  { %162 = vmatmul.mubr.msk.bf16.vlgmr.msra.gmra.mrb[0].mxu0 %vm51_vm1, %v175_v4  ;;  %166 = vmatmul.mubr.msk.bf16.vlgmr.msra.gmra.mrb[0].mxu1 %vm51_vm1, %v176_v5 }
  0xd9   :  { %v163_v7 = vpop.f32.mrb[0].mxu0  ;;  %v167_v9 = vpop.f32.mrb[0].mxu1 }
  0xda   :  { %v111_v8 = vadd.f32 %v163_v7, %v145_v6  ;;  %v102_v10 = vpop.f32.mrb[1].mxu0  ;;  %v127_v11 = vadd.f32 %v167_v9, %v145_v6  ;;  %v118_v13 = vpop.f32.mrb[1].mxu1 }
  0xdb   :  { %v103_v12 = vadd.f32 %v145_v6, %v102_v10  ;;  %v164_v14 = vpop.f32.mrb[2].mxu0  ;;  %v119_v15 = vadd.f32 %v145_v6, %v118_v13  ;;  %v168_v17 = vpop.f32.mrb[2].mxu1 }
  0xdc   :  { %135 = vst [vmem:[%s242_s3 + $0x10] sm:$0xff] %v111_v8  ;;  %v114_v16 = vadd.f32 %v164_v14, %v145_v6  ;;  %v105_v18 = vpop.f32.mrb[3].mxu0  ;;  %139 = vst [vmem:[%s242_s3 + $0x30] sm:$0xff] %v127_v11  ;;  %v130_v19 = vadd.f32 %v168_v17, %v145_v6  ;;  %v121_v21 = vpop.f32.mrb[3].mxu1 }
  0xdd   :  { %133 = vst [vmem:[%s242_s3] sm:$0xff] %v103_v12  ;;  %v106_v20 = vadd.f32 %v145_v6, %v105_v18  ;;  %137 = vst [vmem:[%s242_s3 + $0x20] sm:$0xff] %v119_v15  ;;  %v122_v22 = vadd.f32 %v145_v6, %v121_v21 }
  0xde   :  { %136 = vst [vmem:[%s242_s3 + $0x18] sm:$0xff] %v114_v16  ;;  %140 = vst [vmem:[%s242_s3 + $0x38] sm:$0xff] %v130_v19 }
  0xdf   :  { %134 = vst [vmem:[%s242_s3 + $0x8] sm:$0xff] %v106_v20  ;;  %138 = vst [vmem:[%s242_s3 + $0x28] sm:$0xff] %v122_v22 }

// kernel: deeplab_forward.30
= control target key start
LH: loop header
LB: loop body
LE: loop exit
PB: predicated region body
PF: predicated region fallthrough
CT: control target
= control target key end

     0   :  { %v740_v0 = vmov 0   ;;  %vm147_vm0 = vcmask 588800   ;;  %vm172_vm1 = vcmask 1043456   ;;  %vm399_vm2 = vcmask 130048   ;;  %s1000_s3 = inlined_call_operand.vmem [shape: bf16[72,128], index: 3, kind: input, shape index: {}]   ;;  %s1001_s2 = inlined_call_operand.vmem [shape: bf16[144,128], index: 2, kind: input, shape index: {}]   ;;  %s1002_s1 = inlined_call_operand.vmem [shape: bf16[128,72], index: 1, kind: input, shape index: {}]   ;;  %s1003_s0 = inlined_call_operand.vmem [shape: bf16[128,144], index: 0, kind: input, shape index: {}]   ;;  %s1004_s4 = inlined_call_operand.vmem [shape: f32[1,128], index: 4, kind: input, shape index: {}]   ;;  %s1005_s5 = inlined_call_operand.vmem [shape: f32[128,128], index: 5, kind: output, shape index: {}]  }
   0x1   :  { %674 = vmatprep.subr.bf16.mxu1 %v740_v0  ;;  %v694_v1 = vld [vmem:[%s1000_s3] sm:$0xff]   ;;  %v696_v3 = vld [vmem:[%s1000_s3 + $0x8] sm:$0xff]   ;;  %v698_v5 = vld [vmem:[%s1000_s3 + $0x10] sm:$0xff]  }
   0x2   :  { %v695_v2 = vld [vmem:[%s1001_s2] sm:$0xff]   ;;  %648 = vmatprep.subr.bf16.mxu0 %v694_v1  ;;  %v697_v4 = vld [vmem:[%s1001_s2 + $0x8] sm:$0xff]   ;;  %v699_v6 = vld [vmem:[%s1001_s2 + $0x10] sm:$0xff]  }
   0x3   :  { %683 = vmatpush1.bf16.msra.mxu1 %v695_v2  ;;  %649 = vmatpush3.bf16.msra.mxu0 %v694_v1  ;;  %v700_v7 = vld [vmem:[%s1000_s3 + $0x18] sm:$0xff]   ;;  %v704_v8 = vld [vmem:[%s1002_s1] sm:$0xff]   ;;  %v706_v13 = vld [vmem:[%s1002_s1 + $0x8] sm:$0xff]  }
   0x4   :  { %675 = vmatprep.subr.bf16.mxu1 %v740_v0  ;;  %650 = vmatprep.subr.bf16.mxu0 %v696_v3  ;;  %v701_v9 = vld [vmem:[%s1001_s2 + $0x18] sm:$0xff]   ;;  %v702_v10 = vld [vmem:[%s1000_s3 + $0x20] ss:$0 sps:$4 sm:$0xff]   ;;  %v714_v14 = vld [vmem:[%s1003_s0 + $0x24] ss:$8 sps:$4 sm:$0xff]  }
   0x5   :  { %658 = vmatprep.mubr.msk.bf16.mxu0 %vm147_vm0, %v704_v8  ;;  %v703_v11 = vld [vmem:[%s1001_s2 + $0x20] sm:$0xff]   ;;  %v174_v12 = vsel %vm172_vm1, %v702_v10, 0  ;;  %v705_v15 = vld [vmem:[%s1001_s2 + $0x28] sm:$0xff]   ;;  %v709_v16 = vld [vmem:[%s1002_s1 + $0x10] sm:$0xff]   ;;  %628 = vmatprep.mubr.msk.bf16.mxu1 %vm399_vm2, %v714_v14 }
   0x6   :  { %v707_v17 = vld [vmem:[%s1001_s2 + $0x30] sm:$0xff]   ;;  %v710_v18 = vld [vmem:[%s1002_s1 + $0x18] sm:$0xff]   ;;  %v715_v20 = vld [vmem:[%s1002_s1 + $0x20] sm:$0xff]  }
   0x7   :  { %684 = vmatpush1.bf16.msra.mxu1 %v697_v4  ;;  %651 = vmatpush3.bf16.msra.mxu0 %v696_v3  ;;  %v708_v19 = vld [vmem:[%s1001_s2 + $0x38] sm:$0xff]   ;;  %v711_v21 = vld [vmem:[%s1001_s2 + $0x40] sm:$0xff]   ;;  %v716_v23 = vld [vmem:[%s1002_s1 + $0x28] sm:$0xff]  }
   0x8   :  { %676 = vmatprep.subr.bf16.mxu1 %v740_v0  ;;  %652 = vmatprep.subr.bf16.mxu0 %v698_v5  ;;  %v712_v22 = vld [vmem:[%s1003_s0 + $0x20] ss:$8 sps:$4 sm:$0xff]   ;;  %v717_v24 = vld [vmem:[%s1003_s0 + $0x34] ss:$8 sps:$4 sm:$0xff]   ;;  %v719_v26 = vld [vmem:[%s1003_s0 + $0x30] ss:$8 sps:$4 sm:$0xff]  }
   0x9   :  { %v720_v25 = vld [vmem:[%s1002_s1 + $0x30] sm:$0xff]   ;;  %v721_v27 = vld [vmem:[%s1002_s1 + $0x38] sm:$0xff]   ;;  %v722_v28 = vld [vmem:[%s1003_s0 + $0x44] ss:$8 sps:$4 sm:$0xff]  }
   0xa   :  { %v727_v29 = vld [vmem:[%s1003_s0 + $0x4] ss:$8 sps:$4 sm:$0xff]   ;;  %v724_v30 = vld [vmem:[%s1003_s0 + $0x40] ss:$8 sps:$4 sm:$0xff]   ;;  %v728_v31 = vld [vmem:[%s1003_s0 + $0x54] ss:$8 sps:$4 sm:$0xff]  }
   0xb   :  { %685 = vmatpush1.bf16.msra.mxu1 %v699_v6  ;;  %653 = vmatpush3.bf16.msra.mxu0 %v698_v5  ;;  %v725_v32 = vld [vmem:[%s1003_s0] ss:$8 sps:$4 sm:$0xff]   ;;  %v731_v33 = vld [vmem:[%s1003_s0 + $0x14] ss:$8 sps:$4 sm:$0xff]   ;;  %v730_v34 = vld [vmem:[%s1003_s0 + $0x50] ss:$8 sps:$4 sm:$0xff]  }
   0xc   :  { %677 = vmatprep.subr.bf16.mxu1 %v740_v0  ;;  %654 = vmatprep.subr.bf16.mxu0 %v700_v7  ;;  %v734_v35 = vld [vmem:[%s1003_s0 + $0x64] ss:$8 sps:$4 sm:$0xff]   ;;  %v733_v36 = vld [vmem:[%s1003_s0 + $0x10] ss:$8 sps:$4 sm:$0xff]   ;;  %v736_v37 = vld [vmem:[%s1003_s0 + $0x60] ss:$8 sps:$4 sm:$0xff]  }
   0xd   :  { %v737_v38 = vld [vmem:[%s1003_s0 + $0x74] ss:$8 sps:$4 sm:$0xff]   ;;  %v739_v39 = vld [vmem:[%s1003_s0 + $0x70] ss:$8 sps:$4 sm:$0xff]   ;;  %v926_v49 = vld [vmem:[%s1004_s4] ss:$0 sm:$0xff] }
   0xf   :  { %686 = vmatpush1.bf16.msra.mxu1 %v701_v9  ;;  %655 = vmatpush3.bf16.msra.mxu0 %v700_v7 }
  0x10   :  { %678 = vmatprep.subr.bf16.mxu1 %v740_v0  ;;  %692 = vmatprep.subr.msk.bf16.mxu0 %vm172_vm1, %v702_v10 }
  0x13   :  { %687 = vmatpush1.bf16.msra.mxu1 %v703_v11  ;;  %657 = vmatpush3.bf16.msra.mxu0 %v174_v12 }
  0x14   :  { %679 = vmatprep.subr.bf16.mxu1 %v740_v0  ;;  %424 = vmatprep.subr.bf16.mxu0 %v740_v0 }
  0x16   :  { %659 = vmatmul.mubr.msk.bf16.vlgmr.msra.gmra.mrb[0].mxu0 %vm147_vm0, %v706_v13 }
  0x17   :  { %688 = vmatpush1.bf16.msra.mxu1 %v705_v15  ;;  %425 = vmatpush1.bf16.msra.mxu0 %v695_v2 }
  0x18   :  { %680 = vmatprep.subr.bf16.mxu1 %v740_v0  ;;  %426 = vmatprep.subr.bf16.mxu0 %v740_v0 }
  0x19   :  { %662 = vmatprep.mubr.msk.bf16.mxu0 %vm147_vm0, %v709_v16 }
  0x1b   :  { %689 = vmatpush1.bf16.msra.mxu1 %v707_v17  ;;  %427 = vmatpush1.bf16.msra.mxu0 %v697_v4 }
  0x1c   :  { %681 = vmatprep.subr.bf16.mxu1 %v740_v0  ;;  %428 = vmatprep.subr.bf16.mxu0 %v740_v0 }
  0x1e   :  { %663 = vmatmul.mubr.msk.bf16.gmra.mrb[4].mxu0 %vm147_vm0, %v710_v18 }
  0x1f   :  { %690 = vmatpush1.bf16.msra.mxu1 %v708_v19  ;;  %429 = vmatpush1.bf16.msra.mxu0 %v699_v6 }
  0x20   :  { %682 = vmatprep.subr.bf16.mxu1 %v740_v0  ;;  %430 = vmatprep.subr.bf16.mxu0 %v740_v0 }
  0x21   :  { %666 = vmatprep.mubr.msk.bf16.mxu0 %vm147_vm0, %v715_v20 }
  0x23   :  { %691 = vmatpush1.bf16.msra.mxu1 %v711_v21  ;;  %431 = vmatpush1.bf16.msra.mxu0 %v701_v9 }
  0x24   :  { %432 = vmatprep.subr.bf16.mxu0 %v740_v0 }
  0x26   :  { %473 = vmatmul.mubr.bf16.vlgmr.msra.gmra.mrb[0].mxu1 %v712_v22  ;;  %667 = vmatmul.mubr.msk.bf16.gmra.mrb[8].mxu0 %vm147_vm0, %v716_v23 }
  0x27   :  { %433 = vmatpush1.bf16.msra.mxu0 %v703_v11  ;;  %629 = vmatprep.mubr.msk.bf16.mxu1 %vm399_vm2, %v717_v24 }
  0x28   :  { %434 = vmatprep.subr.bf16.mxu0 %v740_v0  ;;  %670 = vmatprep.mubr.msk.bf16.mxu0 %vm147_vm0, %v720_v25 }
  0x2b   :  { %435 = vmatpush1.bf16.msra.mxu0 %v705_v15 }
  0x2c   :  { %436 = vmatprep.subr.bf16.mxu0 %v740_v0 }
  0x2e   :  { %481 = vmatmul.mubr.bf16.gmra.mrb[4].mxu1 %v719_v26  ;;  %671 = vmatmul.mubr.msk.bf16.gmra.mrb[12].mxu0 %vm147_vm0, %v721_v27 }
  0x2f   :  { %437 = vmatpush1.bf16.msra.mxu0 %v707_v17  ;;  %630 = vmatprep.mubr.msk.bf16.mxu1 %vm399_vm2, %v722_v28 }
  0x30   :  { %438 = vmatprep.subr.bf16.mxu0 %v740_v0  ;;  %626 = vmatprep.mubr.msk.bf16.mxu0 %vm399_vm2, %v727_v29 }
  0x33   :  { %439 = vmatpush1.bf16.msra.mxu0 %v708_v19 }
  0x34   :  { %440 = vmatprep.subr.bf16.mxu0 %v740_v0 }
  0x36   :  { %489 = vmatmul.mubr.bf16.gmra.mrb[8].mxu1 %v724_v30 }
  0x37   :  { %441 = vmatpush1.bf16.msra.mxu0 %v711_v21  ;;  %631 = vmatprep.mubr.msk.bf16.mxu1 %vm399_vm2, %v728_v31 }
  0x3a   :  { %457 = vmatmul.mubr.bf16.vlgmr.msra.gmra.mrb[16].mxu0 %v725_v32 }
  0x3b   :  { %627 = vmatprep.mubr.msk.bf16.mxu0 %vm399_vm2, %v731_v33 }
  0x3e   :  { %497 = vmatmul.mubr.bf16.gmra.mrb[12].mxu1 %v730_v34 }
  0x3f   :  { %632 = vmatprep.mubr.msk.bf16.mxu1 %vm399_vm2, %v734_v35 }
  0x42   :  { %465 = vmatmul.mubr.bf16.gmra.mrb[20].mxu0 %v733_v36 }
  0x46   :  { %505 = vmatmul.mubr.bf16.gmra.mrb[16].mxu1 %v736_v37 }
  0x47   :  { %633 = vmatprep.mubr.msk.bf16.mxu1 %vm399_vm2, %v737_v38 }
  0x4e   :  { %513 = vmatmul.mubr.bf16.gmra.mrb[20].mxu1 %v739_v39 }
  0xe9   :  { %v919_v40 = vpop.f32.mrb[0].mxu0 }
  0xea   :  { %v210_v41 = vpop.f32.mrb[1].mxu0 }
  0xeb   :  { %v921_v42 = vpop.f32.mrb[2].mxu0 }
  0xec   :  { %v213_v43 = vpop.f32.mrb[3].mxu0 }
  0xf1   :  { %v664_v44 = vpop.f32.mrb[4].mxu0 }
  0xf2   :  { %v226_v45 = vpop.f32.mrb[5].mxu0 }
  0xf3   :  { %v665_v46 = vpop.f32.mrb[6].mxu0 }
  0xf4   :  { %v229_v47 = vpop.f32.mrb[7].mxu0 }
  0xf9   :  { %v474_v48 = vpop.f32.mrb[0].mxu1  ;;  %v668_v50 = vpop.f32.mrb[8].mxu0 }
  0xfa   :  { %v475_v51 = vadd.f32 %v474_v48, %v226_v45  ;;  %v476_v52 = vpop.f32.mrb[1].mxu1  ;;  %v242_v53 = vpop.f32.mrb[9].mxu0 }
  0xfb   :  { %v477_v54 = vpop.f32.mrb[2].mxu1  ;;  %v669_v55 = vpop.f32.mrb[10].mxu0 }
  0xfc   :  { %v532_v56 = vadd.f32 %v926_v49, %v475_v51  ;;  %v478_v57 = vadd.f32 %v477_v54, %v229_v47  ;;  %v479_v58 = vpop.f32.mrb[3].mxu1  ;;  %v245_v59 = vpop.f32.mrb[11].mxu0 }
  0xfe   :  { %v548_v60 = vmax.f32 %v532_v56, 0.0  ;;  %v533_v61 = vadd.f32 %v926_v49, %v478_v57 }
 0x100   :  { %564 = vst [vmem:[%s1005_s5 + $0x20] sm:$0xff] %v548_v60  ;;  %v549_v62 = vmax.f32 %v533_v61, 0.0 }
 0x101   :  { %v482_v63 = vpop.f32.mrb[4].mxu1  ;;  %v933_v0 = vpop.f32.mrb[12].mxu0 }
 0x102   :  { %565 = vst [vmem:[%s1005_s5 + $0x28] sm:$0xff] %v549_v62  ;;  %v483_v1 = vadd.f32 %v664_v44, %v482_v63  ;;  %v484_v2 = vpop.f32.mrb[5].mxu1  ;;  %v258_v3 = vpop.f32.mrb[13].mxu0 }
 0x103   :  { %v485_v4 = vpop.f32.mrb[6].mxu1  ;;  %v938_v5 = vpop.f32.mrb[14].mxu0 }
 0x104   :  { %v534_v6 = vadd.f32 %v926_v49, %v483_v1  ;;  %v486_v7 = vadd.f32 %v665_v46, %v485_v4  ;;  %v487_v8 = vpop.f32.mrb[7].mxu1  ;;  %v261_v9 = vpop.f32.mrb[15].mxu0 }
 0x106   :  { %v550_v10 = vmax.f32 %v534_v6, 0.0  ;;  %v535_v11 = vadd.f32 %v926_v49, %v486_v7 }
 0x108   :  { %566 = vst [vmem:[%s1005_s5 + $0x30] sm:$0xff] %v550_v10  ;;  %v551_v12 = vmax.f32 %v535_v11, 0.0 }
 0x109   :  { %v490_v13 = vpop.f32.mrb[8].mxu1 }
 0x10a   :  { %567 = vst [vmem:[%s1005_s5 + $0x38] sm:$0xff] %v551_v12  ;;  %v491_v14 = vadd.f32 %v490_v13, %v242_v53  ;;  %v492_v15 = vpop.f32.mrb[9].mxu1 }
 0x10b   :  { %v493_v16 = vpop.f32.mrb[10].mxu1 }
 0x10c   :  { %v536_v17 = vadd.f32 %v926_v49, %v491_v14  ;;  %v494_v18 = vadd.f32 %v493_v16, %v245_v59  ;;  %v495_v19 = vpop.f32.mrb[11].mxu1 }
 0x10d   :  { %v458_v20 = vpop.f32.mrb[16].mxu0 }
 0x10e   :  { %v552_v21 = vmax.f32 %v536_v17, 0.0  ;;  %v537_v22 = vadd.f32 %v926_v49, %v494_v18  ;;  %v459_v23 = vadd.f32 %v458_v20, %v210_v41  ;;  %v460_v24 = vpop.f32.mrb[17].mxu0 }
 0x10f   :  { %v461_v25 = vpop.f32.mrb[18].mxu0 }
 0x110   :  { %568 = vst [vmem:[%s1005_s5 + $0x40] sm:$0xff] %v552_v21  ;;  %v553_v26 = vmax.f32 %v537_v22, 0.0  ;;  %v528_v27 = vadd.f32 %v926_v49, %v459_v23  ;;  %v462_v28 = vadd.f32 %v461_v25, %v213_v43  ;;  %v463_v29 = vpop.f32.mrb[19].mxu0 }
 0x111   :  { %v498_v30 = vpop.f32.mrb[12].mxu1 }
 0x112   :  { %569 = vst [vmem:[%s1005_s5 + $0x48] sm:$0xff] %v553_v26  ;;  %v544_v31 = vmax.f32 %v528_v27, 0.0  ;;  %v529_v32 = vadd.f32 %v926_v49, %v462_v28  ;;  %v499_v33 = vadd.f32 %v668_v50, %v498_v30  ;;  %v500_v34 = vpop.f32.mrb[13].mxu1 }
 0x113   :  { %v501_v35 = vpop.f32.mrb[14].mxu1 }
 0x114   :  { %560 = vst [vmem:[%s1005_s5] sm:$0xff] %v544_v31  ;;  %v545_v36 = vmax.f32 %v529_v32, 0.0  ;;  %v538_v37 = vadd.f32 %v926_v49, %v499_v33  ;;  %v502_v38 = vadd.f32 %v669_v55, %v501_v35  ;;  %v503_v39 = vpop.f32.mrb[15].mxu1 }
 0x115   :  { %v466_v41 = vpop.f32.mrb[20].mxu0 }
 0x116   :  { %561 = vst [vmem:[%s1005_s5 + $0x8] sm:$0xff] %v545_v36  ;;  %v554_v43 = vmax.f32 %v538_v37, 0.0  ;;  %v539_v44 = vadd.f32 %v926_v49, %v502_v38  ;;  %v467_v45 = vadd.f32 %v919_v40, %v466_v41  ;;  %v468_v46 = vpop.f32.mrb[21].mxu0 }
 0x117   :  { %v469_v47 = vpop.f32.mrb[22].mxu0 }
 0x118   :  { %570 = vst [vmem:[%s1005_s5 + $0x50] sm:$0xff] %v554_v43  ;;  %v555_v48 = vmax.f32 %v539_v44, 0.0  ;;  %v530_v50 = vadd.f32 %v926_v49, %v467_v45  ;;  %v470_v51 = vadd.f32 %v921_v42, %v469_v47  ;;  %v471_v52 = vpop.f32.mrb[23].mxu0 }
 0x119   :  { %v506_v53 = vpop.f32.mrb[16].mxu1 }
 0x11a   :  { %571 = vst [vmem:[%s1005_s5 + $0x58] sm:$0xff] %v555_v48  ;;  %v546_v54 = vmax.f32 %v530_v50, 0.0  ;;  %v531_v40 = vadd.f32 %v926_v49, %v470_v51  ;;  %v507_v55 = vadd.f32 %v506_v53, %v258_v3  ;;  %v508_v56 = vpop.f32.mrb[17].mxu1 }
 0x11b   :  { %v509_v57 = vpop.f32.mrb[18].mxu1 }
 0x11c   :  { %562 = vst [vmem:[%s1005_s5 + $0x10] sm:$0xff] %v546_v54  ;;  %v547_v58 = vmax.f32 %v531_v40, 0.0  ;;  %v540_v59 = vadd.f32 %v926_v49, %v507_v55  ;;  %v510_v42 = vadd.f32 %v509_v57, %v261_v9  ;;  %v511_v60 = vpop.f32.mrb[19].mxu1 }
 0x11e   :  { %563 = vst [vmem:[%s1005_s5 + $0x18] sm:$0xff] %v547_v58  ;;  %v556_v61 = vmax.f32 %v540_v59, 0.0  ;;  %v541_v62 = vadd.f32 %v926_v49, %v510_v42 }
 0x120   :  { %572 = vst [vmem:[%s1005_s5 + $0x60] sm:$0xff] %v556_v61  ;;  %v557_v63 = vmax.f32 %v541_v62, 0.0 }
 0x121   :  { %v514_v1 = vpop.f32.mrb[20].mxu1 }
 0x122   :  { %573 = vst [vmem:[%s1005_s5 + $0x68] sm:$0xff] %v557_v63  ;;  %v515_v2 = vadd.f32 %v933_v0, %v514_v1  ;;  %v516_v3 = vpop.f32.mrb[21].mxu1 }
 0x123   :  { %v517_v4 = vpop.f32.mrb[22].mxu1 }
 0x124   :  { %v542_v6 = vadd.f32 %v926_v49, %v515_v2  ;;  %v518_v7 = vadd.f32 %v938_v5, %v517_v4  ;;  %v519_v8 = vpop.f32.mrb[23].mxu1 }
 0x126   :  { %v558_v9 = vmax.f32 %v542_v6, 0.0  ;;  %v543_v10 = vadd.f32 %v926_v49, %v518_v7 }
 0x128   :  { %574 = vst [vmem:[%s1005_s5 + $0x70] sm:$0xff] %v558_v9  ;;  %v559_v11 = vmax.f32 %v543_v10, 0.0 }
 0x12a   :  { %575 = vst [vmem:[%s1005_s5 + $0x78] sm:$0xff] %v559_v11 }

// kernel: deeplab_forward.31
= control target key start
LH: loop header
LB: loop body
LE: loop exit
PB: predicated region body
PF: predicated region fallthrough
CT: control target
= control target key end

     0   :  { %v426_v0 = vmov 0   ;;  %vm182_vm0 = vcmask 130048   ;;  %s599_s1 = inlined_call_operand.vmem [shape: bf16[144,128], index: 1, kind: input, shape index: {}]   ;;  %s600_s0 = inlined_call_operand.vmem [shape: bf16[128,144], index: 0, kind: input, shape index: {}]   ;;  %s601_s2 = inlined_call_operand.vmem [shape: f32[1,128], index: 2, kind: input, shape index: {}]   ;;  %s602_s3 = inlined_call_operand.vmem [shape: f32[128,128], index: 3, kind: output, shape index: {}]  }
   0x1   :  { %207 = vmatprep.subr.bf16.mxu0 %v426_v0  ;;  %374 = vmatprep.subr.bf16.mxu1 %v426_v0  ;;  %v393_v1 = vld [vmem:[%s599_s1] sm:$0xff]   ;;  %v394_v2 = vld [vmem:[%s599_s1 + $0x8] sm:$0xff]   ;;  %v395_v3 = vld [vmem:[%s599_s1 + $0x10] sm:$0xff]  }
   0x2   :  { %208 = vmatpush1.bf16.msra.mxu0 %v393_v1  ;;  %383 = vmatpush1.bf16.msra.mxu1 %v393_v1  ;;  %v396_v4 = vld [vmem:[%s599_s1 + $0x18] sm:$0xff]   ;;  %v404_v5 = vld [vmem:[%s600_s0 + $0x4] ss:$8 sps:$4 sm:$0xff]   ;;  %v399_v9 = vld [vmem:[%s599_s1 + $0x30] sm:$0xff]  }
   0x3   :  { %209 = vmatprep.subr.bf16.mxu0 %v426_v0  ;;  %375 = vmatprep.subr.bf16.mxu1 %v426_v0  ;;  %v407_v6 = vld [vmem:[%s600_s0 + $0x44] ss:$8 sps:$4 sm:$0xff]   ;;  %v400_v10 = vld [vmem:[%s599_s1 + $0x38] sm:$0xff]   ;;  %v402_v12 = vld [vmem:[%s600_s0] ss:$8 sps:$4 sm:$0xff]  }
   0x4   :  { %366 = vmatprep.mubr.msk.bf16.mxu0 %vm182_vm0, %v404_v5  ;;  %370 = vmatprep.mubr.msk.bf16.mxu1 %vm182_vm0, %v407_v6  ;;  %v397_v7 = vld [vmem:[%s599_s1 + $0x20] sm:$0xff]   ;;  %v398_v8 = vld [vmem:[%s599_s1 + $0x28] sm:$0xff]   ;;  %v408_v14 = vld [vmem:[%s600_s0 + $0x14] ss:$8 sps:$4 sm:$0xff]  }
   0x5   :  { %v401_v11 = vld [vmem:[%s599_s1 + $0x40] sm:$0xff]   ;;  %v410_v15 = vld [vmem:[%s600_s0 + $0x54] ss:$8 sps:$4 sm:$0xff]   ;;  %v412_v16 = vld [vmem:[%s600_s0 + $0x10] ss:$8 sps:$4 sm:$0xff]  }
   0x6   :  { %210 = vmatpush1.bf16.msra.mxu0 %v394_v2  ;;  %384 = vmatpush1.bf16.msra.mxu1 %v394_v2  ;;  %v405_v13 = vld [vmem:[%s600_s0 + $0x40] ss:$8 sps:$4 sm:$0xff]   ;;  %v413_v17 = vld [vmem:[%s600_s0 + $0x50] ss:$8 sps:$4 sm:$0xff]   ;;  %v414_v18 = vld [vmem:[%s600_s0 + $0x24] ss:$8 sps:$4 sm:$0xff]  }
   0x7   :  { %211 = vmatprep.subr.bf16.mxu0 %v426_v0  ;;  %376 = vmatprep.subr.bf16.mxu1 %v426_v0  ;;  %v416_v19 = vld [vmem:[%s600_s0 + $0x64] ss:$8 sps:$4 sm:$0xff]   ;;  %v418_v20 = vld [vmem:[%s600_s0 + $0x20] ss:$8 sps:$4 sm:$0xff]   ;;  %v420_v22 = vld [vmem:[%s600_s0 + $0x34] ss:$8 sps:$4 sm:$0xff]  }
   0x8   :  { %v419_v21 = vld [vmem:[%s600_s0 + $0x60] ss:$8 sps:$4 sm:$0xff]   ;;  %v422_v23 = vld [vmem:[%s600_s0 + $0x74] ss:$8 sps:$4 sm:$0xff]   ;;  %v424_v24 = vld [vmem:[%s600_s0 + $0x30] ss:$8 sps:$4 sm:$0xff]  }
   0x9   :  { %v425_v25 = vld [vmem:[%s600_s0 + $0x70] ss:$8 sps:$4 sm:$0xff]   ;;  %v533_v26 = vld [vmem:[%s601_s2] ss:$0 sm:$0xff] }
   0xa   :  { %212 = vmatpush1.bf16.msra.mxu0 %v395_v3  ;;  %385 = vmatpush1.bf16.msra.mxu1 %v395_v3 }
   0xb   :  { %213 = vmatprep.subr.bf16.mxu0 %v426_v0  ;;  %377 = vmatprep.subr.bf16.mxu1 %v426_v0 }
   0xe   :  { %214 = vmatpush1.bf16.msra.mxu0 %v396_v4  ;;  %386 = vmatpush1.bf16.msra.mxu1 %v396_v4 }
   0xf   :  { %215 = vmatprep.subr.bf16.mxu0 %v426_v0  ;;  %378 = vmatprep.subr.bf16.mxu1 %v426_v0 }
  0x12   :  { %216 = vmatpush1.bf16.msra.mxu0 %v397_v7  ;;  %387 = vmatpush1.bf16.msra.mxu1 %v397_v7 }
  0x13   :  { %217 = vmatprep.subr.bf16.mxu0 %v426_v0  ;;  %379 = vmatprep.subr.bf16.mxu1 %v426_v0 }
  0x16   :  { %218 = vmatpush1.bf16.msra.mxu0 %v398_v8  ;;  %388 = vmatpush1.bf16.msra.mxu1 %v398_v8 }
  0x17   :  { %219 = vmatprep.subr.bf16.mxu0 %v426_v0  ;;  %380 = vmatprep.subr.bf16.mxu1 %v426_v0 }
  0x1a   :  { %220 = vmatpush1.bf16.msra.mxu0 %v399_v9  ;;  %389 = vmatpush1.bf16.msra.mxu1 %v399_v9 }
  0x1b   :  { %221 = vmatprep.subr.bf16.mxu0 %v426_v0  ;;  %381 = vmatprep.subr.bf16.mxu1 %v426_v0 }
  0x1e   :  { %222 = vmatpush1.bf16.msra.mxu0 %v400_v10  ;;  %390 = vmatpush1.bf16.msra.mxu1 %v400_v10 }
  0x1f   :  { %223 = vmatprep.subr.bf16.mxu0 %v426_v0  ;;  %382 = vmatprep.subr.bf16.mxu1 %v426_v0 }
  0x22   :  { %224 = vmatpush1.bf16.msra.mxu0 %v401_v11  ;;  %391 = vmatpush1.bf16.msra.mxu1 %v401_v11 }
  0x25   :  { %240 = vmatmul.mubr.bf16.vlgmr.msra.gmra.mrb[0].mxu0 %v402_v12  ;;  %272 = vmatmul.mubr.bf16.vlgmr.msra.gmra.mrb[0].mxu1 %v405_v13 }
  0x26   :  { %367 = vmatprep.mubr.msk.bf16.mxu0 %vm182_vm0, %v408_v14  ;;  %371 = vmatprep.mubr.msk.bf16.mxu1 %vm182_vm0, %v410_v15 }
  0x2d   :  { %248 = vmatmul.mubr.bf16.gmra.mrb[4].mxu0 %v412_v16  ;;  %280 = vmatmul.mubr.bf16.gmra.mrb[4].mxu1 %v413_v17 }
  0x2e   :  { %368 = vmatprep.mubr.msk.bf16.mxu0 %vm182_vm0, %v414_v18  ;;  %372 = vmatprep.mubr.msk.bf16.mxu1 %vm182_vm0, %v416_v19 }
  0x35   :  { %256 = vmatmul.mubr.bf16.gmra.mrb[8].mxu0 %v418_v20  ;;  %288 = vmatmul.mubr.bf16.gmra.mrb[8].mxu1 %v419_v21 }
  0x36   :  { %369 = vmatprep.mubr.msk.bf16.mxu0 %vm182_vm0, %v420_v22  ;;  %373 = vmatprep.mubr.msk.bf16.mxu1 %vm182_vm0, %v422_v23 }
  0x3d   :  { %264 = vmatmul.mubr.bf16.gmra.mrb[12].mxu0 %v424_v24  ;;  %296 = vmatmul.mubr.bf16.gmra.mrb[12].mxu1 %v425_v25 }
  0xf8   :  { %v241_v27 = vpop.f32.mrb[0].mxu0  ;;  %v273_v28 = vpop.f32.mrb[0].mxu1 }
  0xf9   :  { %v242_v29 = vadd.f32 %v533_v26, %v241_v27  ;;  %v274_v30 = vadd.f32 %v533_v26, %v273_v28  ;;  %v243_v31 = vpop.f32.mrb[1].mxu0  ;;  %v275_v32 = vpop.f32.mrb[1].mxu1 }
  0xfa   :  { %v244_v33 = vpop.f32.mrb[2].mxu0  ;;  %v276_v34 = vpop.f32.mrb[2].mxu1 }
  0xfb   :  { %v304_v35 = vmax.f32 %v242_v29, 0.0  ;;  %v312_v36 = vmax.f32 %v274_v30, 0.0  ;;  %v245_v37 = vadd.f32 %v533_v26, %v244_v33  ;;  %v277_v38 = vadd.f32 %v533_v26, %v276_v34  ;;  %v246_v39 = vpop.f32.mrb[3].mxu0  ;;  %v278_v40 = vpop.f32.mrb[3].mxu1 }
  0xfd   :  { %320 = vst [vmem:[%s602_s3] sm:$0xff] %v304_v35  ;;  %328 = vst [vmem:[%s602_s3 + $0x40] sm:$0xff] %v312_v36  ;;  %v305_v41 = vmax.f32 %v245_v37, 0.0  ;;  %v313_v42 = vmax.f32 %v277_v38, 0.0 }
  0xff   :  { %321 = vst [vmem:[%s602_s3 + $0x8] sm:$0xff] %v305_v41  ;;  %329 = vst [vmem:[%s602_s3 + $0x48] sm:$0xff] %v313_v42 }
 0x100   :  { %v249_v43 = vpop.f32.mrb[4].mxu0  ;;  %v281_v44 = vpop.f32.mrb[4].mxu1 }
 0x101   :  { %v250_v45 = vadd.f32 %v533_v26, %v249_v43  ;;  %v282_v46 = vadd.f32 %v533_v26, %v281_v44  ;;  %v251_v47 = vpop.f32.mrb[5].mxu0  ;;  %v283_v48 = vpop.f32.mrb[5].mxu1 }
 0x102   :  { %v252_v49 = vpop.f32.mrb[6].mxu0  ;;  %v284_v50 = vpop.f32.mrb[6].mxu1 }
 0x103   :  { %v306_v51 = vmax.f32 %v250_v45, 0.0  ;;  %v314_v52 = vmax.f32 %v282_v46, 0.0  ;;  %v253_v53 = vadd.f32 %v533_v26, %v252_v49  ;;  %v285_v54 = vadd.f32 %v533_v26, %v284_v50  ;;  %v254_v55 = vpop.f32.mrb[7].mxu0  ;;  %v286_v56 = vpop.f32.mrb[7].mxu1 }
 0x105   :  { %322 = vst [vmem:[%s602_s3 + $0x10] sm:$0xff] %v306_v51  ;;  %330 = vst [vmem:[%s602_s3 + $0x50] sm:$0xff] %v314_v52  ;;  %v307_v57 = vmax.f32 %v253_v53, 0.0  ;;  %v315_v58 = vmax.f32 %v285_v54, 0.0 }
 0x107   :  { %323 = vst [vmem:[%s602_s3 + $0x18] sm:$0xff] %v307_v57  ;;  %331 = vst [vmem:[%s602_s3 + $0x58] sm:$0xff] %v315_v58 }
 0x108   :  { %v257_v59 = vpop.f32.mrb[8].mxu0  ;;  %v289_v60 = vpop.f32.mrb[8].mxu1 }
 0x109   :  { %v258_v61 = vadd.f32 %v533_v26, %v257_v59  ;;  %v290_v62 = vadd.f32 %v533_v26, %v289_v60  ;;  %v259_v63 = vpop.f32.mrb[9].mxu0  ;;  %v291_v0 = vpop.f32.mrb[9].mxu1 }
 0x10a   :  { %v260_v1 = vpop.f32.mrb[10].mxu0  ;;  %v292_v2 = vpop.f32.mrb[10].mxu1 }
 0x10b   :  { %v308_v3 = vmax.f32 %v258_v61, 0.0  ;;  %v316_v4 = vmax.f32 %v290_v62, 0.0  ;;  %v261_v5 = vadd.f32 %v533_v26, %v260_v1  ;;  %v293_v6 = vadd.f32 %v533_v26, %v292_v2  ;;  %v262_v7 = vpop.f32.mrb[11].mxu0  ;;  %v294_v8 = vpop.f32.mrb[11].mxu1 }
 0x10d   :  { %324 = vst [vmem:[%s602_s3 + $0x20] sm:$0xff] %v308_v3  ;;  %332 = vst [vmem:[%s602_s3 + $0x60] sm:$0xff] %v316_v4  ;;  %v309_v9 = vmax.f32 %v261_v5, 0.0  ;;  %v317_v10 = vmax.f32 %v293_v6, 0.0 }
 0x10f   :  { %325 = vst [vmem:[%s602_s3 + $0x28] sm:$0xff] %v309_v9  ;;  %333 = vst [vmem:[%s602_s3 + $0x68] sm:$0xff] %v317_v10 }
 0x110   :  { %v265_v11 = vpop.f32.mrb[12].mxu0  ;;  %v297_v12 = vpop.f32.mrb[12].mxu1 }
 0x111   :  { %v266_v13 = vadd.f32 %v533_v26, %v265_v11  ;;  %v298_v14 = vadd.f32 %v533_v26, %v297_v12  ;;  %v267_v15 = vpop.f32.mrb[13].mxu0  ;;  %v299_v16 = vpop.f32.mrb[13].mxu1 }
 0x112   :  { %v268_v17 = vpop.f32.mrb[14].mxu0  ;;  %v300_v18 = vpop.f32.mrb[14].mxu1 }
 0x113   :  { %v310_v19 = vmax.f32 %v266_v13, 0.0  ;;  %v318_v20 = vmax.f32 %v298_v14, 0.0  ;;  %v269_v21 = vadd.f32 %v533_v26, %v268_v17  ;;  %v301_v22 = vadd.f32 %v533_v26, %v300_v18  ;;  %v270_v23 = vpop.f32.mrb[15].mxu0  ;;  %v302_v24 = vpop.f32.mrb[15].mxu1 }
 0x115   :  { %326 = vst [vmem:[%s602_s3 + $0x30] sm:$0xff] %v310_v19  ;;  %334 = vst [vmem:[%s602_s3 + $0x70] sm:$0xff] %v318_v20  ;;  %v311_v25 = vmax.f32 %v269_v21, 0.0  ;;  %v319_v27 = vmax.f32 %v301_v22, 0.0 }
 0x117   :  { %327 = vst [vmem:[%s602_s3 + $0x38] sm:$0xff] %v311_v25  ;;  %335 = vst [vmem:[%s602_s3 + $0x78] sm:$0xff] %v319_v27 }

// kernel: deeplab_forward.32
= control target key start
LH: loop header
LB: loop body
LE: loop exit
PB: predicated region body
PF: predicated region fallthrough
CT: control target
= control target key end

     0   :  { %vm86_vm0 = vcmask 130048   ;;  %s390_s1 = inlined_call_operand.vmem [shape: bf16[16,128], index: 1, kind: input, shape index: {}]   ;;  %s391_s0 = inlined_call_operand.vmem [shape: bf16[128,16], index: 0, kind: input, shape index: {}]   ;;  %s392_s2 = inlined_call_operand.vmem [shape: f32[1,128], index: 2, kind: input, shape index: {}]   ;;  %s393_s3 = inlined_call_operand.vmem [shape: f32[128,128], index: 3, kind: output, shape index: {}]  }
   0x1   :  { %v275_v0 = vld [vmem:[%s390_s1] sm:$0xff]   ;;  %v278_v3 = vld [vmem:[%s391_s0 + $0x8] sm:$0xff]   ;;  %v280_v5 = vld [vmem:[%s391_s0 + $0x10] sm:$0xff]  }
   0x2   :  { %v276_v1 = vld [vmem:[%s391_s0] sm:$0xff]   ;;  %255 = vmatprep.subr.bf16.mxu0 %v275_v0  ;;  %273 = vmatprep.subr.bf16.mxu1 %v275_v0  ;;  %v279_v4 = vld [vmem:[%s391_s0 + $0x28] sm:$0xff]   ;;  %v281_v6 = vld [vmem:[%s391_s0 + $0x30] sm:$0xff]  }
   0x3   :  { %v277_v2 = vld [vmem:[%s391_s0 + $0x20] sm:$0xff]   ;;  %256 = vmatpush3.bf16.msra.mxu0 %v275_v0  ;;  %274 = vmatpush3.bf16.msra.mxu1 %v275_v0  ;;  %v282_v7 = vld [vmem:[%s391_s0 + $0x18] sm:$0xff]  }
   0x4   :  { %257 = vmatprep.mubr.msk.bf16.mxu0 %vm86_vm0, %v276_v1  ;;  %265 = vmatprep.mubr.msk.bf16.mxu1 %vm86_vm0, %v277_v2  ;;  %v283_v8 = vld [vmem:[%s391_s0 + $0x38] sm:$0xff]   ;;  %v228_v9 = vld [vmem:[%s392_s2] ss:$0 sm:$0xff] }
   0x6   :  { %258 = vmatmul.mubr.msk.bf16.vlgmr.msra.gmra.mrb[0].mxu0 %vm86_vm0, %v278_v3  ;;  %266 = vmatmul.mubr.msk.bf16.vlgmr.msra.gmra.mrb[0].mxu1 %vm86_vm0, %v279_v4 }
   0x7   :  { %261 = vmatprep.mubr.msk.bf16.mxu0 %vm86_vm0, %v280_v5  ;;  %269 = vmatprep.mubr.msk.bf16.mxu1 %vm86_vm0, %v281_v6 }
   0xe   :  { %262 = vmatmul.mubr.msk.bf16.gmra.mrb[4].mxu0 %vm86_vm0, %v282_v7  ;;  %270 = vmatmul.mubr.msk.bf16.gmra.mrb[4].mxu1 %vm86_vm0, %v283_v8 }
  0xd9   :  { %v259_v10 = vpop.f32.mrb[0].mxu0  ;;  %v267_v11 = vpop.f32.mrb[0].mxu1 }
  0xda   :  { %v154_v12 = vadd.f32 %v259_v10, %v228_v9  ;;  %v186_v13 = vadd.f32 %v267_v11, %v228_v9  ;;  %v145_v14 = vpop.f32.mrb[1].mxu0  ;;  %v177_v15 = vpop.f32.mrb[1].mxu1 }
  0xdb   :  { %v146_v16 = vadd.f32 %v228_v9, %v145_v14  ;;  %v178_v17 = vadd.f32 %v228_v9, %v177_v15  ;;  %v260_v18 = vpop.f32.mrb[2].mxu0  ;;  %v268_v19 = vpop.f32.mrb[2].mxu1 }
  0xdc   :  { %210 = vst [vmem:[%s393_s3 + $0x10] sm:$0xff] %v154_v12  ;;  %218 = vst [vmem:[%s393_s3 + $0x50] sm:$0xff] %v186_v13  ;;  %v157_v20 = vadd.f32 %v260_v18, %v228_v9  ;;  %v189_v21 = vadd.f32 %v268_v19, %v228_v9  ;;  %v148_v22 = vpop.f32.mrb[3].mxu0  ;;  %v180_v23 = vpop.f32.mrb[3].mxu1 }
  0xdd   :  { %208 = vst [vmem:[%s393_s3] sm:$0xff] %v146_v16  ;;  %216 = vst [vmem:[%s393_s3 + $0x40] sm:$0xff] %v178_v17  ;;  %v149_v24 = vadd.f32 %v228_v9, %v148_v22  ;;  %v181_v25 = vadd.f32 %v228_v9, %v180_v23 }
  0xde   :  { %211 = vst [vmem:[%s393_s3 + $0x18] sm:$0xff] %v157_v20  ;;  %219 = vst [vmem:[%s393_s3 + $0x58] sm:$0xff] %v189_v21 }
  0xdf   :  { %209 = vst [vmem:[%s393_s3 + $0x8] sm:$0xff] %v149_v24  ;;  %217 = vst [vmem:[%s393_s3 + $0x48] sm:$0xff] %v181_v25 }
  0xe1   :  { %v263_v26 = vpop.f32.mrb[4].mxu0  ;;  %v271_v27 = vpop.f32.mrb[4].mxu1 }
  0xe2   :  { %v170_v28 = vadd.f32 %v263_v26, %v228_v9  ;;  %v202_v29 = vadd.f32 %v271_v27, %v228_v9  ;;  %v161_v30 = vpop.f32.mrb[5].mxu0  ;;  %v193_v31 = vpop.f32.mrb[5].mxu1 }
  0xe3   :  { %v162_v32 = vadd.f32 %v228_v9, %v161_v30  ;;  %v194_v33 = vadd.f32 %v228_v9, %v193_v31  ;;  %v264_v34 = vpop.f32.mrb[6].mxu0  ;;  %v272_v35 = vpop.f32.mrb[6].mxu1 }
  0xe4   :  { %214 = vst [vmem:[%s393_s3 + $0x30] sm:$0xff] %v170_v28  ;;  %222 = vst [vmem:[%s393_s3 + $0x70] sm:$0xff] %v202_v29  ;;  %v173_v36 = vadd.f32 %v264_v34, %v228_v9  ;;  %v205_v37 = vadd.f32 %v272_v35, %v228_v9  ;;  %v164_v38 = vpop.f32.mrb[7].mxu0  ;;  %v196_v39 = vpop.f32.mrb[7].mxu1 }
  0xe5   :  { %212 = vst [vmem:[%s393_s3 + $0x20] sm:$0xff] %v162_v32  ;;  %220 = vst [vmem:[%s393_s3 + $0x60] sm:$0xff] %v194_v33  ;;  %v165_v40 = vadd.f32 %v228_v9, %v164_v38  ;;  %v197_v41 = vadd.f32 %v228_v9, %v196_v39 }
  0xe6   :  { %215 = vst [vmem:[%s393_s3 + $0x38] sm:$0xff] %v173_v36  ;;  %223 = vst [vmem:[%s393_s3 + $0x78] sm:$0xff] %v205_v37 }
  0xe7   :  { %213 = vst [vmem:[%s393_s3 + $0x28] sm:$0xff] %v165_v40  ;;  %221 = vst [vmem:[%s393_s3 + $0x68] sm:$0xff] %v197_v41 }

// kernel: deeplab_forward.33
= control target key start
LH: loop header
LB: loop body
LE: loop exit
PB: predicated region body
PF: predicated region fallthrough
CT: control target
= control target key end

     0   :  { %s1212_s12 = smov 0   ;;  %s1446_s0 = inlined_call_operand.vmem [shape: bf16[1024,64], index: 0, kind: input, shape index: {}]   ;;  %s1447_s1 = inlined_call_operand.vmem [shape: bf16[64,128], index: 1, kind: input, shape index: {}]   ;;  %s1448_s2 = inlined_call_operand.vmem [shape: f32[1,128], index: 2, kind: input, shape index: {}]   ;;  %s1449_s3 = inlined_call_operand.vmem [shape: f32[1024,128], index: 3, kind: output, shape index: {}]  }
   0x1 LB: > { %s944_s13 = sadd.s32 4294967295, %s1190_s12   ;;  %p948_p0 = scmp.ge.s32.totalorder %s1190_s12, 1  ;;  %s1190_s12 = sphi %s1212_s12, %s13_s12  }
   0x2   : > { %p138_p1 = scmp.lt.s32.totalorder %s1190_s12, 3 }
   0x4   : > { %p139_p2 = pnand %p948_p0, %p138_p1 }
   0x5   : > { %v1148_v0 = vld [vmem:[%s1447_s1] sm:$0xff] (!%p139_p2)   ;;  %s949_s16 = sshll.u32 (!%p139_p2), %s944_s13, 6  ;;  %v1149_v1 = vld [vmem:[%s1447_s1 + $0x8] sm:$0xff] (!%p139_p2)   ;;  %v1150_v2 = vld [vmem:[%s1447_s1 + $0x10] sm:$0xff] (!%p139_p2)   ;;  %vm438_vm0 = vcmask (!%p139_p2), 523264  }
   0x6   : > { %142 = sbr.rel (%p139_p2) target bundleno = 296 (0x128), region = 32  ;;  %p163_p3 = scmp.lt.s32.totalorder (!%p139_p2), %s949_s16, 127  ;;  %1060 = vmatprep.subr.bf16.mxu0 (!%p139_p2), %v1148_v0  ;;  %1132 = vmatprep.subr.bf16.mxu1 (!%p139_p2), %v1148_v0  ;;  %v1151_v3 = vld [vmem:[%s1447_s1 + $0x18] sm:$0xff] (!%p139_p2)   ;;  %v1308_v36 = vld [vmem:[%s1448_s2] ss:$0 sm:$0xff] (!%p139_p2) }
   0x7   : > { %1061 = vmatpush3.bf16.msra.mxu0 (!%p139_p2), %v1148_v0  ;;  %1136 = vmatpush3.bf16.msra.mxu1 (!%p139_p2), %v1148_v0 }
   0x8   : > { %1062 = vmatprep.subr.bf16.mxu0 (!%p139_p2), %v1149_v1  ;;  %1133 = vmatprep.subr.bf16.mxu1 (!%p139_p2), %v1149_v1 }
   0xb   : > { %1063 = vmatpush3.bf16.msra.mxu0 (!%p139_p2), %v1149_v1  ;;  %1137 = vmatpush3.bf16.msra.mxu1 (!%p139_p2), %v1149_v1 }
   0xc   : > { %1064 = vmatprep.subr.bf16.mxu0 (!%p139_p2), %v1150_v2  ;;  %1134 = vmatprep.subr.bf16.mxu1 (!%p139_p2), %v1150_v2 }
   0xd   : > { %s1451_s16 = smov (!%p163_p3, %s949_s16), 127 }
   0xe   : > { %s950_s21 = sshll.u32 %s1451_s16, 2  ;;  %s952_s27 = sshll.u32 %s1451_s16, 3 }
   0xf   : > { %s1238_s26 = scalar_lea.vmem %s1446_s0, %s950_s21  ;;  %1065 = vmatpush3.bf16.msra.mxu0 %v1150_v2  ;;  %1138 = vmatpush3.bf16.msra.mxu1 %v1150_v2  ;;  %s1313_s5 = scalar_lea.vmem %s1449_s3, %s952_s27 }
  0x10   : > { %v1152_v4 = vld [vmem:[%s1238_s26] sm:$0xff]   ;;  %1066 = vmatprep.subr.bf16.mxu0 %v1151_v3  ;;  %1135 = vmatprep.subr.bf16.mxu1 %v1151_v3  ;;  %v1154_v6 = vld [vmem:[%s1238_s26 + $0x8] sm:$0xff]   ;;  %v1156_v8 = vld [vmem:[%s1238_s26 + $0x10] sm:$0xff]  }
  0x11   : > { %v1153_v5 = vld [vmem:[%s1238_s26 + $0x80] sm:$0xff]   ;;  %1068 = vmatprep.mubr.msk.bf16.mxu0 %vm438_vm0, %v1152_v4  ;;  %v1155_v7 = vld [vmem:[%s1238_s26 + $0x88] sm:$0xff]   ;;  %v1157_v9 = vld [vmem:[%s1238_s26 + $0x90] sm:$0xff]  }
  0x12   : > { %1100 = vmatprep.mubr.msk.bf16.mxu1 %vm438_vm0, %v1153_v5  ;;  %v1158_v10 = vld [vmem:[%s1238_s26 + $0x18] sm:$0xff]   ;;  %v1160_v12 = vld [vmem:[%s1238_s26 + $0x20] sm:$0xff]   ;;  %v1162_v14 = vld [vmem:[%s1238_s26 + $0x28] sm:$0xff]  }
  0x13   : > { %1067 = vmatpush3.bf16.msra.mxu0 %v1151_v3  ;;  %1139 = vmatpush3.bf16.msra.mxu1 %v1151_v3  ;;  %v1159_v11 = vld [vmem:[%s1238_s26 + $0x98] sm:$0xff]   ;;  %v1161_v13 = vld [vmem:[%s1238_s26 + $0xa0] sm:$0xff]   ;;  %v1163_v15 = vld [vmem:[%s1238_s26 + $0xa8] sm:$0xff]  }
  0x14   : > { %v1164_v16 = vld [vmem:[%s1238_s26 + $0x30] sm:$0xff]   ;;  %v1166_v18 = vld [vmem:[%s1238_s26 + $0x38] sm:$0xff]   ;;  %v1168_v20 = vld [vmem:[%s1238_s26 + $0x40] sm:$0xff]  }
  0x15   : > { %v1165_v17 = vld [vmem:[%s1238_s26 + $0xb0] sm:$0xff]   ;;  %v1167_v19 = vld [vmem:[%s1238_s26 + $0xb8] sm:$0xff]   ;;  %v1169_v21 = vld [vmem:[%s1238_s26 + $0xc0] sm:$0xff]  }
  0x16   : > { %1069 = vmatmul.mubr.msk.bf16.vlgmr.msra.gmra.mrb[0].mxu0 %vm438_vm0, %v1154_v6  ;;  %1101 = vmatmul.mubr.msk.bf16.vlgmr.msra.gmra.mrb[0].mxu1 %vm438_vm0, %v1155_v7  ;;  %v1170_v22 = vld [vmem:[%s1238_s26 + $0x48] sm:$0xff]   ;;  %v1172_v24 = vld [vmem:[%s1238_s26 + $0x50] sm:$0xff]   ;;  %v1174_v26 = vld [vmem:[%s1238_s26 + $0x58] sm:$0xff]  }
  0x17   : > { %1072 = vmatprep.mubr.msk.bf16.mxu0 %vm438_vm0, %v1156_v8  ;;  %1104 = vmatprep.mubr.msk.bf16.mxu1 %vm438_vm0, %v1157_v9  ;;  %v1171_v23 = vld [vmem:[%s1238_s26 + $0xc8] sm:$0xff]   ;;  %v1173_v25 = vld [vmem:[%s1238_s26 + $0xd0] sm:$0xff]   ;;  %v1175_v27 = vld [vmem:[%s1238_s26 + $0xd8] sm:$0xff]  }
  0x18   : > { %v1176_v28 = vld [vmem:[%s1238_s26 + $0x60] sm:$0xff]   ;;  %v1178_v30 = vld [vmem:[%s1238_s26 + $0x68] sm:$0xff]   ;;  %v1180_v32 = vld [vmem:[%s1238_s26 + $0x70] sm:$0xff]  }
  0x19   : > { %v1177_v29 = vld [vmem:[%s1238_s26 + $0xe0] sm:$0xff]   ;;  %v1179_v31 = vld [vmem:[%s1238_s26 + $0xe8] sm:$0xff]   ;;  %v1181_v33 = vld [vmem:[%s1238_s26 + $0xf0] sm:$0xff]  }
  0x1a   : > { %v1182_v34 = vld [vmem:[%s1238_s26 + $0x78] sm:$0xff]  }
  0x1b   : > { %v1183_v35 = vld [vmem:[%s1238_s26 + $0xf8] sm:$0xff]  }
  0x1e   : > { %1073 = vmatmul.mubr.msk.bf16.gmra.mrb[4].mxu0 %vm438_vm0, %v1158_v10  ;;  %1105 = vmatmul.mubr.msk.bf16.gmra.mrb[4].mxu1 %vm438_vm0, %v1159_v11 }
  0x1f   : > { %1076 = vmatprep.mubr.msk.bf16.mxu0 %vm438_vm0, %v1160_v12  ;;  %1108 = vmatprep.mubr.msk.bf16.mxu1 %vm438_vm0, %v1161_v13 }
  0x26   : > { %1077 = vmatmul.mubr.msk.bf16.gmra.mrb[8].mxu0 %vm438_vm0, %v1162_v14  ;;  %1109 = vmatmul.mubr.msk.bf16.gmra.mrb[8].mxu1 %vm438_vm0, %v1163_v15 }
  0x27   : > { %1080 = vmatprep.mubr.msk.bf16.mxu0 %vm438_vm0, %v1164_v16  ;;  %1112 = vmatprep.mubr.msk.bf16.mxu1 %vm438_vm0, %v1165_v17 }
  0x2e   : > { %1081 = vmatmul.mubr.msk.bf16.gmra.mrb[12].mxu0 %vm438_vm0, %v1166_v18  ;;  %1113 = vmatmul.mubr.msk.bf16.gmra.mrb[12].mxu1 %vm438_vm0, %v1167_v19 }
  0x2f   : > { %1084 = vmatprep.mubr.msk.bf16.mxu0 %vm438_vm0, %v1168_v20  ;;  %1116 = vmatprep.mubr.msk.bf16.mxu1 %vm438_vm0, %v1169_v21 }
  0x36   : > { %1085 = vmatmul.mubr.msk.bf16.gmra.mrb[16].mxu0 %vm438_vm0, %v1170_v22  ;;  %1117 = vmatmul.mubr.msk.bf16.gmra.mrb[16].mxu1 %vm438_vm0, %v1171_v23 }
  0x37   : > { %1088 = vmatprep.mubr.msk.bf16.mxu0 %vm438_vm0, %v1172_v24  ;;  %1120 = vmatprep.mubr.msk.bf16.mxu1 %vm438_vm0, %v1173_v25 }
  0x3e   : > { %1089 = vmatmul.mubr.msk.bf16.gmra.mrb[20].mxu0 %vm438_vm0, %v1174_v26  ;;  %1121 = vmatmul.mubr.msk.bf16.gmra.mrb[20].mxu1 %vm438_vm0, %v1175_v27 }
  0x3f   : > { %1092 = vmatprep.mubr.msk.bf16.mxu0 %vm438_vm0, %v1176_v28  ;;  %1124 = vmatprep.mubr.msk.bf16.mxu1 %vm438_vm0, %v1177_v29 }
  0x46   : > { %1093 = vmatmul.mubr.msk.bf16.gmra.mrb[24].mxu0 %vm438_vm0, %v1178_v30  ;;  %1125 = vmatmul.mubr.msk.bf16.gmra.mrb[24].mxu1 %vm438_vm0, %v1179_v31 }
  0x47   : > { %1096 = vmatprep.mubr.msk.bf16.mxu0 %vm438_vm0, %v1180_v32  ;;  %1128 = vmatprep.mubr.msk.bf16.mxu1 %vm438_vm0, %v1181_v33 }
  0x4e   : > { %1097 = vmatmul.mubr.msk.bf16.gmra.mrb[28].mxu0 %vm438_vm0, %v1182_v34  ;;  %1129 = vmatmul.mubr.msk.bf16.gmra.mrb[28].mxu1 %vm438_vm0, %v1183_v35 }
  0xe9   : > { %v1070_v37 = vpop.f32.mrb[0].mxu0  ;;  %v1102_v38 = vpop.f32.mrb[0].mxu1 }
  0xea   : > { %v578_v39 = vadd.f32 %v1070_v37, %v1308_v36  ;;  %v706_v40 = vadd.f32 %v1102_v38, %v1308_v36  ;;  %v569_v41 = vpop.f32.mrb[1].mxu0  ;;  %v697_v42 = vpop.f32.mrb[1].mxu1 }
  0xeb   : > { %v570_v43 = vadd.f32 %v1308_v36, %v569_v41  ;;  %v698_v44 = vadd.f32 %v1308_v36, %v697_v42  ;;  %v1071_v45 = vpop.f32.mrb[2].mxu0  ;;  %v1103_v46 = vpop.f32.mrb[2].mxu1 }
  0xec   : > { %826 = vst [vmem:[%s1313_s5 + $0x10] sm:$0xff] %v578_v39  ;;  %858 = vst [vmem:[%s1313_s5 + $0x110] sm:$0xff] %v706_v40  ;;  %v581_v47 = vadd.f32 %v1071_v45, %v1308_v36  ;;  %v709_v48 = vadd.f32 %v1103_v46, %v1308_v36  ;;  %v572_v49 = vpop.f32.mrb[3].mxu0  ;;  %v700_v50 = vpop.f32.mrb[3].mxu1 }
  0xed   : > { %824 = vst [vmem:[%s1313_s5] sm:$0xff] %v570_v43  ;;  %856 = vst [vmem:[%s1313_s5 + $0x100] sm:$0xff] %v698_v44  ;;  %v573_v51 = vadd.f32 %v1308_v36, %v572_v49  ;;  %v701_v52 = vadd.f32 %v1308_v36, %v700_v50 }
  0xee   : > { %827 = vst [vmem:[%s1313_s5 + $0x18] sm:$0xff] %v581_v47  ;;  %859 = vst [vmem:[%s1313_s5 + $0x118] sm:$0xff] %v709_v48 }
  0xef   : > { %825 = vst [vmem:[%s1313_s5 + $0x8] sm:$0xff] %v573_v51  ;;  %857 = vst [vmem:[%s1313_s5 + $0x108] sm:$0xff] %v701_v52 }
  0xf1   : > { %v1074_v53 = vpop.f32.mrb[4].mxu0  ;;  %v1106_v54 = vpop.f32.mrb[4].mxu1 }
  0xf2   : > { %v594_v55 = vadd.f32 %v1074_v53, %v1308_v36  ;;  %v722_v56 = vadd.f32 %v1106_v54, %v1308_v36  ;;  %v585_v57 = vpop.f32.mrb[5].mxu0  ;;  %v713_v58 = vpop.f32.mrb[5].mxu1 }
  0xf3   : > { %v586_v59 = vadd.f32 %v1308_v36, %v585_v57  ;;  %v714_v60 = vadd.f32 %v1308_v36, %v713_v58  ;;  %v1075_v61 = vpop.f32.mrb[6].mxu0  ;;  %v1107_v62 = vpop.f32.mrb[6].mxu1 }
  0xf4   : > { %830 = vst [vmem:[%s1313_s5 + $0x30] sm:$0xff] %v594_v55  ;;  %862 = vst [vmem:[%s1313_s5 + $0x130] sm:$0xff] %v722_v56  ;;  %v597_v63 = vadd.f32 %v1075_v61, %v1308_v36  ;;  %v725_v0 = vadd.f32 %v1107_v62, %v1308_v36  ;;  %v588_v1 = vpop.f32.mrb[7].mxu0  ;;  %v716_v2 = vpop.f32.mrb[7].mxu1 }
  0xf5   : > { %828 = vst [vmem:[%s1313_s5 + $0x20] sm:$0xff] %v586_v59  ;;  %860 = vst [vmem:[%s1313_s5 + $0x120] sm:$0xff] %v714_v60  ;;  %v589_v3 = vadd.f32 %v1308_v36, %v588_v1  ;;  %v717_v4 = vadd.f32 %v1308_v36, %v716_v2 }
  0xf6   : > { %831 = vst [vmem:[%s1313_s5 + $0x38] sm:$0xff] %v597_v63  ;;  %863 = vst [vmem:[%s1313_s5 + $0x138] sm:$0xff] %v725_v0 }
  0xf7   : > { %829 = vst [vmem:[%s1313_s5 + $0x28] sm:$0xff] %v589_v3  ;;  %861 = vst [vmem:[%s1313_s5 + $0x128] sm:$0xff] %v717_v4 }
  0xf9   : > { %v1078_v5 = vpop.f32.mrb[8].mxu0  ;;  %v1110_v6 = vpop.f32.mrb[8].mxu1 }
  0xfa   : > { %v610_v7 = vadd.f32 %v1078_v5, %v1308_v36  ;;  %v738_v8 = vadd.f32 %v1110_v6, %v1308_v36  ;;  %v601_v9 = vpop.f32.mrb[9].mxu0  ;;  %v729_v10 = vpop.f32.mrb[9].mxu1 }
  0xfb   : > { %v602_v11 = vadd.f32 %v1308_v36, %v601_v9  ;;  %v730_v12 = vadd.f32 %v1308_v36, %v729_v10  ;;  %v1079_v13 = vpop.f32.mrb[10].mxu0  ;;  %v1111_v14 = vpop.f32.mrb[10].mxu1 }
  0xfc   : > { %834 = vst [vmem:[%s1313_s5 + $0x50] sm:$0xff] %v610_v7  ;;  %866 = vst [vmem:[%s1313_s5 + $0x150] sm:$0xff] %v738_v8  ;;  %v613_v15 = vadd.f32 %v1079_v13, %v1308_v36  ;;  %v741_v16 = vadd.f32 %v1111_v14, %v1308_v36  ;;  %v604_v17 = vpop.f32.mrb[11].mxu0  ;;  %v732_v18 = vpop.f32.mrb[11].mxu1 }
  0xfd   : > { %832 = vst [vmem:[%s1313_s5 + $0x40] sm:$0xff] %v602_v11  ;;  %864 = vst [vmem:[%s1313_s5 + $0x140] sm:$0xff] %v730_v12  ;;  %v605_v19 = vadd.f32 %v1308_v36, %v604_v17  ;;  %v733_v20 = vadd.f32 %v1308_v36, %v732_v18 }
  0xfe   : > { %835 = vst [vmem:[%s1313_s5 + $0x58] sm:$0xff] %v613_v15  ;;  %867 = vst [vmem:[%s1313_s5 + $0x158] sm:$0xff] %v741_v16 }
  0xff   : > { %833 = vst [vmem:[%s1313_s5 + $0x48] sm:$0xff] %v605_v19  ;;  %865 = vst [vmem:[%s1313_s5 + $0x148] sm:$0xff] %v733_v20 }
 0x101   : > { %v1082_v21 = vpop.f32.mrb[12].mxu0  ;;  %v1114_v22 = vpop.f32.mrb[12].mxu1 }
 0x102   : > { %v626_v23 = vadd.f32 %v1082_v21, %v1308_v36  ;;  %v754_v24 = vadd.f32 %v1114_v22, %v1308_v36  ;;  %v617_v25 = vpop.f32.mrb[13].mxu0  ;;  %v745_v26 = vpop.f32.mrb[13].mxu1 }
 0x103   : > { %v618_v27 = vadd.f32 %v1308_v36, %v617_v25  ;;  %v746_v28 = vadd.f32 %v1308_v36, %v745_v26  ;;  %v1083_v29 = vpop.f32.mrb[14].mxu0  ;;  %v1115_v30 = vpop.f32.mrb[14].mxu1 }
 0x104   : > { %838 = vst [vmem:[%s1313_s5 + $0x70] sm:$0xff] %v626_v23  ;;  %870 = vst [vmem:[%s1313_s5 + $0x170] sm:$0xff] %v754_v24  ;;  %v629_v31 = vadd.f32 %v1083_v29, %v1308_v36  ;;  %v757_v32 = vadd.f32 %v1115_v30, %v1308_v36  ;;  %v620_v33 = vpop.f32.mrb[15].mxu0  ;;  %v748_v34 = vpop.f32.mrb[15].mxu1 }
 0x105   : > { %836 = vst [vmem:[%s1313_s5 + $0x60] sm:$0xff] %v618_v27  ;;  %868 = vst [vmem:[%s1313_s5 + $0x160] sm:$0xff] %v746_v28  ;;  %v621_v35 = vadd.f32 %v1308_v36, %v620_v33  ;;  %v749_v37 = vadd.f32 %v1308_v36, %v748_v34 }
 0x106   : > { %839 = vst [vmem:[%s1313_s5 + $0x78] sm:$0xff] %v629_v31  ;;  %871 = vst [vmem:[%s1313_s5 + $0x178] sm:$0xff] %v757_v32 }
 0x107   : > { %837 = vst [vmem:[%s1313_s5 + $0x68] sm:$0xff] %v621_v35  ;;  %869 = vst [vmem:[%s1313_s5 + $0x168] sm:$0xff] %v749_v37 }
 0x109   : > { %v1086_v38 = vpop.f32.mrb[16].mxu0  ;;  %v1118_v39 = vpop.f32.mrb[16].mxu1 }
 0x10a   : > { %v642_v40 = vadd.f32 %v1086_v38, %v1308_v36  ;;  %v770_v41 = vadd.f32 %v1118_v39, %v1308_v36  ;;  %v633_v42 = vpop.f32.mrb[17].mxu0  ;;  %v761_v43 = vpop.f32.mrb[17].mxu1 }
 0x10b   : > { %v634_v44 = vadd.f32 %v1308_v36, %v633_v42  ;;  %v762_v45 = vadd.f32 %v1308_v36, %v761_v43  ;;  %v1087_v46 = vpop.f32.mrb[18].mxu0  ;;  %v1119_v47 = vpop.f32.mrb[18].mxu1 }
 0x10c   : > { %842 = vst [vmem:[%s1313_s5 + $0x90] sm:$0xff] %v642_v40  ;;  %874 = vst [vmem:[%s1313_s5 + $0x190] sm:$0xff] %v770_v41  ;;  %v645_v48 = vadd.f32 %v1087_v46, %v1308_v36  ;;  %v773_v49 = vadd.f32 %v1119_v47, %v1308_v36  ;;  %v636_v50 = vpop.f32.mrb[19].mxu0  ;;  %v764_v51 = vpop.f32.mrb[19].mxu1 }
 0x10d   : > { %840 = vst [vmem:[%s1313_s5 + $0x80] sm:$0xff] %v634_v44  ;;  %872 = vst [vmem:[%s1313_s5 + $0x180] sm:$0xff] %v762_v45  ;;  %v637_v52 = vadd.f32 %v1308_v36, %v636_v50  ;;  %v765_v53 = vadd.f32 %v1308_v36, %v764_v51 }
 0x10e   : > { %843 = vst [vmem:[%s1313_s5 + $0x98] sm:$0xff] %v645_v48  ;;  %875 = vst [vmem:[%s1313_s5 + $0x198] sm:$0xff] %v773_v49 }
 0x10f   : > { %841 = vst [vmem:[%s1313_s5 + $0x88] sm:$0xff] %v637_v52  ;;  %873 = vst [vmem:[%s1313_s5 + $0x188] sm:$0xff] %v765_v53 }
 0x111   : > { %v1090_v54 = vpop.f32.mrb[20].mxu0  ;;  %v1122_v55 = vpop.f32.mrb[20].mxu1 }
 0x112   : > { %v658_v56 = vadd.f32 %v1090_v54, %v1308_v36  ;;  %v786_v57 = vadd.f32 %v1122_v55, %v1308_v36  ;;  %v649_v58 = vpop.f32.mrb[21].mxu0  ;;  %v777_v59 = vpop.f32.mrb[21].mxu1 }
 0x113   : > { %v650_v60 = vadd.f32 %v1308_v36, %v649_v58  ;;  %v778_v61 = vadd.f32 %v1308_v36, %v777_v59  ;;  %v1091_v62 = vpop.f32.mrb[22].mxu0  ;;  %v1123_v63 = vpop.f32.mrb[22].mxu1 }
 0x114   : > { %846 = vst [vmem:[%s1313_s5 + $0xb0] sm:$0xff] %v658_v56  ;;  %878 = vst [vmem:[%s1313_s5 + $0x1b0] sm:$0xff] %v786_v57  ;;  %v661_v0 = vadd.f32 %v1091_v62, %v1308_v36  ;;  %v789_v1 = vadd.f32 %v1123_v63, %v1308_v36  ;;  %v652_v2 = vpop.f32.mrb[23].mxu0  ;;  %v780_v3 = vpop.f32.mrb[23].mxu1 }
 0x115   : > { %844 = vst [vmem:[%s1313_s5 + $0xa0] sm:$0xff] %v650_v60  ;;  %876 = vst [vmem:[%s1313_s5 + $0x1a0] sm:$0xff] %v778_v61  ;;  %v653_v4 = vadd.f32 %v1308_v36, %v652_v2  ;;  %v781_v5 = vadd.f32 %v1308_v36, %v780_v3 }
 0x116   : > { %847 = vst [vmem:[%s1313_s5 + $0xb8] sm:$0xff] %v661_v0  ;;  %879 = vst [vmem:[%s1313_s5 + $0x1b8] sm:$0xff] %v789_v1 }
 0x117   : > { %845 = vst [vmem:[%s1313_s5 + $0xa8] sm:$0xff] %v653_v4  ;;  %877 = vst [vmem:[%s1313_s5 + $0x1a8] sm:$0xff] %v781_v5 }
 0x119   : > { %v1094_v6 = vpop.f32.mrb[24].mxu0  ;;  %v1126_v7 = vpop.f32.mrb[24].mxu1 }
 0x11a   : > { %v674_v8 = vadd.f32 %v1094_v6, %v1308_v36  ;;  %v802_v9 = vadd.f32 %v1126_v7, %v1308_v36  ;;  %v665_v10 = vpop.f32.mrb[25].mxu0  ;;  %v793_v11 = vpop.f32.mrb[25].mxu1 }
 0x11b   : > { %v666_v12 = vadd.f32 %v1308_v36, %v665_v10  ;;  %v794_v13 = vadd.f32 %v1308_v36, %v793_v11  ;;  %v1095_v14 = vpop.f32.mrb[26].mxu0  ;;  %v1127_v15 = vpop.f32.mrb[26].mxu1 }
 0x11c   : > { %850 = vst [vmem:[%s1313_s5 + $0xd0] sm:$0xff] %v674_v8  ;;  %882 = vst [vmem:[%s1313_s5 + $0x1d0] sm:$0xff] %v802_v9  ;;  %v677_v16 = vadd.f32 %v1095_v14, %v1308_v36  ;;  %v805_v17 = vadd.f32 %v1127_v15, %v1308_v36  ;;  %v668_v18 = vpop.f32.mrb[27].mxu0  ;;  %v796_v19 = vpop.f32.mrb[27].mxu1 }
 0x11d   : > { %848 = vst [vmem:[%s1313_s5 + $0xc0] sm:$0xff] %v666_v12  ;;  %880 = vst [vmem:[%s1313_s5 + $0x1c0] sm:$0xff] %v794_v13  ;;  %v669_v20 = vadd.f32 %v1308_v36, %v668_v18  ;;  %v797_v21 = vadd.f32 %v1308_v36, %v796_v19 }
 0x11e   : > { %851 = vst [vmem:[%s1313_s5 + $0xd8] sm:$0xff] %v677_v16  ;;  %883 = vst [vmem:[%s1313_s5 + $0x1d8] sm:$0xff] %v805_v17 }
 0x11f   : > { %849 = vst [vmem:[%s1313_s5 + $0xc8] sm:$0xff] %v669_v20  ;;  %881 = vst [vmem:[%s1313_s5 + $0x1c8] sm:$0xff] %v797_v21 }
 0x121   : > { %v1098_v22 = vpop.f32.mrb[28].mxu0  ;;  %v1130_v23 = vpop.f32.mrb[28].mxu1 }
 0x122   : > { %v690_v24 = vadd.f32 %v1098_v22, %v1308_v36  ;;  %v818_v25 = vadd.f32 %v1130_v23, %v1308_v36  ;;  %v681_v26 = vpop.f32.mrb[29].mxu0  ;;  %v809_v27 = vpop.f32.mrb[29].mxu1 }
 0x123   : > { %v682_v28 = vadd.f32 %v1308_v36, %v681_v26  ;;  %v810_v29 = vadd.f32 %v1308_v36, %v809_v27  ;;  %v1099_v30 = vpop.f32.mrb[30].mxu0  ;;  %v1131_v31 = vpop.f32.mrb[30].mxu1 }
 0x124   : > { %854 = vst [vmem:[%s1313_s5 + $0xf0] sm:$0xff] %v690_v24  ;;  %886 = vst [vmem:[%s1313_s5 + $0x1f0] sm:$0xff] %v818_v25  ;;  %v693_v32 = vadd.f32 %v1099_v30, %v1308_v36  ;;  %v821_v33 = vadd.f32 %v1131_v31, %v1308_v36  ;;  %v684_v34 = vpop.f32.mrb[31].mxu0  ;;  %v812_v35 = vpop.f32.mrb[31].mxu1 }
 0x125   : > { %852 = vst [vmem:[%s1313_s5 + $0xe0] sm:$0xff] %v682_v28  ;;  %884 = vst [vmem:[%s1313_s5 + $0x1e0] sm:$0xff] %v810_v29  ;;  %v685_v37 = vadd.f32 %v1308_v36, %v684_v34  ;;  %v813_v38 = vadd.f32 %v1308_v36, %v812_v35 }
 0x126   : > { %855 = vst [vmem:[%s1313_s5 + $0xf8] sm:$0xff] %v693_v32  ;;  %887 = vst [vmem:[%s1313_s5 + $0x1f8] sm:$0xff] %v821_v33 }
 0x127   : > { %853 = vst [vmem:[%s1313_s5 + $0xe8] sm:$0xff] %v685_v37  ;;  %885 = vst [vmem:[%s1313_s5 + $0x1e8] sm:$0xff] %v813_v38 }
 0x128 PF: > { %s13_s12 = sadd.s32 1, %s1190_s12  }
 0x129   : > { %p10_p4 = scmp.ge.s32.totalorder %s13_s12, 4  }
 0x12b   :  { %12 = sbr.rel (!%p10_p4) target bundleno = 1 (0x1), region = 62 }

</bundles_post_ra>
